<compile_context>
chip_gen: v7x
topology: tpu7x:2x2x1
jax: 0.10.0
libtpu: 0.0.40
codegen_flags: <defaults>
</compile_context>

<pallas_src>
import jax
import jax.numpy as jnp
from jax.experimental import pallas as pl
from jax.experimental.pallas import tpu as pltpu

EMBED_DIM = 8
N_DENSE = 13                           # I1..I13
N_SPARSE = 26                          # C1..C26
FLAT_EMBED = N_SPARSE * EMBED_DIM      # 208
INPUT_DIM = N_DENSE + EMBED_DIM        # 21
HIDDEN_UNITS = [64, 32]                # DNN hidden layers (input_dim prepended)
BN_EPS = 1e-5

assert EMBED_DIM > 0 and (EMBED_DIM & (EMBED_DIM - 1)) == 0  # power of two


def _round_up(x, m):
    return ((x + m - 1) // m) * m


# ---- Packed-parameter slab layout: one f32 (PP_ROWS, PP_COLS) array --------
# Row segments start on 8-row (sublane) boundaries.
_R_W1A = 0                                         # (8, 64)  BN-folded
_R_W1B = _R_W1A + EMBED_DIM                        # (13, 64) BN-folded
_R_W2 = _round_up(_R_W1B + N_DENSE, 8)             # (64, 32)
_R_WF = _round_up(_R_W2 + HIDDEN_UNITS[0], 8)      # (32, 1)
_R_BIAS = _round_up(_R_WF + HIDDEN_UNITS[1], 8)    # rows: b1, b2, bf
PP_ROWS = _round_up(_R_BIAS + 3, 8)                # 128
PP_COLS = max(HIDDEN_UNITS[0], HIDDEN_UNITS[1], 1)  # 64

# Robustness: every packed segment must fit the slab width (review note).
assert HIDDEN_UNITS[0] <= PP_COLS and HIDDEN_UNITS[1] <= PP_COLS and 1 <= PP_COLS


# --------------------------------------------------------------------------
# Kernel
# --------------------------------------------------------------------------
def nfm_kernel(eflat_ref, dense_ref, pp_ref, out_ref):
    h0, h1 = HIDDEN_UNITS

    # ---- Bi-interaction pooling on the MXU ----
    # s = E @ M, sq = (E*E) @ M with M[k, d] = (k % EMBED_DIM == d), i.e. the
    # per-dimension sums over the 26 fields.  Keeps the reduction off the XLU
    # and the embedding input lane-dense.  M is a structural constant, built
    # from iota (EMBED_DIM is a power of two -> bitwise AND).
    e = eflat_ref[...].astype(jnp.float32)                          # (TB, 208)
    kk = jax.lax.broadcasted_iota(jnp.int32, (FLAT_EMBED, EMBED_DIM), 0)
    dd = jax.lax.broadcasted_iota(jnp.int32, (FLAT_EMBED, EMBED_DIM), 1)
    pool = jnp.where((kk & (EMBED_DIM - 1)) == dd, 1.0, 0.0).astype(jnp.float32)
    s = jnp.dot(e, pool, preferred_element_type=jnp.float32)        # (TB, 8)
    sq = jnp.dot(e * e, pool, preferred_element_type=jnp.float32)   # (TB, 8)
    cross = 0.5 * (s * s - sq)                                      # (TB, 8)
    dense = dense_ref[...]                                          # (TB, 13)

    # ---- Packed parameter slab (inference BN already folded in) ----
    w1a = pp_ref[_R_W1A:_R_W1A + EMBED_DIM, 0:h0]                   # (8, 64)
    w1b = pp_ref[_R_W1B:_R_W1B + N_DENSE, 0:h0]                     # (13, 64)
    w2 = pp_ref[_R_W2:_R_W2 + h0, 0:h1]                             # (64, 32)
    wf = pp_ref[_R_WF:_R_WF + h1, 0:1]                              # (32, 1)
    b1 = pp_ref[_R_BIAS:_R_BIAS + 1, 0:h0]                          # (1, 64)
    b2 = pp_ref[_R_BIAS + 1:_R_BIAS + 2, 0:h1]                      # (1, 32)
    bf = pp_ref[_R_BIAS + 2:_R_BIAS + 3, 0:1]                       # (1, 1)

    # ---- DNN: (BN folded) Linear(21->64)+ReLU, Linear(64->32)+ReLU ----
    # concat([cross, dense]) is realized by splitting the first Linear weight.
    h = (jnp.dot(cross, w1a, preferred_element_type=jnp.float32)
         + jnp.dot(dense, w1b, preferred_element_type=jnp.float32)
         + b1)                                                      # (TB, 64)
    h = jnp.maximum(h, 0.0)
    h = jnp.dot(h, w2, preferred_element_type=jnp.float32) + b2
    h = jnp.maximum(h, 0.0)                                         # (TB, 32)
    # (Dropout p=0.0 in the reference -> identity.)

    # ---- Final Linear(32->1) + sigmoid ----
    logits = jnp.dot(h, wf, preferred_element_type=jnp.float32) + bf
    out_ref[...] = jax.nn.sigmoid(logits)                           # (TB, 1)


# --------------------------------------------------------------------------
# Wrapper / parameter preparation
# --------------------------------------------------------------------------
def fold_and_pack_params(params):
    """Fold inference-mode BatchNorm into the (split) first Linear and pack
    every weight/bias into a single (PP_ROWS, PP_COLS) f32 slab.
    Mathematically identical to BN(eval) followed by the Linears."""
    h0, h1 = HIDDEN_UNITS
    scale_c = params["gamma_c"] * jax.lax.rsqrt(params["rv_c"] + BN_EPS)   # (1, 8)
    shift_c = params["beta_c"] - params["rm_c"] * scale_c
    scale_d = params["gamma_d"] * jax.lax.rsqrt(params["rv_d"] + BN_EPS)   # (1, 13)
    shift_d = params["beta_d"] - params["rm_d"] * scale_d

    w1a_f = params["w1a"] * scale_c.T                                      # (8, 64)
    w1b_f = params["w1b"] * scale_d.T                                      # (13, 64)
    b1_f = params["b1"] + shift_c @ params["w1a"] + shift_d @ params["w1b"]  # (1, 64)

    pp = jnp.zeros((PP_ROWS, PP_COLS), jnp.float32)
    pp = pp.at[_R_W1A:_R_W1A + EMBED_DIM, :h0].set(w1a_f)
    pp = pp.at[_R_W1B:_R_W1B + N_DENSE, :h0].set(w1b_f)
    pp = pp.at[_R_W2:_R_W2 + h0, :h1].set(params["w2"])
    pp = pp.at[_R_WF:_R_WF + h1, :1].set(params["wf"])
    pp = pp.at[_R_BIAS, :h0].set(b1_f[0])
    pp = pp.at[_R_BIAS + 1, :h1].set(params["b2"][0])
    pp = pp.at[_R_BIAS + 2, :1].set(params["bf"][0])
    return pp


def nfm_forward(sparse_embeds, x_dense, params, block_b=4096,
                embed_dtype=jnp.bfloat16):
    """sparse_embeds: (B, 26, 8) f32; x_dense: (B, 13) f32 -> (B, 1) f32.

    embed_dtype: dtype of the flattened embedding stream fed to the kernel.
    bf16 halves the dominant HBM stream (MLP math stays f32); pass
    jnp.float32 for bit-level agreement with the f32 reference."""
    B = x_dense.shape[0]

    # Batch tile: large enough to amortize the ~0.35 us per-grid-step pipeline
    # overhead, capped at 4096 rows (VMEM headroom on v7x's 64 MiB) and capped
    # so the "parallel" batch axis keeps >= 2 grid steps (two v7x TensorCores)
    # whenever the batch allows it.
    block_b = max(8, min(block_b, 4096, B))
    if B >= 16:
        block_b = min(block_b, _round_up(pl.cdiv(B, 2), 8))
    block_b = _round_up(block_b, 8)
    Bp = _round_up(B, block_b)
    num_steps = Bp // block_b

    eflat = sparse_embeds.reshape(B, FLAT_EMBED).astype(embed_dtype)
    dense = x_dense.astype(jnp.float32)
    if Bp != B:
        eflat = jnp.pad(eflat, ((0, Bp - B), (0, 0)))
        dense = jnp.pad(dense, ((0, Bp - B), (0, 0)))

    pp = fold_and_pack_params(params)

    # Scoped-VMEM budget from the actual (lane-padded) buffer sizes plus the
    # in-kernel f32 temporaries, with headroom; stays well under v7x's 64 MiB
    # physical VMEM and above the 16 MiB v5e default.
    ebytes = jnp.dtype(embed_dtype).itemsize
    buf_bytes = block_b * (2 * FLAT_EMBED * ebytes   # eflat, double-buffered
                           + 2 * 128 * 4             # dense (lane-padded)
                           + 2 * 128 * 4)            # out   (lane-padded)
    buf_bytes += 2 * PP_ROWS * 128 * 4               # resident param slab
    tmp_bytes = 3 * block_b * FLAT_EMBED * 4         # e / e*e f32 temporaries
    vmem_limit = int(min(56 << 20, max(32 << 20, buf_bytes + tmp_bytes + (4 << 20))))

    in_specs = [
        pl.BlockSpec((block_b, FLAT_EMBED), lambda i: (i, 0)),
        pl.BlockSpec((block_b, N_DENSE), lambda i: (i, 0)),
        # Constant block index -> packed parameter slab is DMA'd once and
        # stays resident in VMEM across grid steps.
        pl.BlockSpec((PP_ROWS, PP_COLS), lambda i: (0, 0)),
    ]

    out = pl.pallas_call(
        nfm_kernel,
        out_shape=jax.ShapeDtypeStruct((Bp, 1), jnp.float32),
        grid=(num_steps,),
        in_specs=in_specs,
        out_specs=pl.BlockSpec((block_b, 1), lambda i: (i, 0)),
        compiler_params=pltpu.CompilerParams(
            dimension_semantics=("parallel",),
            vmem_limit_bytes=vmem_limit),
    )(eflat, dense, pp)
    return out[:B]


# --------------------------------------------------------------------------
# Parameter init / embedding glue / pure-JAX reference
# --------------------------------------------------------------------------
def init_params(key, sparse_fea_list):
    """Init mimicking PyTorch defaults (N(0,1) embeddings, U(+-1/sqrt(fan_in))
    linears) plus non-trivial BatchNorm running stats / affine so the folding
    path is actually exercised."""
    keys = jax.random.split(key, N_SPARSE + 7)
    tables = [jax.random.normal(keys[i], (sparse_fea_list[i], EMBED_DIM),
                                dtype=jnp.float32)
              for i in range(N_SPARSE)]

    def linear_init(k, fan_in, fan_out):
        kw, kb = jax.random.split(k)
        bound = 1.0 / jnp.sqrt(float(fan_in))
        w = jax.random.uniform(kw, (fan_in, fan_out), jnp.float32, -bound, bound)
        b = jax.random.uniform(kb, (1, fan_out), jnp.float32, -bound, bound)
        return w, b

    w1, b1 = linear_init(keys[N_SPARSE + 0], INPUT_DIM, HIDDEN_UNITS[0])
    w2, b2 = linear_init(keys[N_SPARSE + 1], HIDDEN_UNITS[0], HIDDEN_UNITS[1])
    wf, bf = linear_init(keys[N_SPARSE + 2], HIDDEN_UNITS[1], 1)

    kg, kb_, km, kv = keys[N_SPARSE + 3:N_SPARSE + 7]
    gamma = jax.random.uniform(kg, (1, INPUT_DIM), jnp.float32, 0.5, 1.5)
    beta = 0.1 * jax.random.normal(kb_, (1, INPUT_DIM), dtype=jnp.float32)
    rm = 0.1 * jax.random.normal(km, (1, INPUT_DIM), dtype=jnp.float32)
    rv = jax.random.uniform(kv, (1, INPUT_DIM), jnp.float32, 0.5, 1.5)

    params = {
        # BatchNorm split into cross (first 8) / dense (last 13) parts.
        "gamma_c": gamma[:, :EMBED_DIM], "gamma_d": gamma[:, EMBED_DIM:],
        "beta_c": beta[:, :EMBED_DIM], "beta_d": beta[:, EMBED_DIM:],
        "rm_c": rm[:, :EMBED_DIM], "rm_d": rm[:, EMBED_DIM:],
        "rv_c": rv[:, :EMBED_DIM], "rv_d": rv[:, EMBED_DIM:],
        # First Linear split to match concat([embed_cross, x_dense]) order.
        "w1a": w1[:EMBED_DIM, :],      # (8, 64)
        "w1b": w1[EMBED_DIM:, :],      # (13, 64)
        "b1": b1,                      # (1, 64)
        "w2": w2, "b2": b2,            # (64, 32), (1, 32)
        "wf": wf, "bf": bf,            # (32, 1), (1, 1)
    }
    return tables, params


def embed_lookup(tables, x_sparse):
    """Glue: gather 26 embeddings -> (B, 26, 8) (XLA gather, outside kernel)."""
    cols = [tables[i][x_sparse[:, i]] for i in range(N_SPARSE)]
    return jnp.stack(cols, axis=1).astype(jnp.float32)


def reference_forward(sparse_embeds, x_dense, params):
    """Pure-JAX reference reproducing the PyTorch forward (inference BN)."""
    s = jnp.sum(sparse_embeds, axis=1)
    sq = jnp.sum(sparse_embeds ** 2, axis=1)
    cross = 0.5 * (s * s - sq)
    x = jnp.concatenate([cross, x_dense], axis=-1)
    gamma = jnp.concatenate([params["gamma_c"], params["gamma_d"]], axis=-1)
    beta = jnp.concatenate([params["beta_c"], params["beta_d"]], axis=-1)
    rm = jnp.concatenate([params["rm_c"], params["rm_d"]], axis=-1)
    rv = jnp.concatenate([params["rv_c"], params["rv_d"]], axis=-1)
    x = (x - rm) * (gamma * jax.lax.rsqrt(rv + BN_EPS)) + beta
    w1 = jnp.concatenate([params["w1a"], params["w1b"]], axis=0)
    h = jnp.maximum(x @ w1 + params["b1"], 0.0)
    h = jnp.maximum(h @ params["w2"] + params["b2"], 0.0)
    return jax.nn.sigmoid(h @ params["wf"] + params["bf"])


if __name__ == "__main__":
    B = 1000          # non-multiple of the tile: exercises padding; 2 grid steps
    sparse_fea_list = [20 + i for i in range(N_SPARSE)]   # per-feature vocab sizes

    key = jax.random.PRNGKey(0)
    k_params, k_dense, k_sparse = jax.random.split(key, 3)

    tables, params = init_params(k_params, sparse_fea_list)

    x_dense = jax.random.normal(k_dense, (B, N_DENSE), dtype=jnp.float32)
    ks = jax.random.split(k_sparse, N_SPARSE)
    x_sparse = jnp.stack(
        [jax.random.randint(ks[i], (B,), 0, sparse_fea_list[i], dtype=jnp.int32)
         for i in range(N_SPARSE)], axis=1)               # (B, 26)

    sparse_embeds = embed_lookup(tables, x_sparse)        # (B, 26, 8) f32

    # Default path: bf16 embedding stream.
    out = nfm_forward(sparse_embeds, x_dense, params)
    out = jax.block_until_ready(out)
    assert out.shape == (B, 1)

    # 1) Kernel math exactness vs a reference fed the same bf16-rounded
    #    embeddings (the only quantization the kernel introduces).
    embeds_q = sparse_embeds.astype(jnp.bfloat16).astype(jnp.float32)
    ref_q = reference_forward(embeds_q, x_dense, params)
    err_q = float(jnp.max(jnp.abs(out - ref_q)))
    assert jnp.allclose(out, ref_q, atol=1e-4, rtol=1e-4), err_q

    # 2) End-to-end vs the full-f32 reference (bf16 input quantization noise only).
    ref = reference_forward(sparse_embeds, x_dense, params)
    err = float(jnp.max(jnp.abs(out - ref)))
    assert jnp.allclose(out, ref, atol=3e-2, rtol=3e-2), err

    # 3) f32 embedding path matches the f32 reference tightly.
    out_f32 = nfm_forward(sparse_embeds, x_dense, params, embed_dtype=jnp.float32)
    out_f32 = jax.block_until_ready(out_f32)
    err_f32 = float(jnp.max(jnp.abs(out_f32 - ref)))
    assert jnp.allclose(out_f32, ref, atol=1e-4, rtol=1e-4), err_f32

    print("KERNEL_OK")
</pallas_src>

<mosaic_0001>
module attributes {stable_mosaic.version = 11 : i64} {
  func.func @nfm_kernel(%arg0: i32, %arg1: memref<504x208xbf16, #tpu.memory_space<vmem>>, %arg2: memref<504x13xf32, #tpu.memory_space<vmem>>, %arg3: memref<128x64xf32, #tpu.memory_space<vmem>>, %arg4: memref<504x1xf32, #tpu.memory_space<vmem>>) attributes {dimension_semantics = [#tpu.dimension_semantics<parallel>], iteration_bounds = array<i64: 2>, scalar_prefetch = 0 : i64, scratch_operands = 0 : i64, tpu.core_type = #tpu.core_type<tc>, window_params = [{transform_indices = @transform_0, window_bounds = array<i64: 504, 208>}, {transform_indices = @transform_1, window_bounds = array<i64: 504, 13>}, {pipeline_mode = #tpu.pipeline_mode<synchronous>, transform_indices = @transform_2, window_bounds = array<i64: 128, 64>}, {transform_indices = @transform_3, window_bounds = array<i64: 504, 1>}]} {
    %c0 = arith.constant 0 : index
    %c0_0 = arith.constant 0 : index
    %0 = vector.load %arg1[%c0, %c0_0] : memref<504x208xbf16, #tpu.memory_space<vmem>>, vector<504x208xbf16>
    %1 = arith.extf %0 : vector<504x208xbf16> to vector<504x208xf32>
    %2 = tpu.iota {dimensions = array<i32: 0>} : vector<208x8xi32>
    %3 = tpu.iota {dimensions = array<i32: 1>} : vector<208x8xi32>
    %c7_i32 = arith.constant 7 : i32
    %4 = vector.broadcast %c7_i32 : i32 to vector<208x8xi32>
    %5 = arith.andi %2, %4 : vector<208x8xi32>
    %6 = arith.cmpi eq, %5, %3 : vector<208x8xi32>
    %cst = arith.constant 1.000000e+00 : f32
    %cst_1 = arith.constant 0.000000e+00 : f32
    %7 = vector.broadcast %cst : f32 to vector<208x8xf32>
    %8 = vector.broadcast %cst_1 : f32 to vector<208x8xf32>
    %9 = arith.select %6, %7, %8 : vector<208x8xi1>, vector<208x8xf32>
    %cst_2 = arith.constant dense<0.000000e+00> : vector<504x8xf32>
    %10 = tpu.matmul %1, %9, %cst_2 {dimension_numbers = #tpu.dot_dimension_numbers<[1], [0], [0], [1], [0, 0, 1, 1], [], []>} : vector<504x208xf32>, vector<208x8xf32>, vector<504x8xf32> -> vector<504x8xf32>
    %11 = arith.mulf %1, %1 : vector<504x208xf32>
    %cst_3 = arith.constant dense<0.000000e+00> : vector<504x8xf32>
    %12 = tpu.matmul %11, %9, %cst_3 {dimension_numbers = #tpu.dot_dimension_numbers<[1], [0], [0], [1], [0, 0, 1, 1], [], []>} : vector<504x208xf32>, vector<208x8xf32>, vector<504x8xf32> -> vector<504x8xf32>
    %13 = arith.mulf %10, %10 : vector<504x8xf32>
    %14 = arith.subf %13, %12 : vector<504x8xf32>
    %cst_4 = arith.constant 5.000000e-01 : f32
    %15 = vector.broadcast %cst_4 : f32 to vector<504x8xf32>
    %16 = arith.mulf %15, %14 : vector<504x8xf32>
    %c0_5 = arith.constant 0 : index
    %c0_6 = arith.constant 0 : index
    %17 = vector.load %arg2[%c0_5, %c0_6] : memref<504x13xf32, #tpu.memory_space<vmem>>, vector<504x13xf32>
    %c0_7 = arith.constant 0 : index
    %c0_8 = arith.constant 0 : index
    %18 = vector.load %arg3[%c0_7, %c0_8] : memref<128x64xf32, #tpu.memory_space<vmem>>, vector<8x64xf32>
    %c8 = arith.constant 8 : index
    %c0_9 = arith.constant 0 : index
    %19 = vector.load %arg3[%c8, %c0_9] : memref<128x64xf32, #tpu.memory_space<vmem>>, vector<13x64xf32>
    %c24 = arith.constant 24 : index
    %c0_10 = arith.constant 0 : index
    %20 = vector.load %arg3[%c24, %c0_10] : memref<128x64xf32, #tpu.memory_space<vmem>>, vector<64x32xf32>
    %c88 = arith.constant 88 : index
    %c0_11 = arith.constant 0 : index
    %21 = vector.load %arg3[%c88, %c0_11] : memref<128x64xf32, #tpu.memory_space<vmem>>, vector<32x1xf32>
    %c120 = arith.constant 120 : index
    %c0_12 = arith.constant 0 : index
    %22 = vector.load %arg3[%c120, %c0_12] : memref<128x64xf32, #tpu.memory_space<vmem>>, vector<1x64xf32>
    %c121 = arith.constant 121 : index
    %c0_13 = arith.constant 0 : index
    %23 = vector.load %arg3[%c121, %c0_13] : memref<128x64xf32, #tpu.memory_space<vmem>>, vector<1x32xf32>
    %c122 = arith.constant 122 : index
    %c0_14 = arith.constant 0 : index
    %24 = vector.load %arg3[%c122, %c0_14] : memref<128x64xf32, #tpu.memory_space<vmem>>, vector<1x1xf32>
    %cst_15 = arith.constant dense<0.000000e+00> : vector<504x64xf32>
    %25 = tpu.matmul %16, %18, %cst_15 {dimension_numbers = #tpu.dot_dimension_numbers<[1], [0], [0], [1], [0, 0, 1, 1], [], []>} : vector<504x8xf32>, vector<8x64xf32>, vector<504x64xf32> -> vector<504x64xf32>
    %cst_16 = arith.constant dense<0.000000e+00> : vector<504x64xf32>
    %26 = tpu.matmul %17, %19, %cst_16 {dimension_numbers = #tpu.dot_dimension_numbers<[1], [0], [0], [1], [0, 0, 1, 1], [], []>} : vector<504x13xf32>, vector<13x64xf32>, vector<504x64xf32> -> vector<504x64xf32>
    %27 = arith.addf %25, %26 : vector<504x64xf32>
    %28 = vector.broadcast %22 : vector<1x64xf32> to vector<504x64xf32>
    %29 = arith.addf %27, %28 : vector<504x64xf32>
    %cst_17 = arith.constant 0.000000e+00 : f32
    %30 = vector.broadcast %cst_17 : f32 to vector<504x64xf32>
    %31 = arith.maximumf %29, %30 : vector<504x64xf32>
    %cst_18 = arith.constant dense<0.000000e+00> : vector<504x32xf32>
    %32 = tpu.matmul %31, %20, %cst_18 {dimension_numbers = #tpu.dot_dimension_numbers<[1], [0], [0], [1], [0, 0, 1, 1], [], []>} : vector<504x64xf32>, vector<64x32xf32>, vector<504x32xf32> -> vector<504x32xf32>
    %33 = vector.broadcast %23 : vector<1x32xf32> to vector<504x32xf32>
    %34 = arith.addf %32, %33 : vector<504x32xf32>
    %cst_19 = arith.constant 0.000000e+00 : f32
    %35 = vector.broadcast %cst_19 : f32 to vector<504x32xf32>
    %36 = arith.maximumf %34, %35 : vector<504x32xf32>
    %cst_20 = arith.constant dense<0.000000e+00> : vector<504x1xf32>
    %37 = tpu.matmul %36, %21, %cst_20 {dimension_numbers = #tpu.dot_dimension_numbers<[1], [0], [0], [1], [0, 0, 1, 1], [], []>} : vector<504x32xf32>, vector<32x1xf32>, vector<504x1xf32> -> vector<504x1xf32>
    %38 = vector.broadcast %24 : vector<1x1xf32> to vector<504x1xf32>
    %39 = arith.addf %37, %38 : vector<504x1xf32>
    %40 = arith.negf %39 : vector<504x1xf32>
    %41 = math.exp %40 : vector<504x1xf32>
    %cst_21 = arith.constant 1.000000e+00 : f32
    %42 = vector.broadcast %cst_21 : f32 to vector<504x1xf32>
    %43 = arith.addf %42, %41 : vector<504x1xf32>
    %44 = arith.divf %42, %43 : vector<504x1xf32>
    %c0_22 = arith.constant 0 : index
    %c0_23 = arith.constant 0 : index
    %45 = vector.load %arg4[%c0_22, %c0_23] : memref<504x1xf32, #tpu.memory_space<vmem>>, vector<504x1xf32>
    tpu.vector_store %arg4[%c0_22, %c0_23], %44 {strides = array<i32>} : memref<504x1xf32, #tpu.memory_space<vmem>>, vector<504x1xf32>,
    return
  }
  func.func @transform_0(%arg0: i32) -> (i32, i32) {
    %c0_i32 = arith.constant 0 : i32
    %c0_i32_0 = arith.constant 0 : i32
    return %arg0, %c0_i32 : i32, i32
  }
  func.func @transform_1(%arg0: i32) -> (i32, i32) {
    %c0_i32 = arith.constant 0 : i32
    %c0_i32_0 = arith.constant 0 : i32
    return %arg0, %c0_i32 : i32, i32
  }
  func.func @transform_2(%arg0: i32) -> (i32, i32) {
    %c0_i32 = arith.constant 0 : i32
    %c0_i32_0 = arith.constant 0 : i32
    %c0_i32_1 = arith.constant 0 : i32
    return %c0_i32, %c0_i32_0 : i32, i32
  }
  func.func @transform_3(%arg0: i32) -> (i32, i32) {
    %c0_i32 = arith.constant 0 : i32
    %c0_i32_0 = arith.constant 0 : i32
    return %arg0, %c0_i32 : i32, i32
  }
}

</mosaic_0001>

<bundles_post_ra>
// kernel: tpu_custom_call.1
= control target key start
LH: loop header
LB: loop body
LE: loop exit
PB: predicated region body
PF: predicated region fallthrough
CT: control target
= control target key end

     0   :  { %s6987_s12 = smov 0   ;;  %s9398_s0 = inlined_call_operand.vmem [shape: bf16[1008,208], index: 0, kind: input, shape index: {}]   ;;  %s9399_s1 = inlined_call_operand.vmem [shape: f32[1008,13], index: 1, kind: input, shape index: {}]   ;;  %s9400_s2 = inlined_call_operand.vmem [shape: f32[128,64], index: 2, kind: input, shape index: {}]   ;;  %s9401_s3 = inlined_call_operand.vmem [shape: f32[1008,1], index: 3, kind: output, shape index: {}]  }
   0x1 LB: > { %s5025_s13 = sadd.s32 4294967295, %s6960_s12   ;;  %p5029_p0 = scmp.ge.s32.totalorder %s6960_s12, 1  ;;  %s6960_s12 = sphi %s6987_s12, %s13_s12  }
   0x2   : > { %p150_p1 = scmp.lt.s32.totalorder %s6960_s12, 3 }
   0x4   : > { %p151_p2 = pnand %p5029_p0, %p150_p1 }
   0x5   : > { %v388_v0 = vlaneseq (!%p151_p2)  ;;  %v6962_v1 = vmov (!%p151_p2), 0.0|0.0   ;;  %s180_s14 = smul.u32 (!%p151_p2), 63, %s5025_s13  ;;  %v6963_v19 = vmov (!%p151_p2), 1.0|1.0   ;;  %vm495_vm14 = vcmask (!%p151_p2), 654336  }
   0x6   : > { %154 = sbr.rel (%p151_p2) target bundleno = 1275 (0x4fb), region = 32  ;;  %6587 = vmatprep.subr.bf16.mxu0 (!%p151_p2), %v6962_v1  ;;  %6626 = vmatprep.subr.bf16.mxu1 (!%p151_p2), %v6962_v1 }
   0x7   : > { %v6997_v2 = vshrl.u32 (!%p151_p2), %v388_v0, 7  ;;  %v6999_v3 = vand.u32 (!%p151_p2), 127, %v388_v0  ;;  %p181_p3 = scmp.lt.s32.totalorder (!%p151_p2), %s180_s14, 125 }
   0x9   : > { %v390_v4 = vadd.s32 (!%p151_p2), 8, %v6997_v2  ;;  %v417_v5 = vand.u32 (!%p151_p2), 7, %v6997_v2  ;;  %v391_v6 = vadd.s32 (!%p151_p2), 16, %v6997_v2  ;;  %v392_v7 = vadd.s32 (!%p151_p2), 24, %v6997_v2 }
   0xa   : > { %v393_v8 = vadd.s32 (!%p151_p2), 32, %v6997_v2  ;;  %v394_v9 = vadd.s32 (!%p151_p2), 40, %v6997_v2  ;;  %v395_v14 = vadd.s32 (!%p151_p2), 48, %v6997_v2  ;;  %v396_v15 = vadd.s32 (!%p151_p2), 56, %v6997_v2 }
   0xb   : > { %v418_v10 = vand.u32 (!%p151_p2), 7, %v390_v4  ;;  %vm443_vm0 = vcmp.eq.s32.totalorder (!%p151_p2), %v417_v5, %v6999_v3  ;;  %v419_v11 = vand.u32 (!%p151_p2), 7, %v391_v6  ;;  %v420_v12 = vand.u32 (!%p151_p2), 7, %v392_v7 }
   0xc   : > { %v421_v13 = vand.u32 (!%p151_p2), 7, %v393_v8  ;;  %v422_v18 = vand.u32 (!%p151_p2), 7, %v394_v9  ;;  %v423_v20 = vand.u32 (!%p151_p2), 7, %v395_v14  ;;  %v424_v21 = vand.u32 (!%p151_p2), 7, %v396_v15 }
   0xd   : > { %vm444_vm1 = vcmp.eq.s32.totalorder %v418_v10, %v6999_v3  ;;  %vm7012_vm2 = vcmp.eq.s32.totalorder %v419_v11, %v6999_v3  ;;  %vm7017_vm3 = vcmp.eq.s32.totalorder %v420_v12, %v6999_v3  ;;  %s9443_s14 = smov (!%p181_p3, %s180_s14), 125  ;;  %v397_v24 = vadd.s32 64, %v6997_v2 }
   0xe   : > { %vm6588_vm4 = vmpackc.low %vm444_vm1, %vm443_vm0  ;;  %vm7030_vm6 = vcmp.eq.s32.totalorder %v421_v13, %v6999_v3  ;;  %vm7035_vm7 = vcmp.eq.s32.totalorder %v422_v18, %v6999_v3  ;;  %v398_v25 = vadd.s32 72, %v6997_v2  ;;  %s7041_s15 = sshll.u32 %s9443_s14, 3  ;;  %vm7052_vm9 = vcmp.eq.s32.totalorder %v423_v20, %v6999_v3  ;;  %v2013_v20 = vld [vmem:[%s9400_s2 + $0x8] sm:$0xff] }
   0xf   : > { %6589 = vmatpush1.bf16.msk.msra.mxu0 %vm6588_vm4, %v6963_v19  ;;  %6628 = vmatpush1.bf16.msk.msra.mxu1 %vm6588_vm4, %v6963_v19  ;;  %vm6591_vm5 = vmpackc.low %vm7017_vm3, %vm7012_vm2  ;;  %vm7057_vm10 = vcmp.eq.s32.totalorder %v424_v21, %v6999_v3  ;;  %v425_v28 = vand.u32 7, %v397_v24  ;;  %v399_v30 = vadd.s32 80, %v6997_v2  ;;  %v400_v31 = vadd.s32 88, %v6997_v2  ;;  %s7067_s18 = scalar_lea.vmem %s9398_s0, %s7041_s15  ;;  %s7495_s27 = scalar_lea.vmem %s9399_s1, %s7041_s15 }
  0x10   : > { %6590 = vmatprep.subr.bf16.mxu0 %v6962_v1  ;;  %6629 = vmatprep.subr.bf16.mxu1 %v6962_v1  ;;  %vm6594_vm8 = vmpackc.low %vm7035_vm7, %vm7030_vm6  ;;  %v426_v29 = vand.u32 7, %v398_v25  ;;  %v401_v32 = vadd.s32 96, %v6997_v2  ;;  %v402_v33 = vadd.s32 104, %v6997_v2  ;;  %v7080_v34 = vld [vmem:[%s7067_s18] sm:$0xff]  ;;  %v403_v41 = vadd.s32 112, %v6997_v2  ;;  %v200_v17 = vld [vmem:[%s7067_s18 + $0x8] sm:$0xff]  ;;  %s9195_s10 = scalar_lea.vmem %s9401_s3, %s7041_s15 }
  0x11   : > { %vm6597_vm11 = vmpackc.low %vm7057_vm10, %vm7052_vm9  ;;  %vm7083_vm12 = vcmp.eq.s32.totalorder %v425_v28, %v6999_v3  ;;  %v427_v37 = vand.u32 7, %v399_v30  ;;  %v428_v38 = vand.u32 7, %v400_v31  ;;  %v263_v39 = vunpack.c.h.bf16 %v7080_v34  ;;  %v201_v22 = vld [vmem:[%s7067_s18 + $0x10] sm:$0xff]  ;;  %v202_v28 = vld [vmem:[%s7067_s18 + $0x18] sm:$0xff] }
  0x12   : > { %vm7088_vm13 = vcmp.eq.s32.totalorder %v426_v29, %v6999_v3  ;;  %v429_v40 = vand.u32 7, %v401_v32  ;;  %v404_v42 = vadd.s32 120, %v6997_v2  ;;  %v430_v45 = vand.u32 7, %v402_v33  ;;  %v2012_v30 = vld [vmem:[%s9400_s2] sm:$0xff]  ;;  %v205_v44 = vld [vmem:[%s7067_s18 + $0x30] sm:$0xff]  ;;  %v206_v49 = vld [vmem:[%s7067_s18 + $0x38] sm:$0xff] }
  0x13   : > { %6592 = vmatpush1.bf16.msk.msra.mxu0 %vm6591_vm5, %v6963_v19  ;;  %6631 = vmatpush1.bf16.msk.msra.mxu1 %vm6591_vm5, %v6963_v19  ;;  %vm6600_vm15 = vmpackc.low %vm7088_vm13, %vm7083_vm12  ;;  %vm7104_vm0 = vcmp.eq.s32.totalorder %v427_v37, %v6999_v3  ;;  %vm7109_vm1 = vcmp.eq.s32.totalorder %v428_v38, %v6999_v3  ;;  %v1066_v46 = vmul.f32 %v263_v39, %v263_v39  ;;  %v431_v47 = vand.u32 7, %v403_v41  ;;  %v207_v54 = vld [vmem:[%s7067_s18 + $0x40] sm:$0xff] }
  0x14   : > { %6593 = vmatprep.subr.bf16.mxu0 %v6962_v1  ;;  %6632 = vmatprep.subr.bf16.mxu1 %v6962_v1  ;;  %vm6603_vm2 = vmpackc.low %vm7109_vm1, %vm7104_vm0  ;;  %v432_v48 = vand.u32 7, %v404_v42  ;;  %vm7123_vm3 = vcmp.eq.s32.totalorder %v429_v40, %v6999_v3  ;;  %vm7128_vm4 = vcmp.eq.s32.totalorder %v430_v45, %v6999_v3  ;;  %v405_v51 = vadd.s32 128, %v6997_v2 }
  0x15   : > { %5060 = vmatprep.mubr.msk.f32.mxu0 %vm495_vm14, %v263_v39  ;;  %v406_v52 = vadd.s32 136, %v6997_v2  ;;  %5149 = vmatprep.mubr.msk.f32.mxu1 %vm495_vm14, %v1066_v46  ;;  %vm6606_vm5 = vmpackc.low %vm7128_vm4, %vm7123_vm3  ;;  %vm7144_vm6 = vcmp.eq.s32.totalorder %v431_v47, %v6999_v3  ;;  %v407_v57 = vadd.s32 144, %v6997_v2  ;;  %v408_v58 = vadd.s32 152, %v6997_v2  ;;  %v204_v39 = vld [vmem:[%s7067_s18 + $0x28] sm:$0xff] }
  0x16   : > { %vm7149_vm7 = vcmp.eq.s32.totalorder %v432_v48, %v6999_v3  ;;  %v433_v55 = vand.u32 7, %v405_v51  ;;  %v409_v59 = vadd.s32 160, %v6997_v2  ;;  %v410_v60 = vadd.s32 168, %v6997_v2 }
  0x17   : > { %6595 = vmatpush1.bf16.msk.msra.mxu0 %vm6594_vm8, %v6963_v19  ;;  %6634 = vmatpush1.bf16.msk.msra.mxu1 %vm6594_vm8, %v6963_v19  ;;  %v434_v56 = vand.u32 7, %v406_v52  ;;  %vm6609_vm8 = vmpackc.low %vm7149_vm7, %vm7144_vm6  ;;  %v435_v63 = vand.u32 7, %v407_v57  ;;  %v436_v0 = vand.u32 7, %v408_v58  ;;  %v411_v4 = vadd.s32 176, %v6997_v2 }
  0x18   : > { %6596 = vmatprep.subr.bf16.mxu0 %v6962_v1  ;;  %6635 = vmatprep.subr.bf16.mxu1 %v6962_v1  ;;  %vm7166_vm9 = vcmp.eq.s32.totalorder %v433_v55, %v6999_v3  ;;  %v412_v5 = vadd.s32 184, %v6997_v2  ;;  %v437_v8 = vand.u32 7, %v409_v59  ;;  %v438_v9 = vand.u32 7, %v410_v60  ;;  %v208_v59 = vld [vmem:[%s7067_s18 + $0x48] sm:$0xff] }
  0x19   : > { %vm7171_vm10 = vcmp.eq.s32.totalorder %v434_v56, %v6999_v3  ;;  %vm7186_vm12 = vcmp.eq.s32.totalorder %v435_v63, %v6999_v3  ;;  %vm7191_vm13 = vcmp.eq.s32.totalorder %v436_v0, %v6999_v3  ;;  %v439_v10 = vand.u32 7, %v411_v4  ;;  %v209_v0 = vld [vmem:[%s7067_s18 + $0x50] sm:$0xff] }
  0x1a   : > { %v440_v11 = vand.u32 7, %v412_v5  ;;  %vm463_vm0 = vcmp.eq.s32.totalorder %v437_v8, %v6999_v3  ;;  %vm464_vm1 = vcmp.eq.s32.totalorder %v438_v9, %v6999_v3  ;;  %v413_v12 = vadd.s32 192, %v6997_v2  ;;  %v210_v8 = vld [vmem:[%s7067_s18 + $0x58] sm:$0xff] }
  0x1b   : > { %6598 = vmatpush1.bf16.msk.msra.mxu0 %vm6597_vm11, %v6963_v19  ;;  %6637 = vmatpush1.bf16.msk.msra.mxu1 %vm6597_vm11, %v6963_v19  ;;  %vm6612_vm11 = vmpackc.low %vm7171_vm10, %vm7166_vm9  ;;  %v414_v13 = vadd.s32 200, %v6997_v2  ;;  %vm465_vm3 = vcmp.eq.s32.totalorder %v439_v10, %v6999_v3  ;;  %v262_v18 = vunpack.c.l.bf16 %v7080_v34  ;;  %v265_v21 = vunpack.c.h.bf16 %v200_v17  ;;  %v203_v34 = vld [vmem:[%s7067_s18 + $0x20] sm:$0xff] }
  0x1c   : > { %6599 = vmatprep.subr.bf16.mxu0 %v6962_v1  ;;  %6638 = vmatprep.subr.bf16.mxu1 %v6962_v1  ;;  %vm466_vm4 = vcmp.eq.s32.totalorder %v440_v11, %v6999_v3  ;;  %v441_v14 = vand.u32 7, %v413_v12  ;;  %vm2220_vm9 = vcmask 1044480   ;;  %v264_v24 = vunpack.c.l.bf16 %v200_v17  ;;  %v212_v17 = vld [vmem:[%s7067_s18 + $0x68] sm:$0xff] }
  0x1d   : > { %v442_v15 = vand.u32 7, %v414_v13  ;;  %v1065_v23 = vmul.f32 %v262_v18, %v262_v18  ;;  %v267_v26 = vunpack.c.h.bf16 %v201_v22  ;;  %vm6964_vm10 = vmmov 1   ;;  %v211_v13 = vld [vmem:[%s7067_s18 + $0x60] sm:$0xff] }
  0x1e   : > { %vm7218_vm6 = vcmp.eq.s32.totalorder %v441_v14, %v6999_v3  ;;  %v1068_v27 = vmul.f32 %v265_v21, %v265_v21  ;;  %v6965_v29 = vmov 0.0   ;;  %v1067_v31 = vmul.f32 %v264_v24, %v264_v24 }
  0x1f   : > { %6601 = vmatpush1.bf16.msk.msra.mxu0 %vm6600_vm15, %v6963_v19  ;;  %6640 = vmatpush1.bf16.msk.msra.mxu1 %vm6600_vm15, %v6963_v19  ;;  %vm6615_vm15 = vmpackc.low %vm7191_vm13, %vm7186_vm12  ;;  %vm7223_vm7 = vcmp.eq.s32.totalorder %v442_v15, %v6999_v3  ;;  %v2014_v3 = vld [vmem:[%s9400_s2 + $0x10] sm:$0x1f]  ;;  %v1070_v32 = vmul.f32 %v267_v26, %v267_v26  ;;  %v269_v33 = vunpack.c.h.bf16 %v202_v28  ;;  %v268_v36 = vunpack.c.l.bf16 %v202_v28 }
  0x20   : > { %6602 = vmatprep.subr.bf16.mxu0 %v6962_v1  ;;  %6641 = vmatprep.subr.bf16.mxu1 %v6962_v1  ;;  %v6666_v25 = vpack.c.bf16 %v2014_v3, %v2013_v20  ;;  %v271_v38 = vunpack.c.h.bf16 %v203_v34  ;;  %v270_v41 = vunpack.c.l.bf16 %v203_v34  ;;  %v273_v43 = vunpack.c.h.bf16 %v204_v39 }
  0x21   : > { %v1072_v37 = vmul.f32 %v269_v33, %v269_v33  ;;  %v1071_v40 = vmul.f32 %v268_v36, %v268_v36  ;;  %v272_v46 = vunpack.c.l.bf16 %v204_v39  ;;  %v275_v48 = vunpack.c.h.bf16 %v205_v44 }
  0x22   : > { %v1074_v42 = vmul.f32 %v271_v38, %v271_v38  ;;  %v1073_v45 = vmul.f32 %v270_v41, %v270_v41  ;;  %v1076_v47 = vmul.f32 %v273_v43, %v273_v43  ;;  %v274_v51 = vunpack.c.l.bf16 %v205_v44 }
  0x23   : > { %6604 = vmatpush1.bf16.msk.msra.mxu0 %vm6603_vm2, %v6963_v19  ;;  %6643 = vmatpush1.bf16.msk.msra.mxu1 %vm6603_vm2, %v6963_v19  ;;  %vm6618_vm2 = vmpackc.low %vm464_vm1, %vm463_vm0  ;;  %v1075_v50 = vmul.f32 %v272_v46, %v272_v46  ;;  %v1078_v52 = vmul.f32 %v275_v48, %v275_v48  ;;  %v277_v53 = vunpack.c.h.bf16 %v206_v49  ;;  %v276_v56 = vunpack.c.l.bf16 %v206_v49 }
  0x24   : > { %6605 = vmatprep.subr.bf16.mxu0 %v6962_v1  ;;  %6644 = vmatprep.subr.bf16.mxu1 %v6962_v1  ;;  %v1077_v55 = vmul.f32 %v274_v51, %v274_v51  ;;  %v279_v58 = vunpack.c.h.bf16 %v207_v54  ;;  %v278_v61 = vunpack.c.l.bf16 %v207_v54  ;;  %v281_v63 = vunpack.c.h.bf16 %v208_v59 }
  0x25   : > { %v1080_v57 = vmul.f32 %v277_v53, %v277_v53  ;;  %v1079_v60 = vmul.f32 %v276_v56, %v276_v56  ;;  %v280_v5 = vunpack.c.l.bf16 %v208_v59  ;;  %v283_v7 = vunpack.c.h.bf16 %v209_v0 }
  0x26   : > { %v1082_v62 = vmul.f32 %v279_v58, %v279_v58  ;;  %v1081_v4 = vmul.f32 %v278_v61, %v278_v61  ;;  %v1084_v6 = vmul.f32 %v281_v63, %v281_v63  ;;  %v282_v10 = vunpack.c.l.bf16 %v209_v0 }
  0x27   : > { %6607 = vmatpush1.bf16.msk.msra.mxu0 %vm6606_vm5, %v6963_v19  ;;  %6646 = vmatpush1.bf16.msk.msra.mxu1 %vm6606_vm5, %v6963_v19  ;;  %vm6621_vm5 = vmpackc.low %vm466_vm4, %vm465_vm3  ;;  %v1083_v9 = vmul.f32 %v280_v5, %v280_v5  ;;  %v1086_v11 = vmul.f32 %v283_v7, %v283_v7  ;;  %v285_v12 = vunpack.c.h.bf16 %v210_v8  ;;  %v284_v15 = vunpack.c.l.bf16 %v210_v8 }
  0x28   : > { %6608 = vmatprep.subr.bf16.mxu0 %v6962_v1  ;;  %6647 = vmatprep.subr.bf16.mxu1 %v6962_v1  ;;  %v1085_v14 = vmul.f32 %v282_v10, %v282_v10  ;;  %v287_v16 = vunpack.c.h.bf16 %v211_v13  ;;  %v286_v20 = vunpack.c.l.bf16 %v211_v13  ;;  %vm2030_vm12 = vcmask 105472  }
  0x29   : > { %v1088_v2 = vmul.f32 %v285_v12, %v285_v12  ;;  %vm2604_vm13 = vcmask 64512   ;;  %vm3945_vm0 = vcmask 261120   ;;  %vm4893_vm1 = vcmask 7168  }
  0x2a   : > { %v1090_v3 = vmul.f32 %v287_v16, %v287_v16 }
  0x2b   : > { %6610 = vmatpush1.bf16.msk.msra.mxu0 %vm6609_vm8, %v6963_v19  ;;  %6649 = vmatpush1.bf16.msk.msra.mxu1 %vm6609_vm8, %v6963_v19  ;;  %vm6624_vm8 = vmpackc.low %vm7223_vm7, %vm7218_vm6 }
  0x2c   : > { %6611 = vmatprep.subr.bf16.mxu0 %v6962_v1  ;;  %6650 = vmatprep.subr.bf16.mxu1 %v6962_v1 }
  0x2f   : > { %6613 = vmatpush1.bf16.msk.msra.mxu0 %vm6612_vm11, %v6963_v19  ;;  %6652 = vmatpush1.bf16.msk.msra.mxu1 %vm6612_vm11, %v6963_v19  ;;  %vm6667_vm11 = vmpackc.low %vm2220_vm9, %vm6964_vm10 }
  0x30   : > { %6614 = vmatprep.subr.bf16.mxu0 %v6962_v1  ;;  %6653 = vmatprep.subr.bf16.mxu1 %v6962_v1 }
  0x33   : > { %6616 = vmatpush1.bf16.msk.msra.mxu0 %vm6615_vm15, %v6963_v19  ;;  %6655 = vmatpush1.bf16.msk.msra.mxu1 %vm6615_vm15, %v6963_v19  ;;  %vm3308_vm15 = vcmask 523264  }
  0x34   : > { %6617 = vmatprep.subr.bf16.mxu0 %v6962_v1  ;;  %6656 = vmatprep.subr.bf16.mxu1 %v6962_v1 }
  0x37   : > { %6619 = vmatpush1.bf16.msk.msra.mxu0 %vm6618_vm2, %v6963_v19  ;;  %6658 = vmatpush1.bf16.msk.msra.mxu1 %vm6618_vm2, %v6963_v19 }
  0x38   : > { %6620 = vmatprep.subr.bf16.mxu0 %v6962_v1  ;;  %6659 = vmatprep.subr.bf16.mxu1 %v6962_v1 }
  0x3b   : > { %6622 = vmatpush1.bf16.msk.msra.mxu0 %vm6621_vm5, %v6963_v19  ;;  %6661 = vmatpush1.bf16.msk.msra.mxu1 %vm6621_vm5, %v6963_v19 }
  0x3c   : > { %6623 = vmatprep.subr.bf16.mxu0 %v6962_v1  ;;  %6662 = vmatprep.subr.bf16.mxu1 %v6962_v1 }
  0x3f   : > { %6625 = vmatpush1.bf16.msk.msra.mxu0 %vm6624_vm8, %v6963_v19  ;;  %6664 = vmatpush1.bf16.msk.msra.mxu1 %vm6624_vm8, %v6963_v19  ;;  %v266_v19 = vunpack.c.l.bf16 %v201_v22  ;;  %v213_v22 = vld [vmem:[%s7067_s18 + $0x70] sm:$0xff] }
  0x40   : > { %6665 = vmatprep.subr.bf16.mxu0 %v6962_v1  ;;  %5994 = vmatprep.subr.mxu1 %v6965_v29 }
  0x41   : > { %v1069_v35 = vmul.f32 %v266_v19, %v266_v19 }
  0x42   : > { %750 = vmatmul.mubr.f32.vlgmr.msra.gmra.mrb[0].mxu0 %v262_v18  ;;  %1445 = vmatmul.mubr.f32.vlgmr.msra.gmra.mrb[0].mxu1 %v1065_v23  ;;  %v1087_v18 = vmul.f32 %v284_v15, %v284_v15  ;;  %v1089_v23 = vmul.f32 %v286_v20, %v286_v20 }
  0x43   : > { %6668 = vmatpush3.bf16.msk.msra.mxu0 %vm6667_vm11, %v6666_v25  ;;  %5061 = vmatprep.mubr.msk.f32.mxu0 %vm495_vm14, %v265_v21  ;;  %v289_v21 = vunpack.c.h.bf16 %v212_v17 }
  0x44   : > { %5150 = vmatprep.mubr.msk.f32.mxu1 %vm495_vm14, %v1068_v27  ;;  %5995 = vmatpush3.msra.mxu1 %v2012_v30  ;;  %v214_v27 = vld [vmem:[%s7067_s18 + $0x78] sm:$0xff]  ;;  %v290_v30 = vunpack.c.l.bf16 %v213_v22 }
  0x45   : > { %6669 = vmatprep.subr.bf16.mxu0 %v6962_v1  ;;  %6681 = vmatprep.subr.bf16.mxu1 %v6962_v1  ;;  %v1092_v25 = vmul.f32 %v289_v21, %v289_v21  ;;  %v292_v34 = vunpack.c.l.bf16 %v214_v27 }
  0x46   : > { %755 = vmatmul.mubr.f32.gmra.mrb[2].mxu0 %v264_v24  ;;  %1450 = vmatmul.mubr.f32.gmra.mrb[2].mxu1 %v1067_v31  ;;  %v288_v24 = vunpack.c.l.bf16 %v212_v17 }
  0x47   : > { %5062 = vmatprep.mubr.msk.f32.mxu0 %vm495_vm14, %v267_v26  ;;  %5151 = vmatprep.mubr.msk.f32.mxu1 %vm495_vm14, %v1070_v32  ;;  %v291_v26 = vunpack.c.h.bf16 %v213_v22  ;;  %v215_v32 = vld [vmem:[%s7067_s18 + $0x80] sm:$0xff] }
  0x48   : > { %v1091_v28 = vmul.f32 %v288_v24, %v288_v24  ;;  %v294_v39 = vunpack.c.l.bf16 %v215_v32 }
  0x49   : > { %v1094_v31 = vmul.f32 %v291_v26, %v291_v26 }
  0x4a   : > { %760 = vmatmul.mubr.f32.gmra.mrb[4].mxu0 %v266_v19  ;;  %1455 = vmatmul.mubr.f32.gmra.mrb[4].mxu1 %v1069_v35  ;;  %v293_v19 = vunpack.c.h.bf16 %v214_v27 }
  0x4b   : > { %5063 = vmatprep.mubr.msk.f32.mxu0 %vm495_vm14, %v269_v33  ;;  %5152 = vmatprep.mubr.msk.f32.mxu1 %vm495_vm14, %v1072_v37  ;;  %v1093_v33 = vmul.f32 %v290_v30, %v290_v30  ;;  %v216_v37 = vld [vmem:[%s7067_s18 + $0x88] sm:$0xff] }
  0x4c   : > { %v1096_v35 = vmul.f32 %v293_v19, %v293_v19  ;;  %v296_v44 = vunpack.c.l.bf16 %v216_v37 }
  0x4e   : > { %765 = vmatmul.mubr.f32.gmra.mrb[6].mxu0 %v268_v36  ;;  %1460 = vmatmul.mubr.f32.gmra.mrb[6].mxu1 %v1071_v40  ;;  %v295_v36 = vunpack.c.h.bf16 %v215_v32 }
  0x4f   : > { %5064 = vmatprep.mubr.msk.f32.mxu0 %vm495_vm14, %v271_v38  ;;  %5153 = vmatprep.mubr.msk.f32.mxu1 %vm495_vm14, %v1074_v42  ;;  %v1095_v38 = vmul.f32 %v292_v34, %v292_v34  ;;  %v217_v42 = vld [vmem:[%s7067_s18 + $0x90] sm:$0xff] }
  0x50   : > { %v1098_v40 = vmul.f32 %v295_v36, %v295_v36  ;;  %v298_v49 = vunpack.c.l.bf16 %v217_v42 }
  0x52   : > { %770 = vmatmul.mubr.f32.gmra.mrb[8].mxu0 %v270_v41  ;;  %1465 = vmatmul.mubr.f32.gmra.mrb[8].mxu1 %v1073_v45  ;;  %v297_v41 = vunpack.c.h.bf16 %v216_v37 }
  0x53   : > { %5065 = vmatprep.mubr.msk.f32.mxu0 %vm495_vm14, %v273_v43  ;;  %5154 = vmatprep.mubr.msk.f32.mxu1 %vm495_vm14, %v1076_v47  ;;  %v1097_v43 = vmul.f32 %v294_v39, %v294_v39  ;;  %v218_v47 = vld [vmem:[%s7067_s18 + $0x98] sm:$0xff] }
  0x54   : > { %v1100_v45 = vmul.f32 %v297_v41, %v297_v41  ;;  %v300_v54 = vunpack.c.l.bf16 %v218_v47 }
  0x56   : > { %775 = vmatmul.mubr.f32.gmra.mrb[10].mxu0 %v272_v46  ;;  %1470 = vmatmul.mubr.f32.gmra.mrb[10].mxu1 %v1075_v50  ;;  %v299_v46 = vunpack.c.h.bf16 %v217_v42 }
  0x57   : > { %5066 = vmatprep.mubr.msk.f32.mxu0 %vm495_vm14, %v275_v48  ;;  %5155 = vmatprep.mubr.msk.f32.mxu1 %vm495_vm14, %v1078_v52  ;;  %v1099_v48 = vmul.f32 %v296_v44, %v296_v44  ;;  %v219_v52 = vld [vmem:[%s7067_s18 + $0xa0] sm:$0xff] }
  0x58   : > { %v1102_v50 = vmul.f32 %v299_v46, %v299_v46  ;;  %v302_v59 = vunpack.c.l.bf16 %v219_v52 }
  0x5a   : > { %780 = vmatmul.mubr.f32.gmra.mrb[12].mxu0 %v274_v51  ;;  %1475 = vmatmul.mubr.f32.gmra.mrb[12].mxu1 %v1077_v55  ;;  %v301_v51 = vunpack.c.h.bf16 %v218_v47 }
  0x5b   : > { %5067 = vmatprep.mubr.msk.f32.mxu0 %vm495_vm14, %v277_v53  ;;  %5156 = vmatprep.mubr.msk.f32.mxu1 %vm495_vm14, %v1080_v57  ;;  %v1101_v53 = vmul.f32 %v298_v49, %v298_v49  ;;  %v220_v57 = vld [vmem:[%s7067_s18 + $0xa8] sm:$0xff] }
  0x5c   : > { %v1104_v55 = vmul.f32 %v301_v51, %v301_v51  ;;  %v304_v0 = vunpack.c.l.bf16 %v220_v57 }
  0x5e   : > { %785 = vmatmul.mubr.f32.gmra.mrb[14].mxu0 %v276_v56  ;;  %1480 = vmatmul.mubr.f32.gmra.mrb[14].mxu1 %v1079_v60  ;;  %v303_v56 = vunpack.c.h.bf16 %v219_v52 }
  0x5f   : > { %5068 = vmatprep.mubr.msk.f32.mxu0 %vm495_vm14, %v279_v58  ;;  %5157 = vmatprep.mubr.msk.f32.mxu1 %vm495_vm14, %v1082_v62  ;;  %v1103_v58 = vmul.f32 %v300_v54, %v300_v54  ;;  %v221_v62 = vld [vmem:[%s7067_s18 + $0xb0] sm:$0xff] }
  0x60   : > { %v1106_v60 = vmul.f32 %v303_v56, %v303_v56  ;;  %v306_v8 = vunpack.c.l.bf16 %v221_v62 }
  0x62   : > { %790 = vmatmul.mubr.f32.gmra.mrb[16].mxu0 %v278_v61  ;;  %1485 = vmatmul.mubr.f32.gmra.mrb[16].mxu1 %v1081_v4  ;;  %v305_v61 = vunpack.c.h.bf16 %v220_v57 }
  0x63   : > { %5069 = vmatprep.mubr.msk.f32.mxu0 %vm495_vm14, %v281_v63  ;;  %5158 = vmatprep.mubr.msk.f32.mxu1 %vm495_vm14, %v1084_v6  ;;  %v1105_v63 = vmul.f32 %v302_v59, %v302_v59  ;;  %v222_v6 = vld [vmem:[%s7067_s18 + $0xb8] sm:$0xff] }
  0x64   : > { %v1108_v4 = vmul.f32 %v305_v61, %v305_v61  ;;  %v308_v13 = vunpack.c.l.bf16 %v222_v6 }
  0x66   : > { %795 = vmatmul.mubr.f32.gmra.mrb[18].mxu0 %v280_v5  ;;  %1490 = vmatmul.mubr.f32.gmra.mrb[18].mxu1 %v1083_v9  ;;  %v307_v5 = vunpack.c.h.bf16 %v221_v62 }
  0x67   : > { %5070 = vmatprep.mubr.msk.f32.mxu0 %vm495_vm14, %v283_v7  ;;  %5159 = vmatprep.mubr.msk.f32.mxu1 %vm495_vm14, %v1086_v11  ;;  %v1107_v7 = vmul.f32 %v304_v0, %v304_v0  ;;  %v223_v11 = vld [vmem:[%s7067_s18 + $0xc0] sm:$0xff] }
  0x68   : > { %v1110_v9 = vmul.f32 %v307_v5, %v307_v5  ;;  %v310_v17 = vunpack.c.l.bf16 %v223_v11 }
  0x6a   : > { %800 = vmatmul.mubr.f32.gmra.mrb[20].mxu0 %v282_v10  ;;  %1495 = vmatmul.mubr.f32.gmra.mrb[20].mxu1 %v1085_v14  ;;  %v309_v10 = vunpack.c.h.bf16 %v222_v6 }
  0x6b   : > { %5071 = vmatprep.mubr.msk.f32.mxu0 %vm495_vm14, %v285_v12  ;;  %5160 = vmatprep.mubr.msk.f32.mxu1 %vm495_vm14, %v1088_v2  ;;  %v1109_v12 = vmul.f32 %v306_v8, %v306_v8  ;;  %v224_v2 = vld [vmem:[%s7067_s18 + $0xc8] sm:$0xff] }
  0x6c   : > { %v1112_v14 = vmul.f32 %v309_v10, %v309_v10  ;;  %v312_v22 = vunpack.c.l.bf16 %v224_v2 }
  0x6e   : > { %805 = vmatmul.mubr.f32.gmra.mrb[22].mxu0 %v284_v15  ;;  %1500 = vmatmul.mubr.f32.gmra.mrb[22].mxu1 %v1087_v18  ;;  %v311_v15 = vunpack.c.h.bf16 %v223_v11 }
  0x6f   : > { %5072 = vmatprep.mubr.msk.f32.mxu0 %vm495_vm14, %v287_v16  ;;  %5161 = vmatprep.mubr.msk.f32.mxu1 %vm495_vm14, %v1090_v3  ;;  %v1111_v16 = vmul.f32 %v308_v13, %v308_v13  ;;  %v225_v3 = vld [vmem:[%s7067_s18 + $0xd0] sm:$0xff] }
  0x70   : > { %v1114_v18 = vmul.f32 %v311_v15, %v311_v15  ;;  %v314_v27 = vunpack.c.l.bf16 %v225_v3 }
  0x72   : > { %810 = vmatmul.mubr.f32.gmra.mrb[24].mxu0 %v286_v20  ;;  %1505 = vmatmul.mubr.f32.gmra.mrb[24].mxu1 %v1089_v23  ;;  %v313_v20 = vunpack.c.h.bf16 %v224_v2 }
  0x73   : > { %5073 = vmatprep.mubr.msk.f32.mxu0 %vm495_vm14, %v289_v21  ;;  %5162 = vmatprep.mubr.msk.f32.mxu1 %vm495_vm14, %v1092_v25  ;;  %v1113_v21 = vmul.f32 %v310_v17, %v310_v17  ;;  %v226_v25 = vld [vmem:[%s7067_s18 + $0xd8] sm:$0xff] }
  0x74   : > { %v1116_v23 = vmul.f32 %v313_v20, %v313_v20  ;;  %v316_v32 = vunpack.c.l.bf16 %v226_v25 }
  0x76   : > { %815 = vmatmul.mubr.f32.gmra.mrb[26].mxu0 %v288_v24  ;;  %1510 = vmatmul.mubr.f32.gmra.mrb[26].mxu1 %v1091_v28  ;;  %v315_v24 = vunpack.c.h.bf16 %v225_v3 }
  0x77   : > { %5074 = vmatprep.mubr.msk.f32.mxu0 %vm495_vm14, %v291_v26  ;;  %5163 = vmatprep.mubr.msk.f32.mxu1 %vm495_vm14, %v1094_v31  ;;  %v1115_v26 = vmul.f32 %v312_v22, %v312_v22  ;;  %v227_v31 = vld [vmem:[%s7067_s18 + $0xe0] sm:$0xff] }
  0x78   : > { %v1118_v28 = vmul.f32 %v315_v24, %v315_v24  ;;  %v318_v37 = vunpack.c.l.bf16 %v227_v31 }
  0x7a   : > { %820 = vmatmul.mubr.f32.gmra.mrb[28].mxu0 %v290_v30  ;;  %1515 = vmatmul.mubr.f32.gmra.mrb[28].mxu1 %v1093_v33  ;;  %v317_v30 = vunpack.c.h.bf16 %v226_v25 }
  0x7b   : > { %5075 = vmatprep.mubr.msk.f32.mxu0 %vm495_vm14, %v293_v19  ;;  %5164 = vmatprep.mubr.msk.f32.mxu1 %vm495_vm14, %v1096_v35  ;;  %v1117_v19 = vmul.f32 %v314_v27, %v314_v27  ;;  %v228_v35 = vld [vmem:[%s7067_s18 + $0xe8] sm:$0xff] }
  0x7c   : > { %v1120_v33 = vmul.f32 %v317_v30, %v317_v30  ;;  %v320_v42 = vunpack.c.l.bf16 %v228_v35 }
  0x7e   : > { %825 = vmatmul.mubr.f32.gmra.mrb[30].mxu0 %v292_v34  ;;  %1520 = vmatmul.mubr.f32.gmra.mrb[30].mxu1 %v1095_v38  ;;  %v319_v34 = vunpack.c.h.bf16 %v227_v31 }
  0x7f   : > { %5076 = vmatprep.mubr.msk.f32.mxu0 %vm495_vm14, %v295_v36  ;;  %5165 = vmatprep.mubr.msk.f32.mxu1 %vm495_vm14, %v1098_v40  ;;  %v1119_v36 = vmul.f32 %v316_v32, %v316_v32  ;;  %v229_v40 = vld [vmem:[%s7067_s18 + $0xf0] sm:$0xff] }
  0x80   : > { %v1122_v38 = vmul.f32 %v319_v34, %v319_v34  ;;  %v322_v47 = vunpack.c.l.bf16 %v229_v40 }
  0x82   : > { %830 = vmatmul.mubr.f32.gmra.mrb[32].mxu0 %v294_v39  ;;  %1525 = vmatmul.mubr.f32.gmra.mrb[32].mxu1 %v1097_v43  ;;  %v321_v39 = vunpack.c.h.bf16 %v228_v35 }
  0x83   : > { %5077 = vmatprep.mubr.msk.f32.mxu0 %vm495_vm14, %v297_v41  ;;  %5166 = vmatprep.mubr.msk.f32.mxu1 %vm495_vm14, %v1100_v45  ;;  %v1121_v41 = vmul.f32 %v318_v37, %v318_v37  ;;  %v230_v45 = vld [vmem:[%s7067_s18 + $0xf8] sm:$0xff] }
  0x84   : > { %v1124_v43 = vmul.f32 %v321_v39, %v321_v39  ;;  %v324_v52 = vunpack.c.l.bf16 %v230_v45 }
  0x86   : > { %835 = vmatmul.mubr.f32.gmra.mrb[34].mxu0 %v296_v44  ;;  %1530 = vmatmul.mubr.f32.gmra.mrb[34].mxu1 %v1099_v48  ;;  %v323_v44 = vunpack.c.h.bf16 %v229_v40 }
  0x87   : > { %5078 = vmatprep.mubr.msk.f32.mxu0 %vm495_vm14, %v299_v46  ;;  %5167 = vmatprep.mubr.msk.f32.mxu1 %vm495_vm14, %v1102_v50  ;;  %v1123_v46 = vmul.f32 %v320_v42, %v320_v42  ;;  %v231_v50 = vld [vmem:[%s7067_s18 + $0x100] sm:$0xff] }
  0x88   : > { %v1126_v48 = vmul.f32 %v323_v44, %v323_v44  ;;  %v326_v57 = vunpack.c.l.bf16 %v231_v50 }
  0x8a   : > { %840 = vmatmul.mubr.f32.gmra.mrb[36].mxu0 %v298_v49  ;;  %1535 = vmatmul.mubr.f32.gmra.mrb[36].mxu1 %v1101_v53  ;;  %v325_v49 = vunpack.c.h.bf16 %v230_v45 }
  0x8b   : > { %5079 = vmatprep.mubr.msk.f32.mxu0 %vm495_vm14, %v301_v51  ;;  %5168 = vmatprep.mubr.msk.f32.mxu1 %vm495_vm14, %v1104_v55  ;;  %v1125_v51 = vmul.f32 %v322_v47, %v322_v47  ;;  %v232_v55 = vld [vmem:[%s7067_s18 + $0x108] sm:$0xff] }
  0x8c   : > { %v1128_v53 = vmul.f32 %v325_v49, %v325_v49  ;;  %v328_v62 = vunpack.c.l.bf16 %v232_v55 }
  0x8e   : > { %845 = vmatmul.mubr.f32.gmra.mrb[38].mxu0 %v300_v54  ;;  %1540 = vmatmul.mubr.f32.gmra.mrb[38].mxu1 %v1103_v58  ;;  %v327_v54 = vunpack.c.h.bf16 %v231_v50 }
  0x8f   : > { %5080 = vmatprep.mubr.msk.f32.mxu0 %vm495_vm14, %v303_v56  ;;  %5169 = vmatprep.mubr.msk.f32.mxu1 %vm495_vm14, %v1106_v60  ;;  %v1127_v56 = vmul.f32 %v324_v52, %v324_v52  ;;  %v233_v60 = vld [vmem:[%s7067_s18 + $0x110] sm:$0xff] }
  0x90   : > { %v1130_v58 = vmul.f32 %v327_v54, %v327_v54  ;;  %v330_v6 = vunpack.c.l.bf16 %v233_v60 }
  0x92   : > { %850 = vmatmul.mubr.f32.gmra.mrb[40].mxu0 %v302_v59  ;;  %1545 = vmatmul.mubr.f32.gmra.mrb[40].mxu1 %v1105_v63  ;;  %v329_v59 = vunpack.c.h.bf16 %v232_v55 }
  0x93   : > { %5081 = vmatprep.mubr.msk.f32.mxu0 %vm495_vm14, %v305_v61  ;;  %5170 = vmatprep.mubr.msk.f32.mxu1 %vm495_vm14, %v1108_v4  ;;  %v1129_v61 = vmul.f32 %v326_v57, %v326_v57  ;;  %v234_v4 = vld [vmem:[%s7067_s18 + $0x118] sm:$0xff] }
  0x94   : > { %v1132_v63 = vmul.f32 %v329_v59, %v329_v59  ;;  %v332_v11 = vunpack.c.l.bf16 %v234_v4 }
  0x96   : > { %855 = vmatmul.mubr.f32.gmra.mrb[42].mxu0 %v304_v0  ;;  %1550 = vmatmul.mubr.f32.gmra.mrb[42].mxu1 %v1107_v7  ;;  %v331_v0 = vunpack.c.h.bf16 %v233_v60 }
  0x97   : > { %5082 = vmatprep.mubr.msk.f32.mxu0 %vm495_vm14, %v307_v5  ;;  %5171 = vmatprep.mubr.msk.f32.mxu1 %vm495_vm14, %v1110_v9  ;;  %v1131_v5 = vmul.f32 %v328_v62, %v328_v62  ;;  %v235_v9 = vld [vmem:[%s7067_s18 + $0x120] sm:$0xff] }
  0x98   : > { %v1134_v7 = vmul.f32 %v331_v0, %v331_v0  ;;  %v334_v2 = vunpack.c.l.bf16 %v235_v9 }
  0x9a   : > { %860 = vmatmul.mubr.f32.gmra.mrb[44].mxu0 %v306_v8  ;;  %1555 = vmatmul.mubr.f32.gmra.mrb[44].mxu1 %v1109_v12  ;;  %v333_v8 = vunpack.c.h.bf16 %v234_v4 }
  0x9b   : > { %5083 = vmatprep.mubr.msk.f32.mxu0 %vm495_vm14, %v309_v10  ;;  %5172 = vmatprep.mubr.msk.f32.mxu1 %vm495_vm14, %v1112_v14  ;;  %v1133_v10 = vmul.f32 %v330_v6, %v330_v6  ;;  %v236_v14 = vld [vmem:[%s7067_s18 + $0x128] sm:$0xff] }
  0x9c   : > { %v1136_v12 = vmul.f32 %v333_v8, %v333_v8  ;;  %v336_v3 = vunpack.c.l.bf16 %v236_v14 }
  0x9e   : > { %865 = vmatmul.mubr.f32.gmra.mrb[46].mxu0 %v308_v13  ;;  %1560 = vmatmul.mubr.f32.gmra.mrb[46].mxu1 %v1111_v16  ;;  %v335_v13 = vunpack.c.h.bf16 %v235_v9 }
  0x9f   : > { %5084 = vmatprep.mubr.msk.f32.mxu0 %vm495_vm14, %v311_v15  ;;  %5173 = vmatprep.mubr.msk.f32.mxu1 %vm495_vm14, %v1114_v18  ;;  %v1135_v15 = vmul.f32 %v332_v11, %v332_v11  ;;  %v237_v18 = vld [vmem:[%s7067_s18 + $0x130] sm:$0xff] }
  0xa0   : > { %v1138_v16 = vmul.f32 %v335_v13, %v335_v13  ;;  %v338_v25 = vunpack.c.l.bf16 %v237_v18 }
  0xa2   : > { %870 = vmatmul.mubr.f32.gmra.mrb[48].mxu0 %v310_v17  ;;  %1565 = vmatmul.mubr.f32.gmra.mrb[48].mxu1 %v1113_v21  ;;  %v337_v17 = vunpack.c.h.bf16 %v236_v14 }
  0xa3   : > { %5085 = vmatprep.mubr.msk.f32.mxu0 %vm495_vm14, %v313_v20  ;;  %5174 = vmatprep.mubr.msk.f32.mxu1 %vm495_vm14, %v1116_v23  ;;  %v1137_v20 = vmul.f32 %v334_v2, %v334_v2  ;;  %v238_v23 = vld [vmem:[%s7067_s18 + $0x138] sm:$0xff] }
  0xa4   : > { %v1140_v21 = vmul.f32 %v337_v17, %v337_v17  ;;  %v340_v31 = vunpack.c.l.bf16 %v238_v23 }
  0xa6   : > { %875 = vmatmul.mubr.f32.gmra.mrb[50].mxu0 %v312_v22  ;;  %1570 = vmatmul.mubr.f32.gmra.mrb[50].mxu1 %v1115_v26  ;;  %v339_v22 = vunpack.c.h.bf16 %v237_v18 }
  0xa7   : > { %5086 = vmatprep.mubr.msk.f32.mxu0 %vm495_vm14, %v315_v24  ;;  %5175 = vmatprep.mubr.msk.f32.mxu1 %vm495_vm14, %v1118_v28  ;;  %v1139_v24 = vmul.f32 %v336_v3, %v336_v3  ;;  %v239_v28 = vld [vmem:[%s7067_s18 + $0x140] sm:$0xff] }
  0xa8   : > { %v1142_v26 = vmul.f32 %v339_v22, %v339_v22  ;;  %v342_v35 = vunpack.c.l.bf16 %v239_v28 }
  0xaa   : > { %880 = vmatmul.mubr.f32.gmra.mrb[52].mxu0 %v314_v27  ;;  %1575 = vmatmul.mubr.f32.gmra.mrb[52].mxu1 %v1117_v19  ;;  %v341_v27 = vunpack.c.h.bf16 %v238_v23 }
  0xab   : > { %5087 = vmatprep.mubr.msk.f32.mxu0 %vm495_vm14, %v317_v30  ;;  %5176 = vmatprep.mubr.msk.f32.mxu1 %vm495_vm14, %v1120_v33  ;;  %v1141_v30 = vmul.f32 %v338_v25, %v338_v25  ;;  %v240_v33 = vld [vmem:[%s7067_s18 + $0x148] sm:$0xff] }
  0xac   : > { %v1144_v19 = vmul.f32 %v341_v27, %v341_v27  ;;  %v344_v40 = vunpack.c.l.bf16 %v240_v33 }
  0xae   : > { %885 = vmatmul.mubr.f32.gmra.mrb[54].mxu0 %v316_v32  ;;  %1580 = vmatmul.mubr.f32.gmra.mrb[54].mxu1 %v1119_v36  ;;  %v343_v32 = vunpack.c.h.bf16 %v239_v28 }
  0xaf   : > { %5088 = vmatprep.mubr.msk.f32.mxu0 %vm495_vm14, %v319_v34  ;;  %5177 = vmatprep.mubr.msk.f32.mxu1 %vm495_vm14, %v1122_v38  ;;  %v1143_v34 = vmul.f32 %v340_v31, %v340_v31  ;;  %v241_v38 = vld [vmem:[%s7067_s18 + $0x150] sm:$0xff] }
  0xb0   : > { %v1146_v36 = vmul.f32 %v343_v32, %v343_v32  ;;  %v346_v45 = vunpack.c.l.bf16 %v241_v38 }
  0xb2   : > { %890 = vmatmul.mubr.f32.gmra.mrb[56].mxu0 %v318_v37  ;;  %1585 = vmatmul.mubr.f32.gmra.mrb[56].mxu1 %v1121_v41  ;;  %v345_v37 = vunpack.c.h.bf16 %v240_v33 }
  0xb3   : > { %5089 = vmatprep.mubr.msk.f32.mxu0 %vm495_vm14, %v321_v39  ;;  %5178 = vmatprep.mubr.msk.f32.mxu1 %vm495_vm14, %v1124_v43  ;;  %v1145_v39 = vmul.f32 %v342_v35, %v342_v35  ;;  %v242_v43 = vld [vmem:[%s7067_s18 + $0x158] sm:$0xff] }
  0xb4   : > { %v1148_v41 = vmul.f32 %v345_v37, %v345_v37  ;;  %v348_v50 = vunpack.c.l.bf16 %v242_v43 }
  0xb6   : > { %895 = vmatmul.mubr.f32.gmra.mrb[58].mxu0 %v320_v42  ;;  %1590 = vmatmul.mubr.f32.gmra.mrb[58].mxu1 %v1123_v46  ;;  %v347_v42 = vunpack.c.h.bf16 %v241_v38 }
  0xb7   : > { %5090 = vmatprep.mubr.msk.f32.mxu0 %vm495_vm14, %v323_v44  ;;  %5179 = vmatprep.mubr.msk.f32.mxu1 %vm495_vm14, %v1126_v48  ;;  %v1147_v44 = vmul.f32 %v344_v40, %v344_v40  ;;  %v243_v48 = vld [vmem:[%s7067_s18 + $0x160] sm:$0xff] }
  0xb8   : > { %v1150_v46 = vmul.f32 %v347_v42, %v347_v42  ;;  %v350_v55 = vunpack.c.l.bf16 %v243_v48 }
  0xba   : > { %900 = vmatmul.mubr.f32.gmra.mrb[60].mxu0 %v322_v47  ;;  %1595 = vmatmul.mubr.f32.gmra.mrb[60].mxu1 %v1125_v51  ;;  %v349_v47 = vunpack.c.h.bf16 %v242_v43 }
  0xbb   : > { %5091 = vmatprep.mubr.msk.f32.mxu0 %vm495_vm14, %v325_v49  ;;  %5180 = vmatprep.mubr.msk.f32.mxu1 %vm495_vm14, %v1128_v53  ;;  %v1149_v49 = vmul.f32 %v346_v45, %v346_v45  ;;  %v244_v53 = vld [vmem:[%s7067_s18 + $0x168] sm:$0xff] }
  0xbc   : > { %v1152_v51 = vmul.f32 %v349_v47, %v349_v47  ;;  %v352_v60 = vunpack.c.l.bf16 %v244_v53 }
  0xbe   : > { %905 = vmatmul.mubr.f32.gmra.mrb[62].mxu0 %v324_v52  ;;  %1600 = vmatmul.mubr.f32.gmra.mrb[62].mxu1 %v1127_v56  ;;  %v351_v52 = vunpack.c.h.bf16 %v243_v48 }
  0xbf   : > { %5092 = vmatprep.mubr.msk.f32.mxu0 %vm495_vm14, %v327_v54  ;;  %5181 = vmatprep.mubr.msk.f32.mxu1 %vm495_vm14, %v1130_v58  ;;  %v1151_v54 = vmul.f32 %v348_v50, %v348_v50  ;;  %v245_v58 = vld [vmem:[%s7067_s18 + $0x170] sm:$0xff] }
  0xc0   : > { %v1154_v56 = vmul.f32 %v351_v52, %v351_v52  ;;  %v354_v4 = vunpack.c.l.bf16 %v245_v58 }
  0xc2   : > { %910 = vmatmul.mubr.f32.gmra.mrb[64].mxu0 %v326_v57  ;;  %1605 = vmatmul.mubr.f32.gmra.mrb[64].mxu1 %v1129_v61  ;;  %v353_v57 = vunpack.c.h.bf16 %v244_v53 }
  0xc3   : > { %5093 = vmatprep.mubr.msk.f32.mxu0 %vm495_vm14, %v329_v59  ;;  %5182 = vmatprep.mubr.msk.f32.mxu1 %vm495_vm14, %v1132_v63  ;;  %v1153_v59 = vmul.f32 %v350_v55, %v350_v55  ;;  %v246_v63 = vld [vmem:[%s7067_s18 + $0x178] sm:$0xff] }
  0xc4   : > { %v1156_v61 = vmul.f32 %v353_v57, %v353_v57  ;;  %v356_v9 = vunpack.c.l.bf16 %v246_v63 }
  0xc6   : > { %915 = vmatmul.mubr.f32.gmra.mrb[66].mxu0 %v328_v62  ;;  %1610 = vmatmul.mubr.f32.gmra.mrb[66].mxu1 %v1131_v5  ;;  %v355_v62 = vunpack.c.h.bf16 %v245_v58 }
  0xc7   : > { %5094 = vmatprep.mubr.msk.f32.mxu0 %vm495_vm14, %v331_v0  ;;  %5183 = vmatprep.mubr.msk.f32.mxu1 %vm495_vm14, %v1134_v7  ;;  %v1155_v0 = vmul.f32 %v352_v60, %v352_v60  ;;  %v247_v7 = vld [vmem:[%s7067_s18 + $0x180] sm:$0xff] }
  0xc8   : > { %v1158_v5 = vmul.f32 %v355_v62, %v355_v62  ;;  %v358_v14 = vunpack.c.l.bf16 %v247_v7 }
  0xca   : > { %920 = vmatmul.mubr.f32.gmra.mrb[68].mxu0 %v330_v6  ;;  %1615 = vmatmul.mubr.f32.gmra.mrb[68].mxu1 %v1133_v10  ;;  %v357_v6 = vunpack.c.h.bf16 %v246_v63 }
  0xcb   : > { %5095 = vmatprep.mubr.msk.f32.mxu0 %vm495_vm14, %v333_v8  ;;  %5184 = vmatprep.mubr.msk.f32.mxu1 %vm495_vm14, %v1136_v12  ;;  %v1157_v8 = vmul.f32 %v354_v4, %v354_v4  ;;  %v248_v12 = vld [vmem:[%s7067_s18 + $0x188] sm:$0xff] }
  0xcc   : > { %v1160_v10 = vmul.f32 %v357_v6, %v357_v6  ;;  %v360_v18 = vunpack.c.l.bf16 %v248_v12 }
  0xce   : > { %925 = vmatmul.mubr.f32.gmra.mrb[70].mxu0 %v332_v11  ;;  %1620 = vmatmul.mubr.f32.gmra.mrb[70].mxu1 %v1135_v15  ;;  %v359_v11 = vunpack.c.h.bf16 %v247_v7  ;;  %v257_v7 = vld [vmem:[%s7067_s18 + $0x1d0] sm:$0xff] }
  0xcf   : > { %5096 = vmatprep.mubr.msk.f32.mxu0 %vm495_vm14, %v335_v13  ;;  %5185 = vmatprep.mubr.msk.f32.mxu1 %vm495_vm14, %v1138_v16  ;;  %v1159_v13 = vmul.f32 %v356_v9, %v356_v9  ;;  %v249_v16 = vld [vmem:[%s7067_s18 + $0x190] sm:$0xff] }
  0xd0   : > { %v1162_v15 = vmul.f32 %v359_v11, %v359_v11  ;;  %v362_v23 = vunpack.c.l.bf16 %v249_v16 }
  0xd2   : > { %930 = vmatmul.mubr.f32.gmra.mrb[72].mxu0 %v334_v2  ;;  %1625 = vmatmul.mubr.f32.gmra.mrb[72].mxu1 %v1137_v20  ;;  %v361_v2 = vunpack.c.h.bf16 %v248_v12 }
  0xd3   : > { %5097 = vmatprep.mubr.msk.f32.mxu0 %vm495_vm14, %v337_v17  ;;  %5186 = vmatprep.mubr.msk.f32.mxu1 %vm495_vm14, %v1140_v21  ;;  %v1161_v17 = vmul.f32 %v358_v14, %v358_v14  ;;  %v250_v21 = vld [vmem:[%s7067_s18 + $0x198] sm:$0xff] }
  0xd4   : > { %v1164_v20 = vmul.f32 %v361_v2, %v361_v2  ;;  %v364_v28 = vunpack.c.l.bf16 %v250_v21 }
  0xd6   : > { %935 = vmatmul.mubr.f32.gmra.mrb[74].mxu0 %v336_v3  ;;  %1630 = vmatmul.mubr.f32.gmra.mrb[74].mxu1 %v1139_v24  ;;  %v363_v3 = vunpack.c.h.bf16 %v249_v16 }
  0xd7   : > { %5098 = vmatprep.mubr.msk.f32.mxu0 %vm495_vm14, %v339_v22  ;;  %5187 = vmatprep.mubr.msk.f32.mxu1 %vm495_vm14, %v1142_v26  ;;  %v1163_v22 = vmul.f32 %v360_v18, %v360_v18  ;;  %v251_v26 = vld [vmem:[%s7067_s18 + $0x1a0] sm:$0xff] }
  0xd8   : > { %v1166_v24 = vmul.f32 %v363_v3, %v363_v3  ;;  %v366_v33 = vunpack.c.l.bf16 %v251_v26 }
  0xda   : > { %940 = vmatmul.mubr.f32.gmra.mrb[76].mxu0 %v338_v25  ;;  %1635 = vmatmul.mubr.f32.gmra.mrb[76].mxu1 %v1141_v30  ;;  %v365_v25 = vunpack.c.h.bf16 %v250_v21 }
  0xdb   : > { %5099 = vmatprep.mubr.msk.f32.mxu0 %vm495_vm14, %v341_v27  ;;  %5188 = vmatprep.mubr.msk.f32.mxu1 %vm495_vm14, %v1144_v19  ;;  %v1165_v27 = vmul.f32 %v362_v23, %v362_v23  ;;  %v252_v19 = vld [vmem:[%s7067_s18 + $0x1a8] sm:$0xff] }
  0xdc   : > { %v1168_v30 = vmul.f32 %v365_v25, %v365_v25  ;;  %v368_v38 = vunpack.c.l.bf16 %v252_v19 }
  0xde   : > { %945 = vmatmul.mubr.f32.gmra.mrb[78].mxu0 %v340_v31  ;;  %1640 = vmatmul.mubr.f32.gmra.mrb[78].mxu1 %v1143_v34  ;;  %v367_v31 = vunpack.c.h.bf16 %v251_v26 }
  0xdf   : > { %5100 = vmatprep.mubr.msk.f32.mxu0 %vm495_vm14, %v343_v32  ;;  %5189 = vmatprep.mubr.msk.f32.mxu1 %vm495_vm14, %v1146_v36  ;;  %v1167_v32 = vmul.f32 %v364_v28, %v364_v28  ;;  %v253_v36 = vld [vmem:[%s7067_s18 + $0x1b0] sm:$0xff] }
  0xe0   : > { %v1170_v34 = vmul.f32 %v367_v31, %v367_v31  ;;  %v370_v43 = vunpack.c.l.bf16 %v253_v36 }
  0xe2   : > { %950 = vmatmul.mubr.f32.gmra.mrb[80].mxu0 %v342_v35  ;;  %1645 = vmatmul.mubr.f32.gmra.mrb[80].mxu1 %v1145_v39  ;;  %v369_v35 = vunpack.c.h.bf16 %v252_v19 }
  0xe3   : > { %5101 = vmatprep.mubr.msk.f32.mxu0 %vm495_vm14, %v345_v37  ;;  %5190 = vmatprep.mubr.msk.f32.mxu1 %vm495_vm14, %v1148_v41  ;;  %v1169_v37 = vmul.f32 %v366_v33, %v366_v33  ;;  %v254_v41 = vld [vmem:[%s7067_s18 + $0x1b8] sm:$0xff] }
  0xe4   : > { %v1172_v39 = vmul.f32 %v369_v35, %v369_v35  ;;  %v372_v53 = vunpack.c.l.bf16 %v254_v41 }
  0xe6   : > { %955 = vmatmul.mubr.f32.gmra.mrb[82].mxu0 %v344_v40  ;;  %1650 = vmatmul.mubr.f32.gmra.mrb[82].mxu1 %v1147_v44  ;;  %v371_v40 = vunpack.c.h.bf16 %v253_v36 }
  0xe7   : > { %5102 = vmatprep.mubr.msk.f32.mxu0 %vm495_vm14, %v347_v42  ;;  %5191 = vmatprep.mubr.msk.f32.mxu1 %vm495_vm14, %v1150_v46  ;;  %v1171_v42 = vmul.f32 %v368_v38, %v368_v38  ;;  %v255_v46 = vld [vmem:[%s7067_s18 + $0x1c0] sm:$0xff] }
  0xe8   : > { %v1174_v44 = vmul.f32 %v371_v40, %v371_v40 }
  0xea   : > { %960 = vmatmul.mubr.f32.gmra.mrb[84].mxu0 %v346_v45  ;;  %1655 = vmatmul.mubr.f32.gmra.mrb[84].mxu1 %v1149_v49  ;;  %v373_v45 = vunpack.c.h.bf16 %v254_v41 }
  0xeb   : > { %5103 = vmatprep.mubr.msk.f32.mxu0 %vm495_vm14, %v349_v47  ;;  %5192 = vmatprep.mubr.msk.f32.mxu1 %vm495_vm14, %v1152_v51  ;;  %v1173_v51 = vmul.f32 %v370_v43, %v370_v43 }
  0xee   : > { %965 = vmatmul.mubr.f32.gmra.mrb[86].mxu0 %v348_v50  ;;  %1660 = vmatmul.mubr.f32.gmra.mrb[86].mxu1 %v1151_v54  ;;  %v1176_v54 = vmul.f32 %v373_v45, %v373_v45 }
  0xef   : > { %5104 = vmatprep.mubr.msk.f32.mxu0 %vm495_vm14, %v351_v52  ;;  %5193 = vmatprep.mubr.msk.f32.mxu1 %vm495_vm14, %v1154_v56 }
  0xf2   : > { %970 = vmatmul.mubr.f32.gmra.mrb[88].mxu0 %v350_v55  ;;  %1665 = vmatmul.mubr.f32.gmra.mrb[88].mxu1 %v1153_v59  ;;  %v375_v55 = vunpack.c.h.bf16 %v255_v46 }
  0xf3   : > { %5105 = vmatprep.mubr.msk.f32.mxu0 %vm495_vm14, %v353_v57  ;;  %5194 = vmatprep.mubr.msk.f32.mxu1 %vm495_vm14, %v1156_v61  ;;  %v256_v57 = vld [vmem:[%s7067_s18 + $0x1c8] sm:$0xff] }
  0xf6   : > { %975 = vmatmul.mubr.f32.gmra.mrb[90].mxu0 %v352_v60  ;;  %1670 = vmatmul.mubr.f32.gmra.mrb[90].mxu1 %v1155_v0  ;;  %v374_v0 = vunpack.c.l.bf16 %v255_v46 }
  0xf7   : > { %5106 = vmatprep.mubr.msk.f32.mxu0 %vm495_vm14, %v355_v62  ;;  %5195 = vmatprep.mubr.msk.f32.mxu1 %vm495_vm14, %v1158_v5  ;;  %v1175_v62 = vmul.f32 %v372_v53, %v372_v53  ;;  %v377_v5 = vunpack.c.h.bf16 %v256_v57 }
  0xf8   : > { %v1177_v12 = vmul.f32 %v374_v0, %v374_v0 }
  0xfa   : > { %980 = vmatmul.mubr.f32.gmra.mrb[92].mxu0 %v354_v4  ;;  %1675 = vmatmul.mubr.f32.gmra.mrb[92].mxu1 %v1157_v8  ;;  %v1178_v4 = vmul.f32 %v375_v55, %v375_v55 }
  0xfb   : > { %5107 = vmatprep.mubr.msk.f32.mxu0 %vm495_vm14, %v357_v6  ;;  %5196 = vmatprep.mubr.msk.f32.mxu1 %vm495_vm14, %v1160_v10 }
  0xfe   : > { %985 = vmatmul.mubr.f32.gmra.mrb[94].mxu0 %v356_v9  ;;  %1680 = vmatmul.mubr.f32.gmra.mrb[94].mxu1 %v1159_v13 }
  0xff   : > { %5108 = vmatprep.mubr.msk.f32.mxu0 %vm495_vm14, %v359_v11  ;;  %5197 = vmatprep.mubr.msk.f32.mxu1 %vm495_vm14, %v1162_v15  ;;  %v1180_v15 = vmul.f32 %v377_v5, %v377_v5 }
 0x102   : > { %990 = vmatmul.mubr.f32.gmra.mrb[96].mxu0 %v358_v14  ;;  %1685 = vmatmul.mubr.f32.gmra.mrb[96].mxu1 %v1161_v17  ;;  %v376_v14 = vunpack.c.l.bf16 %v256_v57  ;;  %v258_v17 = vld [vmem:[%s7067_s18 + $0x1d8] sm:$0xff] }
 0x103   : > { %5109 = vmatprep.mubr.msk.f32.mxu0 %vm495_vm14, %v361_v2  ;;  %5198 = vmatprep.mubr.msk.f32.mxu1 %vm495_vm14, %v1164_v20  ;;  %v379_v2 = vunpack.c.h.bf16 %v257_v7  ;;  %v381_v26 = vunpack.c.h.bf16 %v258_v17 }
 0x105   : > { %v1184_v36 = vmul.f32 %v381_v26, %v381_v26 }
 0x106   : > { %995 = vmatmul.mubr.f32.gmra.mrb[98].mxu0 %v360_v18  ;;  %1690 = vmatmul.mubr.f32.gmra.mrb[98].mxu1 %v1163_v22  ;;  %v1179_v22 = vmul.f32 %v376_v14, %v376_v14 }
 0x107   : > { %5110 = vmatprep.mubr.msk.f32.mxu0 %vm495_vm14, %v363_v3  ;;  %5199 = vmatprep.mubr.msk.f32.mxu1 %vm495_vm14, %v1166_v24  ;;  %v378_v24 = vunpack.c.l.bf16 %v257_v7 }
 0x10a   : > { %1000 = vmatmul.mubr.f32.gmra.mrb[100].mxu0 %v362_v23  ;;  %1695 = vmatmul.mubr.f32.gmra.mrb[100].mxu1 %v1165_v27 }
 0x10b   : > { %5111 = vmatprep.mubr.msk.f32.mxu0 %vm495_vm14, %v365_v25  ;;  %5200 = vmatprep.mubr.msk.f32.mxu1 %vm495_vm14, %v1168_v30  ;;  %v1182_v25 = vmul.f32 %v379_v2, %v379_v2 }
 0x10e   : > { %1005 = vmatmul.mubr.f32.gmra.mrb[102].mxu0 %v364_v28  ;;  %1700 = vmatmul.mubr.f32.gmra.mrb[102].mxu1 %v1167_v32  ;;  %v259_v28 = vld [vmem:[%s7067_s18 + $0x1e0] sm:$0xff] }
 0x10f   : > { %5112 = vmatprep.mubr.msk.f32.mxu0 %vm495_vm14, %v367_v31  ;;  %5201 = vmatprep.mubr.msk.f32.mxu1 %vm495_vm14, %v1170_v34  ;;  %v382_v46 = vunpack.c.l.bf16 %v259_v28 }
 0x112   : > { %1010 = vmatmul.mubr.f32.gmra.mrb[104].mxu0 %v366_v33  ;;  %1705 = vmatmul.mubr.f32.gmra.mrb[104].mxu1 %v1169_v37  ;;  %v1181_v33 = vmul.f32 %v378_v24, %v378_v24  ;;  %v383_v37 = vunpack.c.h.bf16 %v259_v28  ;;  %v2016_v28 = vld [vmem:[%s9400_s2 + $0x20] sm:$0xff] }
 0x113   : > { %5113 = vmatprep.mubr.msk.f32.mxu0 %vm495_vm14, %v369_v35  ;;  %5202 = vmatprep.mubr.msk.f32.mxu1 %vm495_vm14, %v1172_v39  ;;  %v380_v35 = vunpack.c.l.bf16 %v258_v17  ;;  %v260_v39 = vld [vmem:[%s7067_s18 + $0x1e8] sm:$0xff] }
 0x115   : > { %v751_v47 = vpop.f32.mrb[0].mxu0  ;;  %v7413_v48 = vpop.f32.mrb[0].mxu1 }
 0x116   : > { %v7415_v49 = vmul.f32 %v751_v47, %v751_v47  ;;  %v753_v50 = vpop.f32.mrb[1].mxu0  ;;  %1015 = vmatmul.mubr.f32.gmra.mrb[106].mxu0 %v368_v38  ;;  %1710 = vmatmul.mubr.f32.gmra.mrb[106].mxu1 %v1171_v42  ;;  %v1448_v52 = vpop.f32.mrb[1].mxu1  ;;  %v1186_v47 = vmul.f32 %v383_v37, %v383_v37 }
 0x117   : > { %5114 = vmatprep.mubr.msk.f32.mxu0 %vm495_vm14, %v371_v40  ;;  %5203 = vmatprep.mubr.msk.f32.mxu1 %vm495_vm14, %v1174_v44  ;;  %v1183_v44 = vmul.f32 %v380_v35, %v380_v35  ;;  %v385_v50 = vunpack.c.h.bf16 %v260_v39  ;;  %v261_v52 = vld [vmem:[%s7067_s18 + $0x1f0] sm:$0xff] }
 0x118   : > { %v1823_v56 = vsub.f32 %v7415_v49, %v7413_v48  ;;  %v1950_v49 = vld [vmem:[%s7495_s27 + $0x8] sm:$0xff] }
 0x119   : > { %v756_v58 = vpop.f32.mrb[2].mxu0  ;;  %v7422_v59 = vpop.f32.mrb[2].mxu1 }
 0x11a   : > { %v7424_v60 = vmul.f32 %v756_v58, %v756_v58  ;;  %v758_v61 = vpop.f32.mrb[3].mxu0  ;;  %1020 = vmatmul.mubr.f32.gmra.mrb[108].mxu0 %v370_v43  ;;  %1715 = vmatmul.mubr.f32.gmra.mrb[108].mxu1 %v1173_v51  ;;  %v1453_v63 = vpop.f32.mrb[3].mxu1  ;;  %v1185_v58 = vmul.f32 %v382_v46, %v382_v46 }
 0x11b   : > { %5115 = vmatprep.mubr.msk.f32.mxu0 %vm495_vm14, %v373_v45  ;;  %5204 = vmatprep.mubr.msk.f32.mxu1 %vm495_vm14, %v1176_v54  ;;  %v1188_v63 = vmul.f32 %v385_v50, %v385_v50 }
 0x11c   : > { %v1824_v6 = vsub.f32 %v7424_v60, %v7422_v59  ;;  %v2020_v59 = vld [vmem:[%s9400_s2 + $0x40] sm:$0xff] }
 0x11d   : > { %v761_v8 = vpop.f32.mrb[4].mxu0  ;;  %v7431_v9 = vpop.f32.mrb[4].mxu1 }
 0x11e   : > { %v7433_v10 = vmul.f32 %v761_v8, %v761_v8  ;;  %v763_v11 = vpop.f32.mrb[5].mxu0  ;;  %1025 = vmatmul.mubr.f32.gmra.mrb[110].mxu0 %v372_v53  ;;  %1720 = vmatmul.mubr.f32.gmra.mrb[110].mxu1 %v1175_v62  ;;  %v1458_v13 = vpop.f32.mrb[5].mxu1  ;;  %v384_v62 = vunpack.c.l.bf16 %v260_v39  ;;  %v1886_v39 = vmul.f32 0.5, %v1823_v56  ;;  %v1887_v56 = vmul.f32 0.5, %v1824_v6 }
 0x11f   : > { %5116 = vmatprep.mubr.msk.f32.mxu0 %vm495_vm14, %v375_v55  ;;  %5205 = vmatprep.mubr.msk.f32.mxu1 %vm495_vm14, %v1178_v4 }
 0x120   : > { %v1825_v16 = vsub.f32 %v7433_v10, %v7431_v9  ;;  %v1952_v9 = vld [vmem:[%s7495_s27 + $0x18] sm:$0xff] }
 0x121   : > { %v766_v18 = vpop.f32.mrb[6].mxu0  ;;  %v7440_v20 = vpop.f32.mrb[6].mxu1 }
 0x122   : > { %v7442_v3 = vmul.f32 %v766_v18, %v766_v18  ;;  %v768_v21 = vpop.f32.mrb[7].mxu0  ;;  %1030 = vmatmul.mubr.f32.gmra.mrb[112].mxu0 %v374_v0  ;;  %1725 = vmatmul.mubr.f32.gmra.mrb[112].mxu1 %v1177_v12  ;;  %v1463_v23 = vpop.f32.mrb[7].mxu1  ;;  %v387_v0 = vunpack.c.h.bf16 %v261_v52  ;;  %v1187_v12 = vmul.f32 %v384_v62, %v384_v62 }
 0x123   : > { %5117 = vmatprep.mubr.msk.f32.mxu0 %vm495_vm14, %v377_v5  ;;  %5206 = vmatprep.mubr.msk.f32.mxu1 %vm495_vm14, %v1180_v15 }
 0x124   : > { %v1826_v27 = vsub.f32 %v7442_v3, %v7440_v20  ;;  %v1190_v15 = vmul.f32 %v387_v0, %v387_v0  ;;  %v1953_v20 = vld [vmem:[%s7495_s27 + $0x20] sm:$0xff] }
 0x125   : > { %v771_v30 = vpop.f32.mrb[8].mxu0  ;;  %v7449_v31 = vpop.f32.mrb[8].mxu1 }
 0x126   : > { %v7451_v19 = vmul.f32 %v771_v30, %v771_v30  ;;  %v773_v32 = vpop.f32.mrb[9].mxu0  ;;  %1035 = vmatmul.mubr.f32.gmra.mrb[114].mxu0 %v376_v14  ;;  %1730 = vmatmul.mubr.f32.gmra.mrb[114].mxu1 %v1179_v22  ;;  %v1468_v34 = vpop.f32.mrb[9].mxu1  ;;  %v386_v14 = vunpack.c.l.bf16 %v261_v52  ;;  %v1889_v10 = vmul.f32 0.5, %v1826_v27 }
 0x127   : > { %5118 = vmatprep.mubr.msk.f32.mxu0 %vm495_vm14, %v379_v2  ;;  %5207 = vmatprep.mubr.msk.f32.mxu1 %vm495_vm14, %v1182_v25 }
 0x128   : > { %v1827_v38 = vsub.f32 %v7451_v19, %v7449_v31  ;;  %v1189_v23 = vmul.f32 %v386_v14, %v386_v14  ;;  %v1954_v31 = vld [vmem:[%s7495_s27 + $0x28] sm:$0xff] }
 0x129   : > { %v776_v40 = vpop.f32.mrb[10].mxu0  ;;  %v7458_v41 = vpop.f32.mrb[10].mxu1 }
 0x12a   : > { %v7460_v42 = vmul.f32 %v776_v40, %v776_v40  ;;  %v778_v43 = vpop.f32.mrb[11].mxu0  ;;  %1040 = vmatmul.mubr.f32.gmra.mrb[116].mxu0 %v378_v24  ;;  %1735 = vmatmul.mubr.f32.gmra.mrb[116].mxu1 %v1181_v33  ;;  %v1473_v45 = vpop.f32.mrb[11].mxu1  ;;  %v1890_v3 = vmul.f32 0.5, %v1827_v38 }
 0x12b   : > { %5119 = vmatprep.mubr.msk.f32.mxu0 %vm495_vm14, %v381_v26  ;;  %5208 = vmatprep.mubr.msk.f32.mxu1 %vm495_vm14, %v1184_v36  ;;  %v2015_v26 = vld [vmem:[%s9400_s2 + $0x18] sm:$0xff]  ;;  %v1949_v36 = vld [vmem:[%s7495_s27] sm:$0xff]  ;;  %v2017_v45 = vld [vmem:[%s9400_s2 + $0x28] sm:$0xff] }
 0x12c   : > { %v1828_v51 = vsub.f32 %v7460_v42, %v7458_v41  ;;  %v1955_v41 = vld [vmem:[%s7495_s27 + $0x30] sm:$0xff] }
 0x12d   : > { %v781_v53 = vpop.f32.mrb[12].mxu0  ;;  %v7467_v54 = vpop.f32.mrb[12].mxu1 }
 0x12e   : > { %v7469_v55 = vmul.f32 %v781_v53, %v781_v53  ;;  %v783_v57 = vpop.f32.mrb[13].mxu0  ;;  %1045 = vmatmul.mubr.f32.gmra.mrb[118].mxu0 %v380_v35  ;;  %1740 = vmatmul.mubr.f32.gmra.mrb[118].mxu1 %v1183_v44  ;;  %v1478_v61 = vpop.f32.mrb[13].mxu1  ;;  %v1891_v19 = vmul.f32 0.5, %v1828_v51 }
 0x12f   : > { %5120 = vmatprep.mubr.msk.f32.mxu0 %vm495_vm14, %v383_v37  ;;  %5209 = vmatprep.mubr.msk.f32.mxu1 %vm495_vm14, %v1186_v47  ;;  %v6670_v37 = vpack.c.bf16 %v2016_v28, %v2015_v26  ;;  %v2019_v61 = vld [vmem:[%s9400_s2 + $0x38] sm:$0xff] }
 0x130   : > { %v1829_v4 = vsub.f32 %v7469_v55, %v7467_v54  ;;  %v1956_v54 = vld [vmem:[%s7495_s27 + $0x38] sm:$0xff] }
 0x131   : > { %v786_v5 = vpop.f32.mrb[14].mxu0  ;;  %v7475_v7 = vpop.f32.mrb[14].mxu1 }
 0x132   : > { %v7477_v8 = vmul.f32 %v786_v5, %v786_v5  ;;  %v788_v11 = vpop.f32.mrb[15].mxu0  ;;  %1050 = vmatmul.mubr.f32.gmra.mrb[120].mxu0 %v382_v46  ;;  %1745 = vmatmul.mubr.f32.gmra.mrb[120].mxu1 %v1185_v58  ;;  %v1483_v13 = vpop.f32.mrb[15].mxu1  ;;  %v2018_v46 = vld [vmem:[%s9400_s2 + $0x30] sm:$0xff]  ;;  %v1892_v42 = vmul.f32 0.5, %v1829_v4 }
 0x133   : > { %5121 = vmatprep.mubr.msk.f32.mxu0 %vm495_vm14, %v385_v50  ;;  %5210 = vmatprep.mubr.msk.f32.mxu1 %vm495_vm14, %v1188_v63  ;;  %v6673_v53 = vpack.c.bf16 %v2018_v46, %v2017_v45  ;;  %v1951_v63 = vld [vmem:[%s7495_s27 + $0x10] sm:$0xff]  ;;  %v6676_v11 = vpack.c.bf16 %v2020_v59, %v2019_v61 }
 0x134   : > { %v1830_v2 = vsub.f32 %v7477_v8, %v7475_v7  ;;  %v1957_v7 = vld [vmem:[%s7495_s27 + $0x40] sm:$0xff] }
 0x135   : > { %v791_v17 = vpop.f32.mrb[16].mxu0  ;;  %v7483_v18 = vpop.f32.mrb[16].mxu1 }
 0x136   : > { %v7485_v21 = vmul.f32 %v791_v17, %v791_v17  ;;  %v793_v22 = vpop.f32.mrb[17].mxu0  ;;  %1055 = vmatmul.mubr.f32.gmra.mrb[122].mxu0 %v384_v62  ;;  %1750 = vmatmul.mubr.f32.gmra.mrb[122].mxu1 %v1187_v12  ;;  %v1488_v24 = vpop.f32.mrb[17].mxu1  ;;  %v1893_v55 = vmul.f32 0.5, %v1830_v2 }
 0x137   : > { %5122 = vmatprep.mubr.msk.f32.mxu0 %vm495_vm14, %v387_v0  ;;  %5211 = vmatprep.mubr.msk.f32.mxu1 %vm495_vm14, %v1190_v15  ;;  %vm6966_vm14 = vmmov 0   ;;  %v1888_v0 = vmul.f32 0.5, %v1825_v16 }
 0x138   : > { %v1831_v25 = vsub.f32 %v7485_v21, %v7483_v18  ;;  %v1958_v18 = vld [vmem:[%s7495_s27 + $0x48] sm:$0xff] }
 0x139   : > { %v796_v30 = vpop.f32.mrb[18].mxu0  ;;  %v7503_v32 = vpop.f32.mrb[18].mxu1 }
 0x13a   : > { %v7505_v33 = vmul.f32 %v796_v30, %v796_v30  ;;  %v798_v34 = vpop.f32.mrb[19].mxu0  ;;  %1060 = vmatmul.mubr.f32.gmra.mrb[124].mxu0 %v386_v14  ;;  %1755 = vmatmul.mubr.f32.gmra.mrb[124].mxu1 %v1189_v23  ;;  %v1493_v35 = vpop.f32.mrb[19].mxu1  ;;  %v1894_v8 = vmul.f32 0.5, %v1831_v25 }
 0x13b   : > { %5805 = vmatprep.mubr.msk.f32.mxu0 %vm6966_vm14, %v6965_v29  ;;  %5996 = vmatprep.mubr.msk.f32.mxu1 %vm6966_vm14, %v6965_v29 }
 0x13c   : > { %v1832_v40 = vsub.f32 %v7505_v33, %v7503_v32  ;;  %v1959_v32 = vld [vmem:[%s7495_s27 + $0x50] sm:$0xff] }
 0x13d   : > { %v801_v43 = vpop.f32.mrb[20].mxu0  ;;  %v7517_v44 = vpop.f32.mrb[20].mxu1 }
 0x13e   : > { %v7525_v47 = vmul.f32 %v801_v43, %v801_v43  ;;  %v803_v50 = vpop.f32.mrb[21].mxu0  ;;  %5806 = vmatmul.mubr.msk.f32.vlgmr.msra.gmra.mrb[126].mxu0 %vm2030_vm12, %v1949_v36  ;;  %5997 = vmatmul.mubr.msk.f32.vlgmr.msra.gmra.mrb[126].mxu1 %vm2604_vm13, %v1886_v39  ;;  %v1498_v48 = vpop.f32.mrb[21].mxu1  ;;  %v1895_v21 = vmul.f32 0.5, %v1832_v40 }
 0x13f   : > { %6671 = vmatpush3.bf16.msra.mxu0 %v6670_v37  ;;  %5808 = vmatprep.mubr.msk.f32.mxu0 %vm6966_vm14, %v6965_v29 }
 0x140   : > { %v1833_v52 = vsub.f32 %v7525_v47, %v7517_v44  ;;  %5999 = vmatprep.mubr.msk.f32.mxu1 %vm6966_vm14, %v6965_v29  ;;  %6672 = vmatprep.subr.bf16.mxu0 %v6962_v1  ;;  %v1960_v44 = vld [vmem:[%s7495_s27 + $0x58] sm:$0xff] }
 0x141   : > { %v806_v57 = vpop.f32.mrb[22].mxu0  ;;  %v7540_v58 = vpop.f32.mrb[22].mxu1 }
 0x142   : > { %v7548_v60 = vmul.f32 %v806_v57, %v806_v57  ;;  %v808_v6 = vpop.f32.mrb[23].mxu0  ;;  %5809 = vmatmul.mubr.msk.f32.gmra.mrb[128].mxu0 %vm2030_vm12, %v1950_v49  ;;  %6000 = vmatmul.mubr.msk.f32.gmra.mrb[128].mxu1 %vm2604_vm13, %v1887_v56  ;;  %v1503_v62 = vpop.f32.mrb[23].mxu1  ;;  %v1896_v33 = vmul.f32 0.5, %v1833_v52 }
 0x143   : > { %5811 = vmatprep.mubr.msk.f32.mxu0 %vm6966_vm14, %v6965_v29  ;;  %6002 = vmatprep.mubr.msk.f32.mxu1 %vm6966_vm14, %v6965_v29 }
 0x144   : > { %v1834_v5 = vsub.f32 %v7548_v60, %v7540_v58  ;;  %6674 = vmatpush3.bf16.msra.mxu0 %v6673_v53  ;;  %v1961_v58 = vld [vmem:[%s7495_s27 + $0x60] sm:$0xff] }
 0x145   : > { %v811_v12 = vpop.f32.mrb[24].mxu0  ;;  %v7562_v13 = vpop.f32.mrb[24].mxu1  ;;  %6675 = vmatprep.subr.bf16.mxu0 %v6962_v1 }
 0x146   : > { %v7565_v14 = vmul.f32 %v811_v12, %v811_v12  ;;  %v813_v15 = vpop.f32.mrb[25].mxu0  ;;  %5812 = vmatmul.mubr.msk.f32.gmra.mrb[130].mxu0 %vm2030_vm12, %v1951_v63  ;;  %6003 = vmatmul.mubr.msk.f32.gmra.mrb[130].mxu1 %vm2604_vm13, %v1888_v0  ;;  %v1508_v17 = vpop.f32.mrb[25].mxu1  ;;  %v1897_v47 = vmul.f32 0.5, %v1834_v5 }
 0x147   : > { %5814 = vmatprep.mubr.msk.f32.mxu0 %vm6966_vm14, %v6965_v29  ;;  %6005 = vmatprep.mubr.msk.f32.mxu1 %vm6966_vm14, %v6965_v29 }
 0x148   : > { %v1835_v16 = vsub.f32 %v7565_v14, %v7562_v13  ;;  %6677 = vmatpush3.bf16.msra.mxu0 %v6676_v11  ;;  %v1962_v13 = vld [vmem:[%s7495_s27 + $0x68] sm:$0xff] }
 0x149   : > { %v816_v22 = vpop.f32.mrb[26].mxu0  ;;  %v7579_v23 = vpop.f32.mrb[26].mxu1  ;;  %6678 = vmatprep.subr.bf16.mxu0 %v6962_v1 }
 0x14a   : > { %v7582_v24 = vmul.f32 %v816_v22, %v816_v22  ;;  %v818_v26 = vpop.f32.mrb[27].mxu0  ;;  %5815 = vmatmul.mubr.msk.f32.gmra.mrb[132].mxu0 %vm2030_vm12, %v1952_v9  ;;  %6006 = vmatmul.mubr.msk.f32.gmra.mrb[132].mxu1 %vm2604_vm13, %v1889_v10  ;;  %v1513_v28 = vpop.f32.mrb[27].mxu1  ;;  %v1898_v60 = vmul.f32 0.5, %v1835_v16 }
 0x14b   : > { %5817 = vmatprep.mubr.msk.f32.mxu0 %vm6966_vm14, %v6965_v29  ;;  %6008 = vmatprep.mubr.msk.f32.mxu1 %vm6966_vm14, %v6965_v29 }
 0x14c   : > { %v1836_v27 = vsub.f32 %v7582_v24, %v7579_v23  ;;  %v1963_v23 = vld [vmem:[%s7495_s27 + $0x70] sm:$0xff] }
 0x14d   : > { %v821_v30 = vpop.f32.mrb[28].mxu0  ;;  %v7596_v34 = vpop.f32.mrb[28].mxu1 }
 0x14e   : > { %v7598_v35 = vmul.f32 %v821_v30, %v821_v30  ;;  %v823_v36 = vpop.f32.mrb[29].mxu0  ;;  %5818 = vmatmul.mubr.msk.f32.gmra.mrb[134].mxu0 %vm2030_vm12, %v1953_v20  ;;  %6009 = vmatmul.mubr.msk.f32.gmra.mrb[134].mxu1 %vm2604_vm13, %v1890_v3  ;;  %v1518_v37 = vpop.f32.mrb[29].mxu1  ;;  %v1899_v14 = vmul.f32 0.5, %v1836_v27 }
 0x14f   : > { %5820 = vmatprep.mubr.msk.f32.mxu0 %vm6966_vm14, %v6965_v29  ;;  %6011 = vmatprep.mubr.msk.f32.mxu1 %vm6966_vm14, %v6965_v29 }
 0x150   : > { %v1837_v38 = vsub.f32 %v7598_v35, %v7596_v34  ;;  %v1964_v34 = vld [vmem:[%s7495_s27 + $0x78] sm:$0xff] }
 0x151   : > { %v826_v39 = vpop.f32.mrb[30].mxu0  ;;  %v7612_v43 = vpop.f32.mrb[30].mxu1 }
 0x152   : > { %v7614_v45 = vmul.f32 %v826_v39, %v826_v39  ;;  %v828_v46 = vpop.f32.mrb[31].mxu0  ;;  %5821 = vmatmul.mubr.msk.f32.gmra.mrb[136].mxu0 %vm2030_vm12, %v1954_v31  ;;  %6012 = vmatmul.mubr.msk.f32.gmra.mrb[136].mxu1 %vm2604_vm13, %v1891_v19  ;;  %v1523_v50 = vpop.f32.mrb[31].mxu1  ;;  %v1900_v24 = vmul.f32 0.5, %v1837_v38 }
 0x153   : > { %5823 = vmatprep.mubr.msk.f32.mxu0 %vm6966_vm14, %v6965_v29  ;;  %6014 = vmatprep.mubr.msk.f32.mxu1 %vm6966_vm14, %v6965_v29 }
 0x154   : > { %v1838_v51 = vsub.f32 %v7614_v45, %v7612_v43  ;;  %v1965_v43 = vld [vmem:[%s7495_s27 + $0x80] sm:$0xff] }
 0x155   : > { %v831_v48 = vpop.f32.mrb[32].mxu0  ;;  %v7628_v49 = vpop.f32.mrb[32].mxu1 }
 0x156   : > { %v7630_v56 = vmul.f32 %v831_v48, %v831_v48  ;;  %v833_v53 = vpop.f32.mrb[33].mxu0  ;;  %5824 = vmatmul.mubr.msk.f32.gmra.mrb[138].mxu0 %vm2030_vm12, %v1955_v41  ;;  %6015 = vmatmul.mubr.msk.f32.gmra.mrb[138].mxu1 %vm2604_vm13, %v1892_v42  ;;  %v1528_v57 = vpop.f32.mrb[33].mxu1  ;;  %v1901_v35 = vmul.f32 0.5, %v1838_v51 }
 0x157   : > { %5826 = vmatprep.mubr.msk.f32.mxu0 %vm6966_vm14, %v6965_v29  ;;  %6017 = vmatprep.mubr.msk.f32.mxu1 %vm6966_vm14, %v6965_v29 }
 0x158   : > { %v1839_v4 = vsub.f32 %v7630_v56, %v7628_v49  ;;  %v2022_v49 = vld [vmem:[%s9400_s2 + $0x50] sm:$0xff]  ;;  %v1966_v56 = vld [vmem:[%s7495_s27 + $0x88] sm:$0xff] }
 0x159   : > { %v836_v61 = vpop.f32.mrb[34].mxu0  ;;  %v7644_v59 = vpop.f32.mrb[34].mxu1 }
 0x15a   : > { %v7646_v6 = vmul.f32 %v836_v61, %v836_v61  ;;  %v838_v62 = vpop.f32.mrb[35].mxu0  ;;  %5827 = vmatmul.mubr.msk.f32.gmra.mrb[140].mxu0 %vm2030_vm12, %v1956_v54  ;;  %6018 = vmatmul.mubr.msk.f32.gmra.mrb[140].mxu1 %vm2604_vm13, %v1893_v55  ;;  %v1533_v63 = vpop.f32.mrb[35].mxu1  ;;  %v1902_v45 = vmul.f32 0.5, %v1839_v4 }
 0x15b   : > { %5829 = vmatprep.mubr.msk.f32.mxu0 %vm6966_vm14, %v6965_v29  ;;  %6020 = vmatprep.mubr.msk.f32.mxu1 %vm6966_vm14, %v6965_v29 }
 0x15c   : > { %v1840_v2 = vsub.f32 %v7646_v6, %v7644_v59  ;;  %v1967_v59 = vld [vmem:[%s7495_s27 + $0x90] sm:$0xff] }
 0x15d   : > { %v841_v0 = vpop.f32.mrb[36].mxu0  ;;  %v7660_v11 = vpop.f32.mrb[36].mxu1 }
 0x15e   : > { %v7662_v12 = vmul.f32 %v841_v0, %v841_v0  ;;  %v843_v15 = vpop.f32.mrb[37].mxu0  ;;  %5830 = vmatmul.mubr.msk.f32.gmra.mrb[142].mxu0 %vm2030_vm12, %v1957_v7  ;;  %6021 = vmatmul.mubr.msk.f32.gmra.mrb[142].mxu1 %vm2604_vm13, %v1894_v8  ;;  %v1538_v17 = vpop.f32.mrb[37].mxu1 }
 0x15f   : > { %5832 = vmatprep.mubr.msk.f32.mxu0 %vm6966_vm14, %v6965_v29  ;;  %6023 = vmatprep.mubr.msk.f32.mxu1 %vm6966_vm14, %v6965_v29 }
 0x160   : > { %v1841_v25 = vsub.f32 %v7662_v12, %v7660_v11  ;;  %v1968_v11 = vld [vmem:[%s7495_s27 + $0x98] sm:$0xff] }
 0x161   : > { %v846_v9 = vpop.f32.mrb[38].mxu0  ;;  %v7676_v10 = vpop.f32.mrb[38].mxu1 }
 0x162   : > { %v7678_v22 = vmul.f32 %v846_v9, %v846_v9  ;;  %v848_v26 = vpop.f32.mrb[39].mxu0  ;;  %5833 = vmatmul.mubr.msk.f32.gmra.mrb[144].mxu0 %vm2030_vm12, %v1958_v18  ;;  %6024 = vmatmul.mubr.msk.f32.gmra.mrb[144].mxu1 %vm2604_vm13, %v1895_v21  ;;  %v1543_v28 = vpop.f32.mrb[39].mxu1  ;;  %v1904_v6 = vmul.f32 0.5, %v1841_v25 }
 0x163   : > { %5835 = vmatprep.mubr.msk.f32.mxu0 %vm6966_vm14, %v6965_v29  ;;  %6026 = vmatprep.mubr.msk.f32.mxu1 %vm6966_vm14, %v6965_v29 }
 0x164   : > { %v1842_v40 = vsub.f32 %v7678_v22, %v7676_v10  ;;  %v1969_v10 = vld [vmem:[%s7495_s27 + $0xa0] sm:$0xff] }
 0x165   : > { %v851_v20 = vpop.f32.mrb[40].mxu0  ;;  %v7692_v3 = vpop.f32.mrb[40].mxu1 }
 0x166   : > { %v7694_v30 = vmul.f32 %v851_v20, %v851_v20  ;;  %v853_v36 = vpop.f32.mrb[41].mxu0  ;;  %5836 = vmatmul.mubr.msk.f32.gmra.mrb[146].mxu0 %vm2030_vm12, %v1959_v32  ;;  %6027 = vmatmul.mubr.msk.f32.gmra.mrb[146].mxu1 %vm2604_vm13, %v1896_v33  ;;  %v1548_v37 = vpop.f32.mrb[41].mxu1  ;;  %v1905_v12 = vmul.f32 0.5, %v1842_v40 }
 0x167   : > { %5838 = vmatprep.mubr.msk.f32.mxu0 %vm6966_vm14, %v6965_v29  ;;  %6029 = vmatprep.mubr.msk.f32.mxu1 %vm6966_vm14, %v6965_v29 }
 0x168   : > { %v1843_v52 = vsub.f32 %v7694_v30, %v7692_v3  ;;  %v1970_v3 = vld [vmem:[%s7495_s27 + $0xa8] sm:$0xff] }
 0x169   : > { %v856_v31 = vpop.f32.mrb[42].mxu0  ;;  %v7708_v19 = vpop.f32.mrb[42].mxu1 }
 0x16a   : > { %v7710_v39 = vmul.f32 %v856_v31, %v856_v31  ;;  %v858_v46 = vpop.f32.mrb[43].mxu0  ;;  %5839 = vmatmul.mubr.msk.f32.gmra.mrb[148].mxu0 %vm2030_vm12, %v1960_v44  ;;  %6030 = vmatmul.mubr.msk.f32.gmra.mrb[148].mxu1 %vm2604_vm13, %v1897_v47  ;;  %v1553_v50 = vpop.f32.mrb[43].mxu1  ;;  %v2021_v44 = vld [vmem:[%s9400_s2 + $0x48] sm:$0xff]  ;;  %v1903_v47 = vmul.f32 0.5, %v1840_v2  ;;  %v1906_v22 = vmul.f32 0.5, %v1843_v52 }
 0x16b   : > { %5841 = vmatprep.mubr.msk.f32.mxu0 %vm6966_vm14, %v6965_v29  ;;  %6032 = vmatprep.mubr.msk.f32.mxu1 %vm6966_vm14, %v6965_v29  ;;  %v6679_v4 = vpack.c.bf16 %v2022_v49, %v2021_v44 }
 0x16c   : > { %v1844_v5 = vsub.f32 %v7710_v39, %v7708_v19  ;;  %v1971_v19 = vld [vmem:[%s7495_s27 + $0xb0] sm:$0xff] }
 0x16d   : > { %v861_v41 = vpop.f32.mrb[44].mxu0  ;;  %v7724_v42 = vpop.f32.mrb[44].mxu1  ;;  %6680 = vmatpush3.bf16.msra.mxu0 %v6679_v4 }
 0x16e   : > { %v7726_v48 = vmul.f32 %v861_v41, %v861_v41  ;;  %v863_v53 = vpop.f32.mrb[45].mxu0  ;;  %5842 = vmatmul.mubr.msk.f32.gmra.mrb[150].mxu0 %vm2030_vm12, %v1961_v58  ;;  %6033 = vmatmul.mubr.msk.f32.gmra.mrb[150].mxu1 %vm2604_vm13, %v1898_v60  ;;  %v1558_v57 = vpop.f32.mrb[45].mxu1  ;;  %v1907_v30 = vmul.f32 0.5, %v1844_v5 }
 0x16f   : > { %5844 = vmatprep.mubr.msk.f32.mxu0 %vm6966_vm14, %v6965_v29  ;;  %6035 = vmatprep.mubr.msk.f32.mxu1 %vm6966_vm14, %v6965_v29 }
 0x170   : > { %v1845_v16 = vsub.f32 %v7726_v48, %v7724_v42  ;;  %v1972_v42 = vld [vmem:[%s7495_s27 + $0xb8] sm:$0xff] }
 0x171   : > { %v866_v54 = vpop.f32.mrb[46].mxu0  ;;  %v7740_v55 = vpop.f32.mrb[46].mxu1 }
 0x172   : > { %v7742_v61 = vmul.f32 %v866_v54, %v866_v54  ;;  %v868_v62 = vpop.f32.mrb[47].mxu0  ;;  %5845 = vmatmul.mubr.msk.f32.gmra.mrb[152].mxu0 %vm2030_vm12, %v1962_v13  ;;  %6036 = vmatmul.mubr.msk.f32.gmra.mrb[152].mxu1 %vm2604_vm13, %v1899_v14  ;;  %v1563_v63 = vpop.f32.mrb[47].mxu1  ;;  %v1908_v39 = vmul.f32 0.5, %v1845_v16 }
 0x173   : > { %5847 = vmatprep.mubr.msk.f32.mxu0 %vm6966_vm14, %v6965_v29  ;;  %6038 = vmatprep.mubr.msk.f32.mxu1 %vm6966_vm14, %v6965_v29 }
 0x174   : > { %v1846_v27 = vsub.f32 %v7742_v61, %v7740_v55  ;;  %v2024_v55 = vld [vmem:[%s9400_s2 + $0x60] sm:$0xff] }
 0x175   : > { %v871_v7 = vpop.f32.mrb[48].mxu0  ;;  %v7756_v8 = vpop.f32.mrb[48].mxu1  ;;  %v1973_v61 = vld [vmem:[%s7495_s27 + $0xc0] sm:$0xff] }
 0x176   : > { %v7758_v0 = vmul.f32 %v871_v7, %v871_v7  ;;  %v873_v15 = vpop.f32.mrb[49].mxu0  ;;  %5848 = vmatmul.mubr.msk.f32.gmra.mrb[154].mxu0 %vm2030_vm12, %v1963_v23  ;;  %6039 = vmatmul.mubr.msk.f32.gmra.mrb[154].mxu1 %vm2604_vm13, %v1900_v24  ;;  %v1568_v17 = vpop.f32.mrb[49].mxu1  ;;  %v1909_v48 = vmul.f32 0.5, %v1846_v27 }
 0x177   : > { %5850 = vmatprep.mubr.msk.f32.mxu0 %vm6966_vm14, %v6965_v29  ;;  %6041 = vmatprep.mubr.msk.f32.mxu1 %vm6966_vm14, %v6965_v29 }
 0x178   : > { %v1847_v38 = vsub.f32 %v7758_v0, %v7756_v8  ;;  %v1974_v8 = vld [vmem:[%s7495_s27 + $0xc8] sm:$0xff] }
 0x179   : > { %v876_v18 = vpop.f32.mrb[50].mxu0  ;;  %v7772_v21 = vpop.f32.mrb[50].mxu1 }
 0x17a   : > { %v7774_v9 = vmul.f32 %v876_v18, %v876_v18  ;;  %v878_v26 = vpop.f32.mrb[51].mxu0  ;;  %5851 = vmatmul.mubr.msk.f32.gmra.mrb[156].mxu0 %vm2030_vm12, %v1964_v34  ;;  %6042 = vmatmul.mubr.msk.f32.gmra.mrb[156].mxu1 %vm2604_vm13, %v1901_v35  ;;  %v1573_v28 = vpop.f32.mrb[51].mxu1 }
 0x17b   : > { %5853 = vmatprep.mubr.msk.f32.mxu0 %vm6966_vm14, %v6965_v29  ;;  %6044 = vmatprep.mubr.msk.f32.mxu1 %vm6966_vm14, %v6965_v29 }
 0x17c   : > { %v1848_v51 = vsub.f32 %v7774_v9, %v7772_v21  ;;  %v1975_v21 = vld [vmem:[%s7495_s27 + $0xd0] sm:$0xff] }
 0x17d   : > { %v881_v32 = vpop.f32.mrb[52].mxu0  ;;  %v7788_v33 = vpop.f32.mrb[52].mxu1 }
 0x17e   : > { %v7790_v20 = vmul.f32 %v881_v32, %v881_v32  ;;  %v883_v36 = vpop.f32.mrb[53].mxu0  ;;  %5854 = vmatmul.mubr.msk.f32.gmra.mrb[158].mxu0 %vm2030_vm12, %v1965_v43  ;;  %6045 = vmatmul.mubr.msk.f32.gmra.mrb[158].mxu1 %vm2604_vm13, %v1902_v45  ;;  %v1578_v37 = vpop.f32.mrb[53].mxu1  ;;  %v1911_v0 = vmul.f32 0.5, %v1848_v51 }
 0x17f   : > { %5856 = vmatprep.mubr.msk.f32.mxu0 %vm6966_vm14, %v6965_v29  ;;  %6047 = vmatprep.mubr.msk.f32.mxu1 %vm6966_vm14, %v6965_v29 }
 0x180   : > { %v1849_v31 = vsub.f32 %v7790_v20, %v7788_v33  ;;  %v1976_v33 = vld [vmem:[%s7495_s27 + $0xd8] sm:$0xff] }
 0x181   : > { %v886_v46 = vpop.f32.mrb[54].mxu0  ;;  %v7810_v50 = vpop.f32.mrb[54].mxu1 }
 0x182   : > { %v7812_v58 = vmul.f32 %v886_v46, %v886_v46  ;;  %v888_v60 = vpop.f32.mrb[55].mxu0  ;;  %5857 = vmatmul.mubr.msk.f32.gmra.mrb[160].mxu0 %vm2030_vm12, %v1966_v56  ;;  %6048 = vmatmul.mubr.msk.f32.gmra.mrb[160].mxu1 %vm2604_vm13, %v1903_v47  ;;  %v1583_v41 = vpop.f32.mrb[55].mxu1 }
 0x183   : > { %5859 = vmatprep.mubr.msk.f32.mxu0 %vm6966_vm14, %v6965_v29  ;;  %6050 = vmatprep.mubr.msk.f32.mxu1 %vm6966_vm14, %v6965_v29 }
 0x184   : > { %v1850_v2 = vsub.f32 %v7812_v58, %v7810_v50  ;;  %v1977_v50 = vld [vmem:[%s7495_s27 + $0xe0] sm:$0xff] }
 0x185   : > { %v891_v53 = vpop.f32.mrb[56].mxu0  ;;  %v7826_v57 = vpop.f32.mrb[56].mxu1 }
 0x186   : > { %v7828_v13 = vmul.f32 %v891_v53, %v891_v53  ;;  %v893_v14 = vpop.f32.mrb[57].mxu0  ;;  %5860 = vmatmul.mubr.msk.f32.gmra.mrb[162].mxu0 %vm2030_vm12, %v1967_v59  ;;  %6051 = vmatmul.mubr.msk.f32.gmra.mrb[162].mxu1 %vm2604_vm13, %v1904_v6  ;;  %v1588_v54 = vpop.f32.mrb[57].mxu1  ;;  %v2023_v59 = vld [vmem:[%s9400_s2 + $0x58] sm:$0xff]  ;;  %v1910_v6 = vmul.f32 0.5, %v1847_v38  ;;  %v1913_v20 = vmul.f32 0.5, %v1850_v2 }
 0x187   : > { %5862 = vmatprep.mubr.msk.f32.mxu0 %vm6966_vm14, %v6965_v29  ;;  %6053 = vmatprep.mubr.msk.f32.mxu1 %vm6966_vm14, %v6965_v29  ;;  %v6682_v27 = vpack.c.bf16 %v2024_v55, %v2023_v59 }
 0x188   : > { %v1851_v25 = vsub.f32 %v7828_v13, %v7826_v57  ;;  %v1978_v57 = vld [vmem:[%s7495_s27 + $0xe8] sm:$0xff] }
 0x189   : > { %v896_v62 = vpop.f32.mrb[58].mxu0  ;;  %v7842_v63 = vpop.f32.mrb[58].mxu1  ;;  %6683 = vmatpush3.bf16.msra.mxu1 %v6682_v27 }
 0x18a   : > { %v7844_v23 = vmul.f32 %v896_v62, %v896_v62  ;;  %v898_v24 = vpop.f32.mrb[59].mxu0  ;;  %5863 = vmatmul.mubr.msk.f32.gmra.mrb[164].mxu0 %vm2030_vm12, %v1968_v11  ;;  %6054 = vmatmul.mubr.msk.f32.gmra.mrb[164].mxu1 %vm2604_vm13, %v1905_v12  ;;  %v1593_v7 = vpop.f32.mrb[59].mxu1  ;;  %v1914_v58 = vmul.f32 0.5, %v1851_v25 }
 0x18b   : > { %5865 = vmatprep.mubr.msk.f32.mxu0 %vm6966_vm14, %v6965_v29  ;;  %6056 = vmatprep.mubr.msk.f32.mxu1 %vm6966_vm14, %v6965_v29 }
 0x18c   : > { %v1852_v40 = vsub.f32 %v7844_v23, %v7842_v63  ;;  %6684 = vmatprep.subr.bf16.mxu1 %v6962_v1  ;;  %v1912_v1 = vmul.f32 0.5, %v1849_v31  ;;  %v1979_v63 = vld [vmem:[%s7495_s27 + $0xf0] sm:$0xff] }
 0x18d   : > { %v901_v15 = vpop.f32.mrb[60].mxu0  ;;  %v7858_v17 = vpop.f32.mrb[60].mxu1 }
 0x18e   : > { %v7860_v34 = vmul.f32 %v901_v15, %v901_v15  ;;  %v903_v35 = vpop.f32.mrb[61].mxu0  ;;  %5866 = vmatmul.mubr.msk.f32.gmra.mrb[166].mxu0 %vm2030_vm12, %v1969_v10  ;;  %6057 = vmatmul.mubr.msk.f32.gmra.mrb[166].mxu1 %vm2604_vm13, %v1906_v22  ;;  %v1598_v18 = vpop.f32.mrb[61].mxu1  ;;  %v1915_v13 = vmul.f32 0.5, %v1852_v40 }
 0x18f   : > { %5868 = vmatprep.mubr.msk.f32.mxu0 %vm6966_vm14, %v6965_v29  ;;  %6059 = vmatprep.mubr.msk.f32.mxu1 %vm6966_vm14, %v6965_v29 }
 0x190   : > { %v1853_v52 = vsub.f32 %v7860_v34, %v7858_v17  ;;  %v1980_v17 = vld [vmem:[%s7495_s27 + $0xf8] sm:$0xff] }
 0x191   : > { %v906_v26 = vpop.f32.mrb[62].mxu0  ;;  %v7874_v28 = vpop.f32.mrb[62].mxu1 }
 0x192   : > { %v7876_v43 = vmul.f32 %v906_v26, %v906_v26  ;;  %v908_v45 = vpop.f32.mrb[63].mxu0  ;;  %5869 = vmatmul.mubr.msk.f32.gmra.mrb[168].mxu0 %vm2030_vm12, %v1970_v3  ;;  %6060 = vmatmul.mubr.msk.f32.gmra.mrb[168].mxu1 %vm2604_vm13, %v1907_v30  ;;  %v1603_v32 = vpop.f32.mrb[63].mxu1  ;;  %v1916_v23 = vmul.f32 0.5, %v1853_v52 }
 0x193   : > { %5871 = vmatprep.mubr.msk.f32.mxu0 %vm6966_vm14, %v6965_v29  ;;  %6062 = vmatprep.mubr.msk.f32.mxu1 %vm6966_vm14, %v6965_v29 }
 0x194   : > { %v1854_v5 = vsub.f32 %v7876_v43, %v7874_v28  ;;  %v1981_v28 = vld [vmem:[%s7495_s27 + $0x100] sm:$0xff] }
 0x195   : > { %v911_v36 = vpop.f32.mrb[64].mxu0  ;;  %v7890_v37 = vpop.f32.mrb[64].mxu1 }
 0x196   : > { %v7892_v44 = vmul.f32 %v911_v36, %v911_v36  ;;  %v913_v49 = vpop.f32.mrb[65].mxu0  ;;  %5872 = vmatmul.mubr.msk.f32.gmra.mrb[170].mxu0 %vm2030_vm12, %v1971_v19  ;;  %6063 = vmatmul.mubr.msk.f32.gmra.mrb[170].mxu1 %vm2604_vm13, %v1908_v39  ;;  %v1608_v56 = vpop.f32.mrb[65].mxu1  ;;  %v1917_v34 = vmul.f32 0.5, %v1854_v5 }
 0x197   : > { %5874 = vmatprep.mubr.msk.f32.mxu0 %vm6966_vm14, %v6965_v29  ;;  %6065 = vmatprep.mubr.msk.f32.mxu1 %vm6966_vm14, %v6965_v29 }
 0x198   : > { %v1855_v16 = vsub.f32 %v7892_v44, %v7890_v37  ;;  %v1982_v37 = vld [vmem:[%s7495_s27 + $0x108] sm:$0xff] }
 0x199   : > { %v916_v4 = vpop.f32.mrb[66].mxu0  ;;  %v7906_v47 = vpop.f32.mrb[66].mxu1 }
 0x19a   : > { %v7908_v46 = vmul.f32 %v916_v4, %v916_v4  ;;  %v918_v60 = vpop.f32.mrb[67].mxu0  ;;  %5875 = vmatmul.mubr.msk.f32.gmra.mrb[172].mxu0 %vm2030_vm12, %v1972_v42  ;;  %6066 = vmatmul.mubr.msk.f32.gmra.mrb[172].mxu1 %vm2604_vm13, %v1909_v48  ;;  %v1613_v41 = vpop.f32.mrb[67].mxu1  ;;  %v1918_v43 = vmul.f32 0.5, %v1855_v16 }
 0x19b   : > { %5877 = vmatprep.mubr.msk.f32.mxu0 %vm6966_vm14, %v6965_v29  ;;  %6068 = vmatprep.mubr.msk.f32.mxu1 %vm6966_vm14, %v6965_v29 }
 0x19c   : > { %v1856_v53 = vsub.f32 %v7908_v46, %v7906_v47  ;;  %v1983_v47 = vld [vmem:[%s7495_s27 + $0x110] sm:$0xff] }
 0x19d   : > { %v921_v14 = vpop.f32.mrb[68].mxu0  ;;  %v7928_v54 = vpop.f32.mrb[68].mxu1 }
 0x19e   : > { %v7930_v11 = vmul.f32 %v921_v14, %v921_v14  ;;  %v923_v12 = vpop.f32.mrb[69].mxu0  ;;  %5878 = vmatmul.mubr.msk.f32.gmra.mrb[174].mxu0 %vm2030_vm12, %v1973_v61  ;;  %6069 = vmatmul.mubr.msk.f32.gmra.mrb[174].mxu1 %vm2604_vm13, %v1910_v6  ;;  %v1618_v62 = vpop.f32.mrb[69].mxu1  ;;  %v1919_v44 = vmul.f32 0.5, %v1856_v53 }
 0x19f   : > { %5880 = vmatprep.mubr.msk.f32.mxu0 %vm6966_vm14, %v6965_v29  ;;  %6071 = vmatprep.mubr.msk.f32.mxu1 %vm6966_vm14, %v6965_v29 }
 0x1a0   : > { %v1857_v38 = vsub.f32 %v7930_v11, %v7928_v54  ;;  %v1984_v54 = vld [vmem:[%s7495_s27 + $0x118] sm:$0xff] }
 0x1a1   : > { %v926_v24 = vpop.f32.mrb[70].mxu0  ;;  %v7945_v7 = vpop.f32.mrb[70].mxu1 }
 0x1a2   : > { %v7947_v10 = vmul.f32 %v926_v24, %v926_v24  ;;  %v928_v22 = vpop.f32.mrb[71].mxu0  ;;  %5881 = vmatmul.mubr.msk.f32.gmra.mrb[176].mxu0 %vm2030_vm12, %v1974_v8  ;;  %6072 = vmatmul.mubr.msk.f32.gmra.mrb[176].mxu1 %vm2604_vm13, %v1911_v0  ;;  %v1623_v15 = vpop.f32.mrb[71].mxu1  ;;  %v1920_v46 = vmul.f32 0.5, %v1857_v38 }
 0x1a3   : > { %5883 = vmatprep.mubr.msk.f32.mxu0 %vm6966_vm14, %v6965_v29  ;;  %6074 = vmatprep.mubr.msk.f32.mxu1 %vm6966_vm14, %v6965_v29 }
 0x1a4   : > { %v1858_v9 = vsub.f32 %v7947_v10, %v7945_v7  ;;  %v1985_v7 = vld [vmem:[%s7495_s27 + $0x120] sm:$0xff] }
 0x1a5   : > { %v931_v51 = vpop.f32.mrb[72].mxu0  ;;  %v7961_v35 = vpop.f32.mrb[72].mxu1 }
 0x1a6   : > { %v7963_v18 = vmul.f32 %v931_v51, %v931_v51  ;;  %v933_v3 = vpop.f32.mrb[73].mxu0  ;;  %5884 = vmatmul.mubr.msk.f32.gmra.mrb[178].mxu0 %vm2030_vm12, %v1975_v21  ;;  %6075 = vmatmul.mubr.msk.f32.gmra.mrb[178].mxu1 %vm2604_vm13, %v1912_v1  ;;  %v1628_v30 = vpop.f32.mrb[73].mxu1  ;;  %v1921_v11 = vmul.f32 0.5, %v1858_v9 }
 0x1a7   : > { %5886 = vmatprep.mubr.msk.f32.mxu0 %vm6966_vm14, %v6965_v29  ;;  %6077 = vmatprep.mubr.msk.f32.mxu1 %vm6966_vm14, %v6965_v29 }
 0x1a8   : > { %v1859_v31 = vsub.f32 %v7963_v18, %v7961_v35  ;;  %v1986_v35 = vld [vmem:[%s7495_s27 + $0x128] sm:$0xff] }
 0x1a9   : > { %v936_v26 = vpop.f32.mrb[74].mxu0  ;;  %v7977_v45 = vpop.f32.mrb[74].mxu1 }
 0x1aa   : > { %v7979_v32 = vmul.f32 %v936_v26, %v936_v26  ;;  %v938_v19 = vpop.f32.mrb[75].mxu0  ;;  %5887 = vmatmul.mubr.msk.f32.gmra.mrb[180].mxu0 %vm2030_vm12, %v1976_v33  ;;  %6078 = vmatmul.mubr.msk.f32.gmra.mrb[180].mxu1 %vm2604_vm13, %v1913_v20  ;;  %v1633_v39 = vpop.f32.mrb[75].mxu1  ;;  %v1922_v10 = vmul.f32 0.5, %v1859_v31 }
 0x1ab   : > { %5889 = vmatprep.mubr.msk.f32.mxu0 %vm6966_vm14, %v6965_v29  ;;  %6080 = vmatprep.mubr.msk.f32.mxu1 %vm6966_vm14, %v6965_v29 }
 0x1ac   : > { %v1860_v2 = vsub.f32 %v7979_v32, %v7977_v45  ;;  %v1987_v45 = vld [vmem:[%s7495_s27 + $0x130] sm:$0xff] }
 0x1ad   : > { %v941_v36 = vpop.f32.mrb[76].mxu0  ;;  %v7993_v49 = vpop.f32.mrb[76].mxu1 }
 0x1ae   : > { %v7995_v56 = vmul.f32 %v941_v36, %v941_v36  ;;  %v943_v42 = vpop.f32.mrb[77].mxu0  ;;  %5890 = vmatmul.mubr.msk.f32.gmra.mrb[182].mxu0 %vm2030_vm12, %v1977_v50  ;;  %6081 = vmatmul.mubr.msk.f32.gmra.mrb[182].mxu1 %vm2604_vm13, %v1914_v58  ;;  %v1638_v48 = vpop.f32.mrb[77].mxu1  ;;  %v1923_v18 = vmul.f32 0.5, %v1860_v2 }
 0x1af   : > { %5892 = vmatprep.mubr.msk.f32.mxu0 %vm6966_vm14, %v6965_v29  ;;  %6083 = vmatprep.mubr.msk.f32.mxu1 %vm6966_vm14, %v6965_v29 }
 0x1b0   : > { %v1861_v25 = vsub.f32 %v7995_v56, %v7993_v49  ;;  %v1988_v49 = vld [vmem:[%s7495_s27 + $0x138] sm:$0xff] }
 0x1b1   : > { %v946_v4 = vpop.f32.mrb[78].mxu0  ;;  %v8009_v60 = vpop.f32.mrb[78].mxu1 }
 0x1b2   : > { %v8011_v41 = vmul.f32 %v946_v4, %v946_v4  ;;  %v948_v59 = vpop.f32.mrb[79].mxu0  ;;  %5893 = vmatmul.mubr.msk.f32.gmra.mrb[184].mxu0 %vm2030_vm12, %v1978_v57  ;;  %6084 = vmatmul.mubr.msk.f32.gmra.mrb[184].mxu1 %vm2604_vm13, %v1915_v13  ;;  %v1643_v55 = vpop.f32.mrb[79].mxu1  ;;  %v1924_v32 = vmul.f32 0.5, %v1861_v25 }
 0x1b3   : > { %5895 = vmatprep.mubr.msk.f32.mxu0 %vm6966_vm14, %v6965_v29  ;;  %6086 = vmatprep.mubr.msk.f32.mxu1 %vm6966_vm14, %v6965_v29 }
 0x1b4   : > { %v1862_v40 = vsub.f32 %v8011_v41, %v8009_v60  ;;  %v1989_v60 = vld [vmem:[%s7495_s27 + $0x140] sm:$0xff] }
 0x1b5   : > { %v951_v61 = vpop.f32.mrb[80].mxu0  ;;  %v8025_v27 = vpop.f32.mrb[80].mxu1 }
 0x1b6   : > { %v8027_v6 = vmul.f32 %v951_v61, %v951_v61  ;;  %v953_v14 = vpop.f32.mrb[81].mxu0  ;;  %5896 = vmatmul.mubr.msk.f32.gmra.mrb[186].mxu0 %vm2030_vm12, %v1979_v63  ;;  %6087 = vmatmul.mubr.msk.f32.gmra.mrb[186].mxu1 %vm2604_vm13, %v1916_v23  ;;  %v1648_v12 = vpop.f32.mrb[81].mxu1  ;;  %v1925_v56 = vmul.f32 0.5, %v1862_v40 }
 0x1b7   : > { %5898 = vmatprep.mubr.msk.f32.mxu0 %vm6966_vm14, %v6965_v29  ;;  %6089 = vmatprep.mubr.msk.f32.mxu1 %vm6966_vm14, %v6965_v29 }
 0x1b8   : > { %v1863_v52 = vsub.f32 %v8027_v6, %v8025_v27  ;;  %v1990_v27 = vld [vmem:[%s7495_s27 + $0x148] sm:$0xff] }
 0x1b9   : > { %v956_v62 = vpop.f32.mrb[82].mxu0  ;;  %v8041_v8 = vpop.f32.mrb[82].mxu1 }
 0x1ba   : > { %v8043_v0 = vmul.f32 %v956_v62, %v956_v62  ;;  %v958_v24 = vpop.f32.mrb[83].mxu0  ;;  %5899 = vmatmul.mubr.msk.f32.gmra.mrb[188].mxu0 %vm2030_vm12, %v1980_v17  ;;  %6090 = vmatmul.mubr.msk.f32.gmra.mrb[188].mxu1 %vm2604_vm13, %v1917_v34  ;;  %v1653_v22 = vpop.f32.mrb[83].mxu1  ;;  %v1926_v41 = vmul.f32 0.5, %v1863_v52 }
 0x1bb   : > { %5901 = vmatprep.mubr.msk.f32.mxu0 %vm6966_vm14, %v6965_v29  ;;  %6092 = vmatprep.mubr.msk.f32.mxu1 %vm6966_vm14, %v6965_v29 }
 0x1bc   : > { %v1864_v5 = vsub.f32 %v8043_v0, %v8041_v8  ;;  %v1991_v8 = vld [vmem:[%s7495_s27 + $0x150] sm:$0xff] }
 0x1bd   : > { %v961_v15 = vpop.f32.mrb[84].mxu0  ;;  %v8057_v21 = vpop.f32.mrb[84].mxu1 }
 0x1be   : > { %v8059_v1 = vmul.f32 %v961_v15, %v961_v15  ;;  %v963_v51 = vpop.f32.mrb[85].mxu0  ;;  %5902 = vmatmul.mubr.msk.f32.gmra.mrb[190].mxu0 %vm2030_vm12, %v1981_v28  ;;  %6093 = vmatmul.mubr.msk.f32.gmra.mrb[190].mxu1 %vm2604_vm13, %v1918_v43  ;;  %v1658_v3 = vpop.f32.mrb[85].mxu1  ;;  %v1927_v6 = vmul.f32 0.5, %v1864_v5 }
 0x1bf   : > { %5904 = vmatprep.mubr.msk.f32.mxu0 %vm6966_vm14, %v6965_v29  ;;  %6095 = vmatprep.mubr.msk.f32.mxu1 %vm6966_vm14, %v6965_v29 }
 0x1c0   : > { %v1865_v16 = vsub.f32 %v8059_v1, %v8057_v21  ;;  %v1992_v21 = vld [vmem:[%s7495_s27 + $0x158] sm:$0xff] }
 0x1c1   : > { %v966_v30 = vpop.f32.mrb[86].mxu0  ;;  %v8073_v33 = vpop.f32.mrb[86].mxu1 }
 0x1c2   : > { %v8075_v20 = vmul.f32 %v966_v30, %v966_v30  ;;  %v968_v26 = vpop.f32.mrb[87].mxu0  ;;  %5905 = vmatmul.mubr.msk.f32.gmra.mrb[192].mxu0 %vm2030_vm12, %v1982_v37  ;;  %6096 = vmatmul.mubr.msk.f32.gmra.mrb[192].mxu1 %vm2604_vm13, %v1919_v44  ;;  %v1663_v19 = vpop.f32.mrb[87].mxu1  ;;  %v1928_v0 = vmul.f32 0.5, %v1865_v16 }
 0x1c3   : > { %5907 = vmatprep.mubr.msk.f32.mxu0 %vm6966_vm14, %v6965_v29  ;;  %6098 = vmatprep.mubr.msk.f32.mxu1 %vm6966_vm14, %v6965_v29 }
 0x1c4   : > { %v1866_v53 = vsub.f32 %v8075_v20, %v8073_v33  ;;  %v1993_v33 = vld [vmem:[%s7495_s27 + $0x160] sm:$0xff] }
 0x1c5   : > { %v971_v39 = vpop.f32.mrb[88].mxu0  ;;  %v8089_v50 = vpop.f32.mrb[88].mxu1 }
 0x1c6   : > { %v8091_v58 = vmul.f32 %v971_v39, %v971_v39  ;;  %v973_v36 = vpop.f32.mrb[89].mxu0  ;;  %5908 = vmatmul.mubr.msk.f32.gmra.mrb[194].mxu0 %vm2030_vm12, %v1983_v47  ;;  %6099 = vmatmul.mubr.msk.f32.gmra.mrb[194].mxu1 %vm2604_vm13, %v1920_v46  ;;  %v1668_v42 = vpop.f32.mrb[89].mxu1  ;;  %v1929_v1 = vmul.f32 0.5, %v1866_v53 }
 0x1c7   : > { %5910 = vmatprep.mubr.msk.f32.mxu0 %vm6966_vm14, %v6965_v29  ;;  %6101 = vmatprep.mubr.msk.f32.mxu1 %vm6966_vm14, %v6965_v29 }
 0x1c8   : > { %v1867_v38 = vsub.f32 %v8091_v58, %v8089_v50  ;;  %v1994_v50 = vld [vmem:[%s7495_s27 + $0x168] sm:$0xff] }
 0x1c9   : > { %v976_v48 = vpop.f32.mrb[90].mxu0  ;;  %v8105_v57 = vpop.f32.mrb[90].mxu1 }
 0x1ca   : > { %v8107_v13 = vmul.f32 %v976_v48, %v976_v48  ;;  %v978_v4 = vpop.f32.mrb[91].mxu0  ;;  %5911 = vmatmul.mubr.msk.f32.gmra.mrb[196].mxu0 %vm2030_vm12, %v1984_v54  ;;  %6102 = vmatmul.mubr.msk.f32.gmra.mrb[196].mxu1 %vm2604_vm13, %v1921_v11  ;;  %v1673_v59 = vpop.f32.mrb[91].mxu1  ;;  %v1930_v20 = vmul.f32 0.5, %v1867_v38 }
 0x1cb   : > { %5913 = vmatprep.mubr.msk.f32.mxu0 %vm6966_vm14, %v6965_v29  ;;  %6104 = vmatprep.mubr.msk.f32.mxu1 %vm6966_vm14, %v6965_v29 }
 0x1cc   : > { %v1868_v9 = vsub.f32 %v8107_v13, %v8105_v57  ;;  %v1995_v57 = vld [vmem:[%s7495_s27 + $0x170] sm:$0xff] }
 0x1cd   : > { %v981_v55 = vpop.f32.mrb[92].mxu0  ;;  %v8121_v63 = vpop.f32.mrb[92].mxu1 }
 0x1ce   : > { %v8123_v23 = vmul.f32 %v981_v55, %v981_v55  ;;  %v983_v61 = vpop.f32.mrb[93].mxu0  ;;  %5914 = vmatmul.mubr.msk.f32.gmra.mrb[198].mxu0 %vm2030_vm12, %v1985_v7  ;;  %6105 = vmatmul.mubr.msk.f32.gmra.mrb[198].mxu1 %vm2604_vm13, %v1922_v10  ;;  %v1678_v14 = vpop.f32.mrb[93].mxu1  ;;  %v1931_v58 = vmul.f32 0.5, %v1868_v9 }
 0x1cf   : > { %5916 = vmatprep.mubr.msk.f32.mxu0 %vm6966_vm14, %v6965_v29  ;;  %6107 = vmatprep.mubr.msk.f32.mxu1 %vm6966_vm14, %v6965_v29 }
 0x1d0   : > { %v1869_v31 = vsub.f32 %v8123_v23, %v8121_v63  ;;  %v1996_v63 = vld [vmem:[%s7495_s27 + $0x178] sm:$0xff] }
 0x1d1   : > { %v986_v12 = vpop.f32.mrb[94].mxu0  ;;  %v8137_v17 = vpop.f32.mrb[94].mxu1 }
 0x1d2   : > { %v8139_v34 = vmul.f32 %v986_v12, %v986_v12  ;;  %v988_v62 = vpop.f32.mrb[95].mxu0  ;;  %5917 = vmatmul.mubr.msk.f32.gmra.mrb[200].mxu0 %vm2030_vm12, %v1986_v35  ;;  %6108 = vmatmul.mubr.msk.f32.gmra.mrb[200].mxu1 %vm2604_vm13, %v1923_v18  ;;  %v1683_v24 = vpop.f32.mrb[95].mxu1  ;;  %v1932_v13 = vmul.f32 0.5, %v1869_v31 }
 0x1d3   : > { %5919 = vmatprep.mubr.msk.f32.mxu0 %vm6966_vm14, %v6965_v29  ;;  %6110 = vmatprep.mubr.msk.f32.mxu1 %vm6966_vm14, %v6965_v29 }
 0x1d4   : > { %v1870_v2 = vsub.f32 %v8139_v34, %v8137_v17  ;;  %v1997_v17 = vld [vmem:[%s7495_s27 + $0x180] sm:$0xff] }
 0x1d5   : > { %v991_v22 = vpop.f32.mrb[96].mxu0  ;;  %v8153_v28 = vpop.f32.mrb[96].mxu1 }
 0x1d6   : > { %v8155_v43 = vmul.f32 %v991_v22, %v991_v22  ;;  %v993_v15 = vpop.f32.mrb[97].mxu0  ;;  %5920 = vmatmul.mubr.msk.f32.gmra.mrb[202].mxu0 %vm2030_vm12, %v1987_v45  ;;  %6111 = vmatmul.mubr.msk.f32.gmra.mrb[202].mxu1 %vm2604_vm13, %v1924_v32  ;;  %v1688_v51 = vpop.f32.mrb[97].mxu1  ;;  %v1933_v23 = vmul.f32 0.5, %v1870_v2 }
 0x1d7   : > { %5922 = vmatprep.mubr.msk.f32.mxu0 %vm6966_vm14, %v6965_v29  ;;  %6113 = vmatprep.mubr.msk.f32.mxu1 %vm6966_vm14, %v6965_v29 }
 0x1d8   : > { %v1871_v25 = vsub.f32 %v8155_v43, %v8153_v28  ;;  %v1998_v28 = vld [vmem:[%s7495_s27 + $0x188] sm:$0xff] }
 0x1d9   : > { %v996_v3 = vpop.f32.mrb[98].mxu0  ;;  %v8169_v37 = vpop.f32.mrb[98].mxu1 }
 0x1da   : > { %v8171_v44 = vmul.f32 %v996_v3, %v996_v3  ;;  %v998_v30 = vpop.f32.mrb[99].mxu0  ;;  %5923 = vmatmul.mubr.msk.f32.gmra.mrb[204].mxu0 %vm2030_vm12, %v1988_v49  ;;  %6114 = vmatmul.mubr.msk.f32.gmra.mrb[204].mxu1 %vm2604_vm13, %v1925_v56  ;;  %v1693_v26 = vpop.f32.mrb[99].mxu1  ;;  %v1934_v34 = vmul.f32 0.5, %v1871_v25 }
 0x1db   : > { %5925 = vmatprep.mubr.msk.f32.mxu0 %vm6966_vm14, %v6965_v29  ;;  %6116 = vmatprep.mubr.msk.f32.mxu1 %vm6966_vm14, %v6965_v29 }
 0x1dc   : > { %v1872_v40 = vsub.f32 %v8171_v44, %v8169_v37  ;;  %v1999_v37 = vld [vmem:[%s7495_s27 + $0x190] sm:$0xff] }
 0x1dd   : > { %v1001_v19 = vpop.f32.mrb[100].mxu0  ;;  %v8185_v47 = vpop.f32.mrb[100].mxu1 }
 0x1de   : > { %v8187_v46 = vmul.f32 %v1001_v19, %v1001_v19  ;;  %v1003_v39 = vpop.f32.mrb[101].mxu0  ;;  %5926 = vmatmul.mubr.msk.f32.gmra.mrb[206].mxu0 %vm2030_vm12, %v1989_v60  ;;  %6117 = vmatmul.mubr.msk.f32.gmra.mrb[206].mxu1 %vm2604_vm13, %v1926_v41  ;;  %v1698_v36 = vpop.f32.mrb[101].mxu1  ;;  %v1935_v43 = vmul.f32 0.5, %v1872_v40 }
 0x1df   : > { %5928 = vmatprep.mubr.msk.f32.mxu0 %vm6966_vm14, %v6965_v29  ;;  %6119 = vmatprep.mubr.msk.f32.mxu1 %vm6966_vm14, %v6965_v29 }
 0x1e0   : > { %v1873_v52 = vsub.f32 %v8187_v46, %v8185_v47  ;;  %v2000_v47 = vld [vmem:[%s7495_s27 + $0x198] sm:$0xff] }
 0x1e1   : > { %v1006_v42 = vpop.f32.mrb[102].mxu0  ;;  %v8201_v54 = vpop.f32.mrb[102].mxu1 }
 0x1e2   : > { %v8203_v11 = vmul.f32 %v1006_v42, %v1006_v42  ;;  %v1008_v48 = vpop.f32.mrb[103].mxu0  ;;  %5929 = vmatmul.mubr.msk.f32.gmra.mrb[208].mxu0 %vm2030_vm12, %v1990_v27  ;;  %6120 = vmatmul.mubr.msk.f32.gmra.mrb[208].mxu1 %vm2604_vm13, %v1927_v6  ;;  %v1703_v4 = vpop.f32.mrb[103].mxu1  ;;  %v1936_v44 = vmul.f32 0.5, %v1873_v52 }
 0x1e3   : > { %5931 = vmatprep.mubr.msk.f32.mxu0 %vm6966_vm14, %v6965_v29  ;;  %6122 = vmatprep.mubr.msk.f32.mxu1 %vm6966_vm14, %v6965_v29 }
 0x1e4   : > { %v1874_v5 = vsub.f32 %v8203_v11, %v8201_v54  ;;  %v2001_v54 = vld [vmem:[%s7495_s27 + $0x1a0] sm:$0xff] }
 0x1e5   : > { %v1011_v59 = vpop.f32.mrb[104].mxu0  ;;  %v8217_v7 = vpop.f32.mrb[104].mxu1 }
 0x1e6   : > { %v8219_v10 = vmul.f32 %v1011_v59, %v1011_v59  ;;  %v1013_v55 = vpop.f32.mrb[105].mxu0  ;;  %5932 = vmatmul.mubr.msk.f32.gmra.mrb[210].mxu0 %vm2030_vm12, %v1991_v8  ;;  %6123 = vmatmul.mubr.msk.f32.gmra.mrb[210].mxu1 %vm2604_vm13, %v1928_v0  ;;  %v1708_v61 = vpop.f32.mrb[105].mxu1  ;;  %v1937_v46 = vmul.f32 0.5, %v1874_v5 }
 0x1e7   : > { %5934 = vmatprep.mubr.msk.f32.mxu0 %vm6966_vm14, %v6965_v29  ;;  %6125 = vmatprep.mubr.msk.f32.mxu1 %vm6966_vm14, %v6965_v29 }
 0x1e8   : > { %v1875_v16 = vsub.f32 %v8219_v10, %v8217_v7  ;;  %v2002_v7 = vld [vmem:[%s7495_s27 + $0x1a8] sm:$0xff] }
 0x1e9   : > { %v1016_v14 = vpop.f32.mrb[106].mxu0  ;;  %v8233_v35 = vpop.f32.mrb[106].mxu1 }
 0x1ea   : > { %v8235_v18 = vmul.f32 %v1016_v14, %v1016_v14  ;;  %v1018_v12 = vpop.f32.mrb[107].mxu0  ;;  %5935 = vmatmul.mubr.msk.f32.gmra.mrb[212].mxu0 %vm2030_vm12, %v1992_v21  ;;  %6126 = vmatmul.mubr.msk.f32.gmra.mrb[212].mxu1 %vm2604_vm13, %v1929_v1  ;;  %v1713_v62 = vpop.f32.mrb[107].mxu1  ;;  %v1938_v11 = vmul.f32 0.5, %v1875_v16 }
 0x1eb   : > { %5937 = vmatprep.mubr.msk.f32.mxu0 %vm6966_vm14, %v6965_v29  ;;  %6128 = vmatprep.mubr.msk.f32.mxu1 %vm6966_vm14, %v6965_v29 }
 0x1ec   : > { %v1876_v53 = vsub.f32 %v8235_v18, %v8233_v35  ;;  %v2003_v35 = vld [vmem:[%s7495_s27 + $0x1b0] sm:$0xff] }
 0x1ed   : > { %v1021_v24 = vpop.f32.mrb[108].mxu0  ;;  %v8249_v45 = vpop.f32.mrb[108].mxu1 }
 0x1ee   : > { %v8251_v32 = vmul.f32 %v1021_v24, %v1021_v24  ;;  %v1023_v22 = vpop.f32.mrb[109].mxu0  ;;  %5938 = vmatmul.mubr.msk.f32.gmra.mrb[214].mxu0 %vm2030_vm12, %v1993_v33  ;;  %6129 = vmatmul.mubr.msk.f32.gmra.mrb[214].mxu1 %vm2604_vm13, %v1930_v20  ;;  %v1718_v15 = vpop.f32.mrb[109].mxu1  ;;  %v1939_v10 = vmul.f32 0.5, %v1876_v53 }
 0x1ef   : > { %5940 = vmatprep.mubr.msk.f32.mxu0 %vm6966_vm14, %v6965_v29  ;;  %6131 = vmatprep.mubr.msk.f32.mxu1 %vm6966_vm14, %v6965_v29 }
 0x1f0   : > { %v1877_v38 = vsub.f32 %v8251_v32, %v8249_v45 }
 0x1f1   : > { %v1026_v51 = vpop.f32.mrb[110].mxu0  ;;  %v8265_v49 = vpop.f32.mrb[110].mxu1 }
 0x1f2   : > { %v8267_v56 = vmul.f32 %v1026_v51, %v1026_v51  ;;  %v1028_v3 = vpop.f32.mrb[111].mxu0  ;;  %5941 = vmatmul.mubr.msk.f32.gmra.mrb[216].mxu0 %vm2030_vm12, %v1994_v50  ;;  %6132 = vmatmul.mubr.msk.f32.gmra.mrb[216].mxu1 %vm2604_vm13, %v1931_v58  ;;  %v1723_v30 = vpop.f32.mrb[111].mxu1  ;;  %v1940_v18 = vmul.f32 0.5, %v1877_v38 }
 0x1f3   : > { %5943 = vmatprep.mubr.msk.f32.mxu0 %vm6966_vm14, %v6965_v29  ;;  %6134 = vmatprep.mubr.msk.f32.mxu1 %vm6966_vm14, %v6965_v29 }
 0x1f4   : > { %v1878_v9 = vsub.f32 %v8267_v56, %v8265_v49  ;;  %v2005_v49 = vld [vmem:[%s7495_s27 + $0x1c0] sm:$0xff] }
 0x1f5   : > { %v1031_v26 = vpop.f32.mrb[112].mxu0  ;;  %v8281_v60 = vpop.f32.mrb[112].mxu1 }
 0x1f6   : > { %v8283_v41 = vmul.f32 %v1031_v26, %v1031_v26  ;;  %v1033_v19 = vpop.f32.mrb[113].mxu0  ;;  %5944 = vmatmul.mubr.msk.f32.gmra.mrb[218].mxu0 %vm2030_vm12, %v1995_v57  ;;  %6135 = vmatmul.mubr.msk.f32.gmra.mrb[218].mxu1 %vm2604_vm13, %v1932_v13  ;;  %v1728_v39 = vpop.f32.mrb[113].mxu1  ;;  %v1941_v45 = vmul.f32 0.5, %v1878_v9 }
 0x1f7   : > { %5946 = vmatprep.mubr.msk.f32.mxu0 %vm6966_vm14, %v6965_v29  ;;  %6137 = vmatprep.mubr.msk.f32.mxu1 %vm6966_vm14, %v6965_v29 }
 0x1f8   : > { %v1879_v31 = vsub.f32 %v8283_v41, %v8281_v60  ;;  %v2006_v60 = vld [vmem:[%s7495_s27 + $0x1c8] sm:$0xff] }
 0x1f9   : > { %v1036_v36 = vpop.f32.mrb[114].mxu0  ;;  %v8297_v27 = vpop.f32.mrb[114].mxu1 }
 0x1fa   : > { %v8299_v6 = vmul.f32 %v1036_v36, %v1036_v36  ;;  %v1038_v42 = vpop.f32.mrb[115].mxu0  ;;  %5947 = vmatmul.mubr.msk.f32.gmra.mrb[220].mxu0 %vm2030_vm12, %v1996_v63  ;;  %6138 = vmatmul.mubr.msk.f32.gmra.mrb[220].mxu1 %vm2604_vm13, %v1933_v23  ;;  %v1733_v48 = vpop.f32.mrb[115].mxu1  ;;  %v1942_v9 = vmul.f32 0.5, %v1879_v31 }
 0x1fb   : > { %5949 = vmatprep.mubr.msk.f32.mxu0 %vm6966_vm14, %v6965_v29  ;;  %6140 = vmatprep.mubr.msk.f32.mxu1 %vm6966_vm14, %v6965_v29 }
 0x1fc   : > { %v1880_v2 = vsub.f32 %v8299_v6, %v8297_v27 }
 0x1fd   : > { %v1041_v4 = vpop.f32.mrb[116].mxu0  ;;  %v8313_v8 = vpop.f32.mrb[116].mxu1 }
 0x1fe   : > { %v8315_v0 = vmul.f32 %v1041_v4, %v1041_v4  ;;  %v1043_v59 = vpop.f32.mrb[117].mxu0  ;;  %5950 = vmatmul.mubr.msk.f32.gmra.mrb[222].mxu0 %vm2030_vm12, %v1997_v17  ;;  %6141 = vmatmul.mubr.msk.f32.gmra.mrb[222].mxu1 %vm2604_vm13, %v1934_v34  ;;  %v1738_v55 = vpop.f32.mrb[117].mxu1  ;;  %v1943_v41 = vmul.f32 0.5, %v1880_v2 }
 0x1ff   : > { %5952 = vmatprep.mubr.msk.f32.mxu0 %vm6966_vm14, %v6965_v29  ;;  %6143 = vmatprep.mubr.msk.f32.mxu1 %vm6966_vm14, %v6965_v29  ;;  %v2004_v59 = vld [vmem:[%s7495_s27 + $0x1b8] sm:$0xff] }
 0x200   : > { %v1881_v25 = vsub.f32 %v8315_v0, %v8313_v8 }
 0x201   : > { %v1046_v61 = vpop.f32.mrb[118].mxu0  ;;  %v8329_v21 = vpop.f32.mrb[118].mxu1 }
 0x202   : > { %v8331_v1 = vmul.f32 %v1046_v61, %v1046_v61  ;;  %v1048_v14 = vpop.f32.mrb[119].mxu0  ;;  %5953 = vmatmul.mubr.msk.f32.gmra.mrb[224].mxu0 %vm2030_vm12, %v1998_v28  ;;  %6144 = vmatmul.mubr.msk.f32.gmra.mrb[224].mxu1 %vm2604_vm13, %v1935_v43  ;;  %v1743_v12 = vpop.f32.mrb[119].mxu1  ;;  %v2025_v61 = vld [vmem:[%s9400_s2 + $0x68] sm:$0xff]  ;;  %v1944_v27 = vmul.f32 0.5, %v1881_v25 }
 0x203   : > { %5955 = vmatprep.mubr.msk.f32.mxu0 %vm6966_vm14, %v6965_v29  ;;  %6146 = vmatprep.mubr.msk.f32.mxu1 %vm6966_vm14, %v6965_v29  ;;  %v2026_v14 = vld [vmem:[%s9400_s2 + $0x70] sm:$0xff] }
 0x204   : > { %v1882_v40 = vsub.f32 %v8331_v1, %v8329_v21  ;;  %v6685_v56 = vpack.c.bf16 %v2026_v14, %v2025_v61 }
 0x205   : > { %v1051_v62 = vpop.f32.mrb[120].mxu0  ;;  %v8345_v33 = vpop.f32.mrb[120].mxu1 }
 0x206   : > { %v8347_v20 = vmul.f32 %v1051_v62, %v1051_v62  ;;  %v1053_v24 = vpop.f32.mrb[121].mxu0  ;;  %5956 = vmatmul.mubr.msk.f32.gmra.mrb[226].mxu0 %vm2030_vm12, %v1999_v37  ;;  %6147 = vmatmul.mubr.msk.f32.gmra.mrb[226].mxu1 %vm2604_vm13, %v1936_v44  ;;  %v1748_v22 = vpop.f32.mrb[121].mxu1  ;;  %v1945_v8 = vmul.f32 0.5, %v1882_v40 }
 0x207   : > { %5958 = vmatprep.mubr.msk.f32.mxu0 %vm6966_vm14, %v6965_v29  ;;  %6149 = vmatprep.mubr.msk.f32.mxu1 %vm6966_vm14, %v6965_v29 }
 0x208   : > { %v1883_v52 = vsub.f32 %v8347_v20, %v8345_v33  ;;  %6686 = vmatpush3.bf16.msra.mxu1 %v6685_v56  ;;  %v8498_v20 = vld [vmem:[%s9400_s2 + $0x78] ss:$0 sm:$0xff] }
 0x209   : > { %v1056_v15 = vpop.f32.mrb[122].mxu0  ;;  %v8361_v50 = vpop.f32.mrb[122].mxu1 }
 0x20a   : > { %v8363_v58 = vmul.f32 %v1056_v15, %v1056_v15  ;;  %v1058_v51 = vpop.f32.mrb[123].mxu0  ;;  %5959 = vmatmul.mubr.msk.f32.gmra.mrb[228].mxu0 %vm2030_vm12, %v2000_v47  ;;  %6150 = vmatmul.mubr.msk.f32.gmra.mrb[228].mxu1 %vm2604_vm13, %v1937_v46  ;;  %v1753_v3 = vpop.f32.mrb[123].mxu1  ;;  %v1946_v21 = vmul.f32 0.5, %v1883_v52 }
 0x20b   : > { %5961 = vmatprep.mubr.msk.f32.mxu0 %vm6966_vm14, %v6965_v29  ;;  %6152 = vmatprep.mubr.msk.f32.mxu1 %vm6966_vm14, %v6965_v29  ;;  %v2007_v51 = vld [vmem:[%s7495_s27 + $0x1d0] sm:$0xff] }
 0x20c   : > { %v1884_v5 = vsub.f32 %v8363_v58, %v8361_v50  ;;  %v2011_v50 = vld [vmem:[%s7495_s27 + $0x1f0] sm:$0xff] }
 0x20d   : > { %v1061_v30 = vpop.f32.mrb[124].mxu0  ;;  %v8377_v57 = vpop.f32.mrb[124].mxu1 }
 0x20e   : > { %v8379_v13 = vmul.f32 %v1061_v30, %v1061_v30  ;;  %v1063_v26 = vpop.f32.mrb[125].mxu0  ;;  %5962 = vmatmul.mubr.msk.f32.gmra.mrb[230].mxu0 %vm2030_vm12, %v2001_v54  ;;  %6153 = vmatmul.mubr.msk.f32.gmra.mrb[230].mxu1 %vm2604_vm13, %v1938_v11  ;;  %v1758_v19 = vpop.f32.mrb[125].mxu1  ;;  %v2008_v30 = vld [vmem:[%s7495_s27 + $0x1d8] sm:$0xff]  ;;  %v1947_v33 = vmul.f32 0.5, %v1884_v5 }
 0x20f   : > { %5964 = vmatprep.mubr.msk.f32.mxu0 %vm6966_vm14, %v6965_v29  ;;  %6155 = vmatprep.mubr.msk.f32.mxu1 %vm6966_vm14, %v6965_v29 }
 0x210   : > { %v1885_v16 = vsub.f32 %v8379_v13, %v8377_v57 }
 0x211   : > { %v2290_v39 = vpop.f32.mrb[126].mxu0  ;;  %v2860_v63 = vpop.f32.mrb[126].mxu1 }
 0x212   : > { %v8393_v23 = vadd.f32 %v2860_v63, %v2290_v39  ;;  %v5807_v36 = vpop.f32.mrb[127].mxu0  ;;  %5965 = vmatmul.mubr.msk.f32.gmra.mrb[232].mxu0 %vm2030_vm12, %v2002_v7  ;;  %v5998_v42 = vpop.f32.mrb[127].mxu1  ;;  %6156 = vmatmul.mubr.msk.f32.gmra.mrb[232].mxu1 %vm2604_vm13, %v1939_v10  ;;  %v2009_v10 = vld [vmem:[%s7495_s27 + $0x1e0] sm:$0xff]  ;;  %v1948_v58 = vmul.f32 0.5, %v1885_v16 }
 0x213   : > { %5967 = vmatprep.mubr.msk.f32.mxu0 %vm6966_vm14, %v6965_v29  ;;  %6158 = vmatprep.mubr.msk.f32.mxu1 %vm6966_vm14, %v6965_v29  ;;  %v2010_v42 = vld [vmem:[%s7495_s27 + $0x1e8] sm:$0xff] }
 0x214   : > { %v3178_v5 = vadd.f32 %v8498_v20, %v8393_v23 }
 0x215   : > { %v2295_v53 = vpop.f32.mrb[128].mxu0  ;;  %v2865_v48 = vpop.f32.mrb[128].mxu1 }
 0x216   : > { %v8405_v17 = vadd.f32 %v2865_v48, %v2295_v53  ;;  %v5810_v34 = vpop.f32.mrb[129].mxu0  ;;  %5968 = vmatmul.mubr.msk.f32.gmra.mrb[234].mxu0 %vm2030_vm12, %v2003_v35  ;;  %v6001_v4 = vpop.f32.mrb[129].mxu1  ;;  %6159 = vmatmul.mubr.msk.f32.gmra.mrb[234].mxu1 %vm2604_vm13, %v1940_v18  ;;  %v3241_v57 = vmax.f32 %v3178_v5, 0.0 }
 0x217   : > { %5970 = vmatprep.mubr.msk.f32.mxu0 %vm6966_vm14, %v6965_v29  ;;  %6161 = vmatprep.mubr.msk.f32.mxu1 %vm6966_vm14, %v6965_v29 }
 0x218   : > { %v3179_v13 = vadd.f32 %v8498_v20, %v8405_v17 }
 0x219   : > { %v2300_v32 = vpop.f32.mrb[130].mxu0  ;;  %v2870_v38 = vpop.f32.mrb[130].mxu1 }
 0x21a   : > { %v8417_v55 = vadd.f32 %v2870_v38, %v2300_v32  ;;  %v5813_v28 = vpop.f32.mrb[131].mxu0  ;;  %5971 = vmatmul.mubr.msk.f32.gmra.mrb[236].mxu0 %vm2030_vm12, %v2004_v59  ;;  %v6004_v43 = vpop.f32.mrb[131].mxu1  ;;  %6162 = vmatmul.mubr.msk.f32.gmra.mrb[236].mxu1 %vm2604_vm13, %v1941_v45  ;;  %v3242_v61 = vmax.f32 %v3179_v13, 0.0 }
 0x21b   : > { %5973 = vmatprep.mubr.msk.f32.mxu0 %vm6966_vm14, %v6965_v29  ;;  %6164 = vmatprep.mubr.msk.f32.mxu1 %vm6966_vm14, %v6965_v29 }
 0x21c   : > { %v3180_v14 = vadd.f32 %v8498_v20, %v8417_v55 }
 0x21d   : > { %v2305_v12 = vpop.f32.mrb[132].mxu0  ;;  %v2875_v37 = vpop.f32.mrb[132].mxu1 }
 0x21e   : > { %v8435_v44 = vadd.f32 %v2875_v37, %v2305_v12  ;;  %v5816_v62 = vpop.f32.mrb[133].mxu0  ;;  %5974 = vmatmul.mubr.msk.f32.gmra.mrb[238].mxu0 %vm2030_vm12, %v2005_v49  ;;  %v6007_v24 = vpop.f32.mrb[133].mxu1  ;;  %6165 = vmatmul.mubr.msk.f32.gmra.mrb[238].mxu1 %vm2604_vm13, %v1942_v9  ;;  %v3243_v37 = vmax.f32 %v3180_v14, 0.0 }
 0x21f   : > { %5976 = vmatprep.mubr.msk.f32.mxu0 %vm6966_vm14, %v6965_v29  ;;  %6167 = vmatprep.mubr.msk.f32.mxu1 %vm6966_vm14, %v6965_v29 }
 0x220   : > { %v3181_v62 = vadd.f32 %v8498_v20, %v8435_v44 }
 0x221   : > { %v2310_v31 = vpop.f32.mrb[134].mxu0  ;;  %v2880_v22 = vpop.f32.mrb[134].mxu1 }
 0x222   : > { %v8447_v47 = vadd.f32 %v2880_v22, %v2310_v31  ;;  %v5819_v46 = vpop.f32.mrb[135].mxu0  ;;  %5977 = vmatmul.mubr.msk.f32.gmra.mrb[240].mxu0 %vm2030_vm12, %v2006_v60  ;;  %v6010_v15 = vpop.f32.mrb[135].mxu1  ;;  %6168 = vmatmul.mubr.msk.f32.gmra.mrb[240].mxu1 %vm2604_vm13, %v1943_v41  ;;  %v3244_v22 = vmax.f32 %v3181_v62, 0.0 }
 0x223   : > { %5979 = vmatprep.mubr.msk.f32.mxu0 %vm6966_vm14, %v6965_v29  ;;  %6170 = vmatprep.mubr.msk.f32.mxu1 %vm6966_vm14, %v6965_v29 }
 0x224   : > { %v3182_v46 = vadd.f32 %v8498_v20, %v8447_v47 }
 0x225   : > { %v2315_v6 = vpop.f32.mrb[136].mxu0  ;;  %v2885_v2 = vpop.f32.mrb[136].mxu1 }
 0x226   : > { %v8459_v3 = vadd.f32 %v2885_v2, %v2315_v6  ;;  %v5822_v54 = vpop.f32.mrb[137].mxu0  ;;  %5980 = vmatmul.mubr.msk.f32.gmra.mrb[242].mxu0 %vm2030_vm12, %v2007_v51  ;;  %v6013_v11 = vpop.f32.mrb[137].mxu1  ;;  %6171 = vmatmul.mubr.msk.f32.gmra.mrb[242].mxu1 %vm2604_vm13, %v1944_v27  ;;  %v3245_v2 = vmax.f32 %v3182_v46, 0.0 }
 0x227   : > { %5982 = vmatprep.mubr.msk.f32.mxu0 %vm6966_vm14, %v6965_v29  ;;  %6173 = vmatprep.mubr.msk.f32.mxu1 %vm6966_vm14, %v6965_v29 }
 0x228   : > { %v3183_v54 = vadd.f32 %v8498_v20, %v8459_v3 }
 0x229   : > { %v2320_v0 = vpop.f32.mrb[138].mxu0  ;;  %v2890_v25 = vpop.f32.mrb[138].mxu1 }
 0x22a   : > { %v8471_v26 = vadd.f32 %v2890_v25, %v2320_v0  ;;  %v5825_v19 = vpop.f32.mrb[139].mxu0  ;;  %5983 = vmatmul.mubr.msk.f32.gmra.mrb[244].mxu0 %vm2030_vm12, %v2008_v30  ;;  %v6016_v7 = vpop.f32.mrb[139].mxu1  ;;  %6174 = vmatmul.mubr.msk.f32.gmra.mrb[244].mxu1 %vm2604_vm13, %v1945_v8  ;;  %v3246_v25 = vmax.f32 %v3183_v54, 0.0 }
 0x22b   : > { %5985 = vmatprep.mubr.msk.f32.mxu0 %vm6966_vm14, %v6965_v29  ;;  %6176 = vmatprep.mubr.msk.f32.mxu1 %vm6966_vm14, %v6965_v29 }
 0x22c   : > { %v3184_v19 = vadd.f32 %v8498_v20, %v8471_v26 }
 0x22d   : > { %v2325_v1 = vpop.f32.mrb[140].mxu0  ;;  %v2895_v40 = vpop.f32.mrb[140].mxu1 }
 0x22e   : > { %v8483_v39 = vadd.f32 %v2895_v40, %v2325_v1  ;;  %v5828_v63 = vpop.f32.mrb[141].mxu0  ;;  %5986 = vmatmul.mubr.msk.f32.gmra.mrb[246].mxu0 %vm2030_vm12, %v2009_v10  ;;  %v6019_v36 = vpop.f32.mrb[141].mxu1  ;;  %6177 = vmatmul.mubr.msk.f32.gmra.mrb[246].mxu1 %vm2604_vm13, %v1946_v21  ;;  %v3247_v40 = vmax.f32 %v3184_v19, 0.0 }
 0x22f   : > { %5988 = vmatprep.mubr.msk.f32.mxu0 %vm6966_vm14, %v6965_v29  ;;  %6179 = vmatprep.mubr.msk.f32.mxu1 %vm6966_vm14, %v6965_v29 }
 0x230   : > { %v3185_v63 = vadd.f32 %v8498_v20, %v8483_v39 }
 0x231   : > { %v2330_v52 = vpop.f32.mrb[142].mxu0  ;;  %v2900_v35 = vpop.f32.mrb[142].mxu1 }
 0x232   : > { %v8500_v18 = vadd.f32 %v2900_v35, %v2330_v52  ;;  %v5831_v53 = vpop.f32.mrb[143].mxu0  ;;  %5989 = vmatmul.mubr.msk.f32.gmra.mrb[248].mxu0 %vm2030_vm12, %v2010_v42  ;;  %v6022_v48 = vpop.f32.mrb[143].mxu1  ;;  %6180 = vmatmul.mubr.msk.f32.gmra.mrb[248].mxu1 %vm2604_vm13, %v1947_v33  ;;  %v3248_v35 = vmax.f32 %v3185_v63, 0.0 }
 0x233   : > { %5991 = vmatprep.mubr.msk.f32.mxu0 %vm6966_vm14, %v6965_v29  ;;  %6182 = vmatprep.mubr.msk.f32.mxu1 %vm6966_vm14, %v6965_v29 }
 0x234   : > { %v3186_v53 = vadd.f32 %v8498_v20, %v8500_v18 }
 0x235   : > { %v2335_v34 = vpop.f32.mrb[144].mxu0  ;;  %v2905_v4 = vpop.f32.mrb[144].mxu1 }
 0x236   : > { %v8514_v59 = vadd.f32 %v2905_v4, %v2335_v34  ;;  %v5834_v45 = vpop.f32.mrb[145].mxu0  ;;  %5992 = vmatmul.mubr.msk.f32.gmra.mrb[250].mxu0 %vm2030_vm12, %v2011_v50  ;;  %v6025_v32 = vpop.f32.mrb[145].mxu1  ;;  %6183 = vmatmul.mubr.msk.f32.gmra.mrb[250].mxu1 %vm2604_vm13, %v1948_v58  ;;  %v3249_v34 = vmax.f32 %v3186_v53, 0.0 }
 0x237   : > { %6201 = vmatprep.mubr.msk.f32.mxu0 %vm6966_vm14, %v6965_v29  ;;  %6398 = vmatprep.mubr.msk.f32.mxu1 %vm6966_vm14, %v6965_v29 }
 0x238   : > { %v3187_v4 = vadd.f32 %v8498_v20, %v8514_v59 }
 0x239   : > { %v2340_v16 = vpop.f32.mrb[146].mxu0  ;;  %v2910_v23 = vpop.f32.mrb[146].mxu1 }
 0x23a   : > { %v8524_v38 = vadd.f32 %v2910_v23, %v2340_v16  ;;  %v5837_v28 = vpop.f32.mrb[147].mxu0  ;;  %v6028_v43 = vpop.f32.mrb[147].mxu1  ;;  %6202 = vmatmul.mubr.msk.f32.vlgmr.msra.gmra.mrb[252].mxu0 %vm3308_vm15, %v3241_v57  ;;  %v3250_v16 = vmax.f32 %v3187_v4, 0.0 }
 0x23b   : > { %6204 = vmatprep.mubr.msk.f32.mxu0 %vm6966_vm14, %v6965_v29 }
 0x23c   : > { %v3188_v23 = vadd.f32 %v8498_v20, %v8524_v38 }
 0x23d   : > { %v2345_v49 = vpop.f32.mrb[148].mxu0  ;;  %v2915_v56 = vpop.f32.mrb[148].mxu1 }
 0x23e   : > { %v8531_v9 = vadd.f32 %v2915_v56, %v2345_v49  ;;  %v5840_v17 = vpop.f32.mrb[149].mxu0  ;;  %v6031_v12 = vpop.f32.mrb[149].mxu1  ;;  %6205 = vmatmul.mubr.msk.f32.gmra.mrb[254].mxu0 %vm3308_vm15, %v3242_v61  ;;  %v3251_v49 = vmax.f32 %v3188_v23, 0.0 }
 0x23f   : > { %6207 = vmatprep.mubr.msk.f32.mxu0 %vm6966_vm14, %v6965_v29 }
 0x240   : > { %v3189_v56 = vadd.f32 %v8498_v20, %v8531_v9 }
 0x241   : > { %v2350_v24 = vpop.f32.mrb[150].mxu0  ;;  %v2920_v60 = vpop.f32.mrb[150].mxu1 }
 0x242   : > { %v8538_v41 = vadd.f32 %v2920_v60, %v2350_v24  ;;  %v5843_v55 = vpop.f32.mrb[151].mxu0  ;;  %v6034_v31 = vpop.f32.mrb[151].mxu1  ;;  %6208 = vmatmul.mubr.msk.f32.gmra.mrb[0].mxu0 %vm3308_vm15, %v3243_v37  ;;  %v3252_v24 = vmax.f32 %v3189_v56, 0.0 }
 0x243   : > { %6210 = vmatprep.mubr.msk.f32.mxu0 %vm6966_vm14, %v6965_v29 }
 0x244   : > { %v3190_v60 = vadd.f32 %v8498_v20, %v8538_v41 }
 0x245   : > { %v2355_v15 = vpop.f32.mrb[152].mxu0  ;;  %v2925_v51 = vpop.f32.mrb[152].mxu1 }
 0x246   : > { %v8545_v27 = vadd.f32 %v2925_v51, %v2355_v15  ;;  %v5846_v44 = vpop.f32.mrb[153].mxu0  ;;  %v6037_v6 = vpop.f32.mrb[153].mxu1  ;;  %6211 = vmatmul.mubr.msk.f32.gmra.mrb[2].mxu0 %vm3308_vm15, %v3244_v22  ;;  %v3253_v15 = vmax.f32 %v3190_v60, 0.0 }
 0x247   : > { %6213 = vmatprep.mubr.msk.f32.mxu0 %vm6966_vm14, %v6965_v29 }
 0x248   : > { %v3191_v51 = vadd.f32 %v8498_v20, %v8545_v27 }
 0x249   : > { %v2360_v11 = vpop.f32.mrb[154].mxu0  ;;  %v2930_v30 = vpop.f32.mrb[154].mxu1 }
 0x24a   : > { %v8552_v8 = vadd.f32 %v2930_v30, %v2360_v11  ;;  %v5849_v47 = vpop.f32.mrb[155].mxu0  ;;  %v6040_v0 = vpop.f32.mrb[155].mxu1  ;;  %6214 = vmatmul.mubr.msk.f32.gmra.mrb[4].mxu0 %vm3308_vm15, %v3245_v2  ;;  %v3254_v11 = vmax.f32 %v3191_v51, 0.0 }
 0x24b   : > { %6216 = vmatprep.mubr.msk.f32.mxu0 %vm6966_vm14, %v6965_v29 }
 0x24c   : > { %v3192_v30 = vadd.f32 %v8498_v20, %v8552_v8 }
 0x24d   : > { %v2365_v7 = vpop.f32.mrb[156].mxu0  ;;  %v2935_v10 = vpop.f32.mrb[156].mxu1 }
 0x24e   : > { %v8559_v21 = vadd.f32 %v2935_v10, %v2365_v7  ;;  %v5852_v3 = vpop.f32.mrb[157].mxu0  ;;  %v6043_v1 = vpop.f32.mrb[157].mxu1  ;;  %6217 = vmatmul.mubr.msk.f32.gmra.mrb[6].mxu0 %vm3308_vm15, %v3246_v25  ;;  %v3255_v7 = vmax.f32 %v3192_v30, 0.0 }
 0x24f   : > { %6219 = vmatprep.mubr.msk.f32.mxu0 %vm6966_vm14, %v6965_v29 }
 0x250   : > { %v3193_v10 = vadd.f32 %v8498_v20, %v8559_v21 }
 0x251   : > { %v2370_v36 = vpop.f32.mrb[158].mxu0  ;;  %v2940_v42 = vpop.f32.mrb[158].mxu1 }
 0x252   : > { %v8566_v33 = vadd.f32 %v2940_v42, %v2370_v36  ;;  %v5855_v26 = vpop.f32.mrb[159].mxu0  ;;  %v6046_v52 = vpop.f32.mrb[159].mxu1  ;;  %6220 = vmatmul.mubr.msk.f32.gmra.mrb[8].mxu0 %vm3308_vm15, %v3247_v40  ;;  %v3256_v36 = vmax.f32 %v3193_v10, 0.0 }
 0x253   : > { %6222 = vmatprep.mubr.msk.f32.mxu0 %vm6966_vm14, %v6965_v29 }
 0x254   : > { %v3194_v42 = vadd.f32 %v8498_v20, %v8566_v33 }
 0x255   : > { %v2375_v48 = vpop.f32.mrb[160].mxu0  ;;  %v2945_v50 = vpop.f32.mrb[160].mxu1 }
 0x256   : > { %v8573_v58 = vadd.f32 %v2945_v50, %v2375_v48  ;;  %v5858_v39 = vpop.f32.mrb[161].mxu0  ;;  %v6049_v5 = vpop.f32.mrb[161].mxu1  ;;  %6223 = vmatmul.mubr.msk.f32.gmra.mrb[10].mxu0 %vm3308_vm15, %v3248_v35  ;;  %v3257_v48 = vmax.f32 %v3194_v42, 0.0 }
 0x257   : > { %6225 = vmatprep.mubr.msk.f32.mxu0 %vm6966_vm14, %v6965_v29 }
 0x258   : > { %v3195_v50 = vadd.f32 %v8498_v20, %v8573_v58 }
 0x259   : > { %v2380_v45 = vpop.f32.mrb[162].mxu0  ;;  %v2950_v32 = vpop.f32.mrb[162].mxu1 }
 0x25a   : > { %v8580_v57 = vadd.f32 %v2950_v32, %v2380_v45  ;;  %v5861_v18 = vpop.f32.mrb[163].mxu0  ;;  %v6052_v13 = vpop.f32.mrb[163].mxu1  ;;  %6226 = vmatmul.mubr.msk.f32.gmra.mrb[12].mxu0 %vm3308_vm15, %v3249_v34  ;;  %v3258_v45 = vmax.f32 %v3195_v50, 0.0 }
 0x25b   : > { %6228 = vmatprep.mubr.msk.f32.mxu0 %vm6966_vm14, %v6965_v29 }
 0x25c   : > { %v3196_v32 = vadd.f32 %v8498_v20, %v8580_v57 }
 0x25d   : > { %v2385_v28 = vpop.f32.mrb[164].mxu0  ;;  %v2955_v43 = vpop.f32.mrb[164].mxu1 }
 0x25e   : > { %v8587_v61 = vadd.f32 %v2955_v43, %v2385_v28  ;;  %v5864_v59 = vpop.f32.mrb[165].mxu0  ;;  %v6055_v14 = vpop.f32.mrb[165].mxu1  ;;  %6229 = vmatmul.mubr.msk.f32.gmra.mrb[14].mxu0 %vm3308_vm15, %v3250_v16  ;;  %v3259_v28 = vmax.f32 %v3196_v32, 0.0 }
 0x25f   : > { %6231 = vmatprep.mubr.msk.f32.mxu0 %vm6966_vm14, %v6965_v29 }
 0x260   : > { %v3197_v43 = vadd.f32 %v8498_v20, %v8587_v61 }
 0x261   : > { %v2390_v17 = vpop.f32.mrb[166].mxu0  ;;  %v2960_v12 = vpop.f32.mrb[166].mxu1 }
 0x262   : > { %v8594_v37 = vadd.f32 %v2960_v12, %v2390_v17  ;;  %v5867_v38 = vpop.f32.mrb[167].mxu0  ;;  %v6058_v62 = vpop.f32.mrb[167].mxu1  ;;  %6232 = vmatmul.mubr.msk.f32.gmra.mrb[16].mxu0 %vm3308_vm15, %v3251_v49  ;;  %v3260_v17 = vmax.f32 %v3197_v43, 0.0 }
 0x263   : > { %6234 = vmatprep.mubr.msk.f32.mxu0 %vm6966_vm14, %v6965_v29 }
 0x264   : > { %v3198_v12 = vadd.f32 %v8498_v20, %v8594_v37 }
 0x265   : > { %v2395_v55 = vpop.f32.mrb[168].mxu0  ;;  %v2965_v31 = vpop.f32.mrb[168].mxu1 }
 0x266   : > { %v8601_v22 = vadd.f32 %v2965_v31, %v2395_v55  ;;  %v5870_v9 = vpop.f32.mrb[169].mxu0  ;;  %v6061_v46 = vpop.f32.mrb[169].mxu1  ;;  %6235 = vmatmul.mubr.msk.f32.gmra.mrb[18].mxu0 %vm3308_vm15, %v3252_v24  ;;  %v3261_v55 = vmax.f32 %v3198_v12, 0.0 }
 0x267   : > { %6237 = vmatprep.mubr.msk.f32.mxu0 %vm6966_vm14, %v6965_v29 }
 0x268   : > { %v3199_v31 = vadd.f32 %v8498_v20, %v8601_v22 }
 0x269   : > { %v2400_v44 = vpop.f32.mrb[170].mxu0  ;;  %v2970_v6 = vpop.f32.mrb[170].mxu1 }
 0x26a   : > { %v8608_v2 = vadd.f32 %v2970_v6, %v2400_v44  ;;  %v5873_v41 = vpop.f32.mrb[171].mxu0  ;;  %v6064_v54 = vpop.f32.mrb[171].mxu1  ;;  %6238 = vmatmul.mubr.msk.f32.gmra.mrb[20].mxu0 %vm3308_vm15, %v3253_v15  ;;  %v3262_v44 = vmax.f32 %v3199_v31, 0.0 }
 0x26b   : > { %6240 = vmatprep.mubr.msk.f32.mxu0 %vm6966_vm14, %v6965_v29 }
 0x26c   : > { %v3200_v6 = vadd.f32 %v8498_v20, %v8608_v2 }
 0x26d   : > { %v2405_v47 = vpop.f32.mrb[172].mxu0  ;;  %v2975_v0 = vpop.f32.mrb[172].mxu1 }
 0x26e   : > { %v8615_v25 = vadd.f32 %v2975_v0, %v2405_v47  ;;  %v5876_v27 = vpop.f32.mrb[173].mxu0  ;;  %v6067_v19 = vpop.f32.mrb[173].mxu1  ;;  %6241 = vmatmul.mubr.msk.f32.gmra.mrb[22].mxu0 %vm3308_vm15, %v3254_v11  ;;  %v3263_v47 = vmax.f32 %v3200_v6, 0.0 }
 0x26f   : > { %6243 = vmatprep.mubr.msk.f32.mxu0 %vm6966_vm14, %v6965_v29 }
 0x270   : > { %v3201_v0 = vadd.f32 %v8498_v20, %v8615_v25 }
 0x271   : > { %v2410_v3 = vpop.f32.mrb[174].mxu0  ;;  %v2980_v1 = vpop.f32.mrb[174].mxu1 }
 0x272   : > { %v8622_v40 = vadd.f32 %v2980_v1, %v2410_v3  ;;  %v5879_v8 = vpop.f32.mrb[175].mxu0  ;;  %v6070_v63 = vpop.f32.mrb[175].mxu1  ;;  %6244 = vmatmul.mubr.msk.f32.gmra.mrb[24].mxu0 %vm3308_vm15, %v3255_v7  ;;  %v3264_v3 = vmax.f32 %v3201_v0, 0.0 }
 0x273   : > { %6246 = vmatprep.mubr.msk.f32.mxu0 %vm6966_vm14, %v6965_v29 }
 0x274   : > { %v3202_v1 = vadd.f32 %v8498_v20, %v8622_v40 }
 0x275   : > { %v2415_v26 = vpop.f32.mrb[176].mxu0  ;;  %v2985_v52 = vpop.f32.mrb[176].mxu1 }
 0x276   : > { %v8629_v35 = vadd.f32 %v2985_v52, %v2415_v26  ;;  %v5882_v21 = vpop.f32.mrb[177].mxu0  ;;  %v6073_v53 = vpop.f32.mrb[177].mxu1  ;;  %6247 = vmatmul.mubr.msk.f32.gmra.mrb[26].mxu0 %vm3308_vm15, %v3256_v36  ;;  %v3265_v26 = vmax.f32 %v3202_v1, 0.0 }
 0x277   : > { %6249 = vmatprep.mubr.msk.f32.mxu0 %vm6966_vm14, %v6965_v29 }
 0x278   : > { %v3203_v52 = vadd.f32 %v8498_v20, %v8629_v35 }
 0x279   : > { %v2420_v39 = vpop.f32.mrb[178].mxu0  ;;  %v2990_v5 = vpop.f32.mrb[178].mxu1 }
 0x27a   : > { %v8636_v34 = vadd.f32 %v2990_v5, %v2420_v39  ;;  %v5885_v33 = vpop.f32.mrb[179].mxu0  ;;  %v6076_v4 = vpop.f32.mrb[179].mxu1  ;;  %6250 = vmatmul.mubr.msk.f32.gmra.mrb[28].mxu0 %vm3308_vm15, %v3257_v48  ;;  %v3266_v39 = vmax.f32 %v3203_v52, 0.0 }
 0x27b   : > { %6252 = vmatprep.mubr.msk.f32.mxu0 %vm6966_vm14, %v6965_v29 }
 0x27c   : > { %v3204_v5 = vadd.f32 %v8498_v20, %v8636_v34 }
 0x27d   : > { %v2425_v18 = vpop.f32.mrb[180].mxu0  ;;  %v2995_v13 = vpop.f32.mrb[180].mxu1 }
 0x27e   : > { %v8643_v16 = vadd.f32 %v2995_v13, %v2425_v18  ;;  %v5888_v58 = vpop.f32.mrb[181].mxu0  ;;  %v6079_v23 = vpop.f32.mrb[181].mxu1  ;;  %6253 = vmatmul.mubr.msk.f32.gmra.mrb[30].mxu0 %vm3308_vm15, %v3258_v45  ;;  %v3267_v18 = vmax.f32 %v3204_v5, 0.0 }
 0x27f   : > { %6255 = vmatprep.mubr.msk.f32.mxu0 %vm6966_vm14, %v6965_v29 }
 0x280   : > { %v3205_v13 = vadd.f32 %v8498_v20, %v8643_v16 }
 0x281   : > { %v2430_v59 = vpop.f32.mrb[182].mxu0  ;;  %v3000_v14 = vpop.f32.mrb[182].mxu1 }
 0x282   : > { %v8650_v49 = vadd.f32 %v3000_v14, %v2430_v59  ;;  %v5891_v57 = vpop.f32.mrb[183].mxu0  ;;  %v6082_v56 = vpop.f32.mrb[183].mxu1  ;;  %6256 = vmatmul.mubr.msk.f32.gmra.mrb[32].mxu0 %vm3308_vm15, %v3259_v28  ;;  %v3268_v59 = vmax.f32 %v3205_v13, 0.0 }
 0x283   : > { %6258 = vmatprep.mubr.msk.f32.mxu0 %vm6966_vm14, %v6965_v29 }
 0x284   : > { %v3206_v14 = vadd.f32 %v8498_v20, %v8650_v49 }
 0x285   : > { %v2435_v38 = vpop.f32.mrb[184].mxu0  ;;  %v3005_v62 = vpop.f32.mrb[184].mxu1 }
 0x286   : > { %v8657_v24 = vadd.f32 %v3005_v62, %v2435_v38  ;;  %v5894_v61 = vpop.f32.mrb[185].mxu0  ;;  %v6085_v60 = vpop.f32.mrb[185].mxu1  ;;  %6259 = vmatmul.mubr.msk.f32.gmra.mrb[34].mxu0 %vm3308_vm15, %v3260_v17  ;;  %v3269_v38 = vmax.f32 %v3206_v14, 0.0 }
 0x287   : > { %6261 = vmatprep.mubr.msk.f32.mxu0 %vm6966_vm14, %v6965_v29 }
 0x288   : > { %v3207_v62 = vadd.f32 %v8498_v20, %v8657_v24 }
 0x289   : > { %v2440_v9 = vpop.f32.mrb[186].mxu0  ;;  %v3010_v46 = vpop.f32.mrb[186].mxu1 }
 0x28a   : > { %v8664_v15 = vadd.f32 %v3010_v46, %v2440_v9  ;;  %v5897_v37 = vpop.f32.mrb[187].mxu0  ;;  %v6088_v51 = vpop.f32.mrb[187].mxu1  ;;  %6262 = vmatmul.mubr.msk.f32.gmra.mrb[36].mxu0 %vm3308_vm15, %v3261_v55  ;;  %v3270_v9 = vmax.f32 %v3207_v62, 0.0 }
 0x28b   : > { %6264 = vmatprep.mubr.msk.f32.mxu0 %vm6966_vm14, %v6965_v29 }
 0x28c   : > { %v3208_v46 = vadd.f32 %v8498_v20, %v8664_v15 }
 0x28d   : > { %v2445_v41 = vpop.f32.mrb[188].mxu0  ;;  %v3015_v54 = vpop.f32.mrb[188].mxu1 }
 0x28e   : > { %v8671_v11 = vadd.f32 %v3015_v54, %v2445_v41  ;;  %v5900_v22 = vpop.f32.mrb[189].mxu0  ;;  %v6091_v30 = vpop.f32.mrb[189].mxu1  ;;  %6265 = vmatmul.mubr.msk.f32.gmra.mrb[38].mxu0 %vm3308_vm15, %v3262_v44  ;;  %v3271_v41 = vmax.f32 %v3208_v46, 0.0 }
 0x28f   : > { %6267 = vmatprep.mubr.msk.f32.mxu0 %vm6966_vm14, %v6965_v29 }
 0x290   : > { %v3209_v54 = vadd.f32 %v8498_v20, %v8671_v11 }
 0x291   : > { %v2450_v27 = vpop.f32.mrb[190].mxu0  ;;  %v3020_v19 = vpop.f32.mrb[190].mxu1 }
 0x292   : > { %v8678_v7 = vadd.f32 %v3020_v19, %v2450_v27  ;;  %v5903_v2 = vpop.f32.mrb[191].mxu0  ;;  %v6094_v10 = vpop.f32.mrb[191].mxu1  ;;  %6268 = vmatmul.mubr.msk.f32.gmra.mrb[40].mxu0 %vm3308_vm15, %v3263_v47  ;;  %v3272_v27 = vmax.f32 %v3209_v54, 0.0 }
 0x293   : > { %6270 = vmatprep.mubr.msk.f32.mxu0 %vm6966_vm14, %v6965_v29 }
 0x294   : > { %v3210_v19 = vadd.f32 %v8498_v20, %v8678_v7 }
 0x295   : > { %v2455_v8 = vpop.f32.mrb[192].mxu0  ;;  %v3025_v63 = vpop.f32.mrb[192].mxu1 }
 0x296   : > { %v8685_v36 = vadd.f32 %v3025_v63, %v2455_v8  ;;  %v5906_v25 = vpop.f32.mrb[193].mxu0  ;;  %v6097_v42 = vpop.f32.mrb[193].mxu1  ;;  %6271 = vmatmul.mubr.msk.f32.gmra.mrb[42].mxu0 %vm3308_vm15, %v3264_v3  ;;  %v3273_v8 = vmax.f32 %v3210_v19, 0.0 }
 0x297   : > { %6273 = vmatprep.mubr.msk.f32.mxu0 %vm6966_vm14, %v6965_v29 }
 0x298   : > { %v3211_v63 = vadd.f32 %v8498_v20, %v8685_v36 }
 0x299   : > { %v2460_v21 = vpop.f32.mrb[194].mxu0  ;;  %v3030_v53 = vpop.f32.mrb[194].mxu1 }
 0x29a   : > { %v8692_v48 = vadd.f32 %v3030_v53, %v2460_v21  ;;  %v5909_v40 = vpop.f32.mrb[195].mxu0  ;;  %v6100_v50 = vpop.f32.mrb[195].mxu1  ;;  %6274 = vmatmul.mubr.msk.f32.gmra.mrb[44].mxu0 %vm3308_vm15, %v3265_v26  ;;  %v3274_v21 = vmax.f32 %v3211_v63, 0.0 }
 0x29b   : > { %6276 = vmatprep.mubr.msk.f32.mxu0 %vm6966_vm14, %v6965_v29 }
 0x29c   : > { %v3212_v53 = vadd.f32 %v8498_v20, %v8692_v48 }
 0x29d   : > { %v2465_v33 = vpop.f32.mrb[196].mxu0  ;;  %v3035_v4 = vpop.f32.mrb[196].mxu1 }
 0x29e   : > { %v8699_v45 = vadd.f32 %v3035_v4, %v2465_v33  ;;  %v5912_v35 = vpop.f32.mrb[197].mxu0  ;;  %v6103_v32 = vpop.f32.mrb[197].mxu1  ;;  %6277 = vmatmul.mubr.msk.f32.gmra.mrb[46].mxu0 %vm3308_vm15, %v3266_v39  ;;  %v3275_v33 = vmax.f32 %v3212_v53, 0.0 }
 0x29f   : > { %6279 = vmatprep.mubr.msk.f32.mxu0 %vm6966_vm14, %v6965_v29 }
 0x2a0   : > { %v3213_v4 = vadd.f32 %v8498_v20, %v8699_v45 }
 0x2a1   : > { %v2470_v58 = vpop.f32.mrb[198].mxu0  ;;  %v3040_v23 = vpop.f32.mrb[198].mxu1 }
 0x2a2   : > { %v8706_v28 = vadd.f32 %v3040_v23, %v2470_v58  ;;  %v5915_v34 = vpop.f32.mrb[199].mxu0  ;;  %v6106_v43 = vpop.f32.mrb[199].mxu1  ;;  %6280 = vmatmul.mubr.msk.f32.gmra.mrb[48].mxu0 %vm3308_vm15, %v3267_v18  ;;  %v3276_v58 = vmax.f32 %v3213_v4, 0.0 }
 0x2a3   : > { %6282 = vmatprep.mubr.msk.f32.mxu0 %vm6966_vm14, %v6965_v29 }
 0x2a4   : > { %v3214_v23 = vadd.f32 %v8498_v20, %v8706_v28 }
 0x2a5   : > { %v2475_v57 = vpop.f32.mrb[200].mxu0  ;;  %v3045_v56 = vpop.f32.mrb[200].mxu1 }
 0x2a6   : > { %v8713_v17 = vadd.f32 %v3045_v56, %v2475_v57  ;;  %v5918_v16 = vpop.f32.mrb[201].mxu0  ;;  %v6109_v12 = vpop.f32.mrb[201].mxu1  ;;  %6283 = vmatmul.mubr.msk.f32.gmra.mrb[50].mxu0 %vm3308_vm15, %v3268_v59  ;;  %v3277_v57 = vmax.f32 %v3214_v23, 0.0 }
 0x2a7   : > { %6285 = vmatprep.mubr.msk.f32.mxu0 %vm6966_vm14, %v6965_v29 }
 0x2a8   : > { %v3215_v56 = vadd.f32 %v8498_v20, %v8713_v17 }
 0x2a9   : > { %v2480_v61 = vpop.f32.mrb[202].mxu0  ;;  %v3050_v60 = vpop.f32.mrb[202].mxu1 }
 0x2aa   : > { %v8720_v55 = vadd.f32 %v3050_v60, %v2480_v61  ;;  %v5921_v49 = vpop.f32.mrb[203].mxu0  ;;  %v6112_v31 = vpop.f32.mrb[203].mxu1  ;;  %6286 = vmatmul.mubr.msk.f32.gmra.mrb[52].mxu0 %vm3308_vm15, %v3269_v38  ;;  %v3278_v61 = vmax.f32 %v3215_v56, 0.0 }
 0x2ab   : > { %6288 = vmatprep.mubr.msk.f32.mxu0 %vm6966_vm14, %v6965_v29 }
 0x2ac   : > { %v3216_v60 = vadd.f32 %v8498_v20, %v8720_v55 }
 0x2ad   : > { %v2485_v37 = vpop.f32.mrb[204].mxu0  ;;  %v3055_v51 = vpop.f32.mrb[204].mxu1 }
 0x2ae   : > { %v8727_v44 = vadd.f32 %v3055_v51, %v2485_v37  ;;  %v5924_v24 = vpop.f32.mrb[205].mxu0  ;;  %v6115_v6 = vpop.f32.mrb[205].mxu1  ;;  %6289 = vmatmul.mubr.msk.f32.gmra.mrb[54].mxu0 %vm3308_vm15, %v3270_v9  ;;  %v3279_v37 = vmax.f32 %v3216_v60, 0.0 }
 0x2af   : > { %6291 = vmatprep.mubr.msk.f32.mxu0 %vm6966_vm14, %v6965_v29 }
 0x2b0   : > { %v3217_v51 = vadd.f32 %v8498_v20, %v8727_v44 }
 0x2b1   : > { %v2490_v22 = vpop.f32.mrb[206].mxu0  ;;  %v3060_v30 = vpop.f32.mrb[206].mxu1 }
 0x2b2   : > { %v8734_v47 = vadd.f32 %v3060_v30, %v2490_v22  ;;  %v5927_v15 = vpop.f32.mrb[207].mxu0  ;;  %v6118_v0 = vpop.f32.mrb[207].mxu1  ;;  %6292 = vmatmul.mubr.msk.f32.gmra.mrb[56].mxu0 %vm3308_vm15, %v3271_v41  ;;  %v3280_v22 = vmax.f32 %v3217_v51, 0.0 }
 0x2b3   : > { %6294 = vmatprep.mubr.msk.f32.mxu0 %vm6966_vm14, %v6965_v29 }
 0x2b4   : > { %v3218_v30 = vadd.f32 %v8498_v20, %v8734_v47 }
 0x2b5   : > { %v2495_v2 = vpop.f32.mrb[208].mxu0  ;;  %v3065_v10 = vpop.f32.mrb[208].mxu1 }
 0x2b6   : > { %v8741_v3 = vadd.f32 %v3065_v10, %v2495_v2  ;;  %v5930_v11 = vpop.f32.mrb[209].mxu0  ;;  %v6121_v1 = vpop.f32.mrb[209].mxu1  ;;  %6295 = vmatmul.mubr.msk.f32.gmra.mrb[58].mxu0 %vm3308_vm15, %v3272_v27  ;;  %v3281_v2 = vmax.f32 %v3218_v30, 0.0 }
 0x2b7   : > { %6297 = vmatprep.mubr.msk.f32.mxu0 %vm6966_vm14, %v6965_v29 }
 0x2b8   : > { %v3219_v10 = vadd.f32 %v8498_v20, %v8741_v3 }
 0x2b9   : > { %v2500_v25 = vpop.f32.mrb[210].mxu0  ;;  %v3070_v42 = vpop.f32.mrb[210].mxu1 }
 0x2ba   : > { %v8748_v26 = vadd.f32 %v3070_v42, %v2500_v25  ;;  %v5933_v7 = vpop.f32.mrb[211].mxu0  ;;  %v6124_v52 = vpop.f32.mrb[211].mxu1  ;;  %6298 = vmatmul.mubr.msk.f32.gmra.mrb[60].mxu0 %vm3308_vm15, %v3273_v8  ;;  %v3282_v25 = vmax.f32 %v3219_v10, 0.0 }
 0x2bb   : > { %6300 = vmatprep.mubr.msk.f32.mxu0 %vm6966_vm14, %v6965_v29 }
 0x2bc   : > { %v3220_v42 = vadd.f32 %v8498_v20, %v8748_v26 }
 0x2bd   : > { %v2505_v40 = vpop.f32.mrb[212].mxu0  ;;  %v3075_v50 = vpop.f32.mrb[212].mxu1 }
 0x2be   : > { %v8755_v39 = vadd.f32 %v3075_v50, %v2505_v40  ;;  %v5936_v36 = vpop.f32.mrb[213].mxu0  ;;  %v6127_v5 = vpop.f32.mrb[213].mxu1  ;;  %6301 = vmatmul.mubr.msk.f32.gmra.mrb[62].mxu0 %vm3308_vm15, %v3274_v21  ;;  %v3283_v40 = vmax.f32 %v3220_v42, 0.0 }
 0x2bf   : > { %6303 = vmatprep.mubr.msk.f32.mxu0 %vm6966_vm14, %v6965_v29 }
 0x2c0   : > { %v3221_v50 = vadd.f32 %v8498_v20, %v8755_v39 }
 0x2c1   : > { %v2510_v35 = vpop.f32.mrb[214].mxu0  ;;  %v3080_v32 = vpop.f32.mrb[214].mxu1 }
 0x2c2   : > { %v8762_v18 = vadd.f32 %v3080_v32, %v2510_v35  ;;  %v5939_v48 = vpop.f32.mrb[215].mxu0  ;;  %v6130_v13 = vpop.f32.mrb[215].mxu1  ;;  %6304 = vmatmul.mubr.msk.f32.gmra.mrb[64].mxu0 %vm3308_vm15, %v3275_v33  ;;  %v3284_v35 = vmax.f32 %v3221_v50, 0.0 }
 0x2c3   : > { %6306 = vmatprep.mubr.msk.f32.mxu0 %vm6966_vm14, %v6965_v29 }
 0x2c4   : > { %v3222_v32 = vadd.f32 %v8498_v20, %v8762_v18 }
 0x2c5   : > { %v2515_v34 = vpop.f32.mrb[216].mxu0  ;;  %v3085_v43 = vpop.f32.mrb[216].mxu1 }
 0x2c6   : > { %v8769_v59 = vadd.f32 %v3085_v43, %v2515_v34  ;;  %v5942_v45 = vpop.f32.mrb[217].mxu0  ;;  %v6133_v14 = vpop.f32.mrb[217].mxu1  ;;  %6307 = vmatmul.mubr.msk.f32.gmra.mrb[66].mxu0 %vm3308_vm15, %v3276_v58  ;;  %v3285_v34 = vmax.f32 %v3222_v32, 0.0 }
 0x2c7   : > { %6309 = vmatprep.mubr.msk.f32.mxu0 %vm6966_vm14, %v6965_v29 }
 0x2c8   : > { %v3223_v43 = vadd.f32 %v8498_v20, %v8769_v59 }
 0x2c9   : > { %v2520_v16 = vpop.f32.mrb[218].mxu0  ;;  %v3090_v12 = vpop.f32.mrb[218].mxu1 }
 0x2ca   : > { %v8776_v38 = vadd.f32 %v3090_v12, %v2520_v16  ;;  %v5945_v28 = vpop.f32.mrb[219].mxu0  ;;  %v6136_v62 = vpop.f32.mrb[219].mxu1  ;;  %6310 = vmatmul.mubr.msk.f32.gmra.mrb[68].mxu0 %vm3308_vm15, %v3277_v57  ;;  %v3286_v16 = vmax.f32 %v3223_v43, 0.0 }
 0x2cb   : > { %6312 = vmatprep.mubr.msk.f32.mxu0 %vm6966_vm14, %v6965_v29 }
 0x2cc   : > { %v3224_v12 = vadd.f32 %v8498_v20, %v8776_v38 }
 0x2cd   : > { %v2525_v49 = vpop.f32.mrb[220].mxu0  ;;  %v3095_v31 = vpop.f32.mrb[220].mxu1 }
 0x2ce   : > { %v8783_v9 = vadd.f32 %v3095_v31, %v2525_v49  ;;  %v5948_v17 = vpop.f32.mrb[221].mxu0  ;;  %v6139_v46 = vpop.f32.mrb[221].mxu1  ;;  %6313 = vmatmul.mubr.msk.f32.gmra.mrb[70].mxu0 %vm3308_vm15, %v3278_v61  ;;  %v3287_v49 = vmax.f32 %v3224_v12, 0.0 }
 0x2cf   : > { %6315 = vmatprep.mubr.msk.f32.mxu0 %vm6966_vm14, %v6965_v29 }
 0x2d0   : > { %v3225_v31 = vadd.f32 %v8498_v20, %v8783_v9 }
 0x2d1   : > { %v2530_v24 = vpop.f32.mrb[222].mxu0  ;;  %v3100_v6 = vpop.f32.mrb[222].mxu1 }
 0x2d2   : > { %v8790_v41 = vadd.f32 %v3100_v6, %v2530_v24  ;;  %v5951_v55 = vpop.f32.mrb[223].mxu0  ;;  %v6142_v54 = vpop.f32.mrb[223].mxu1  ;;  %6316 = vmatmul.mubr.msk.f32.gmra.mrb[72].mxu0 %vm3308_vm15, %v3279_v37  ;;  %v3288_v24 = vmax.f32 %v3225_v31, 0.0 }
 0x2d3   : > { %6318 = vmatprep.mubr.msk.f32.mxu0 %vm6966_vm14, %v6965_v29 }
 0x2d4   : > { %v3226_v6 = vadd.f32 %v8498_v20, %v8790_v41 }
 0x2d5   : > { %v2535_v15 = vpop.f32.mrb[224].mxu0  ;;  %v3105_v0 = vpop.f32.mrb[224].mxu1 }
 0x2d6   : > { %v8797_v27 = vadd.f32 %v3105_v0, %v2535_v15  ;;  %v5954_v44 = vpop.f32.mrb[225].mxu0  ;;  %v6145_v19 = vpop.f32.mrb[225].mxu1  ;;  %6319 = vmatmul.mubr.msk.f32.gmra.mrb[74].mxu0 %vm3308_vm15, %v3280_v22  ;;  %v3289_v15 = vmax.f32 %v3226_v6, 0.0 }
 0x2d7   : > { %6321 = vmatprep.mubr.msk.f32.mxu0 %vm6966_vm14, %v6965_v29 }
 0x2d8   : > { %v3227_v0 = vadd.f32 %v8498_v20, %v8797_v27 }
 0x2d9   : > { %v2540_v11 = vpop.f32.mrb[226].mxu0  ;;  %v3110_v1 = vpop.f32.mrb[226].mxu1 }
 0x2da   : > { %v8804_v8 = vadd.f32 %v3110_v1, %v2540_v11  ;;  %v5957_v47 = vpop.f32.mrb[227].mxu0  ;;  %v6148_v63 = vpop.f32.mrb[227].mxu1  ;;  %6322 = vmatmul.mubr.msk.f32.gmra.mrb[76].mxu0 %vm3308_vm15, %v3281_v2  ;;  %v3290_v11 = vmax.f32 %v3227_v0, 0.0 }
 0x2db   : > { %6324 = vmatprep.mubr.msk.f32.mxu0 %vm6966_vm14, %v6965_v29 }
 0x2dc   : > { %v3228_v1 = vadd.f32 %v8498_v20, %v8804_v8 }
 0x2dd   : > { %v2545_v7 = vpop.f32.mrb[228].mxu0  ;;  %v3115_v52 = vpop.f32.mrb[228].mxu1 }
 0x2de   : > { %v8811_v21 = vadd.f32 %v3115_v52, %v2545_v7  ;;  %v5960_v3 = vpop.f32.mrb[229].mxu0  ;;  %v6151_v53 = vpop.f32.mrb[229].mxu1  ;;  %6325 = vmatmul.mubr.msk.f32.gmra.mrb[78].mxu0 %vm3308_vm15, %v3282_v25  ;;  %v3291_v7 = vmax.f32 %v3228_v1, 0.0 }
 0x2df   : > { %6327 = vmatprep.mubr.msk.f32.mxu0 %vm6966_vm14, %v6965_v29 }
 0x2e0   : > { %v3229_v52 = vadd.f32 %v8498_v20, %v8811_v21 }
 0x2e1   : > { %v2550_v36 = vpop.f32.mrb[230].mxu0  ;;  %v3120_v5 = vpop.f32.mrb[230].mxu1 }
 0x2e2   : > { %v8818_v33 = vadd.f32 %v3120_v5, %v2550_v36  ;;  %v5963_v26 = vpop.f32.mrb[231].mxu0  ;;  %v6154_v4 = vpop.f32.mrb[231].mxu1  ;;  %6328 = vmatmul.mubr.msk.f32.gmra.mrb[80].mxu0 %vm3308_vm15, %v3283_v40  ;;  %v3292_v36 = vmax.f32 %v3229_v52, 0.0 }
 0x2e3   : > { %6330 = vmatprep.mubr.msk.f32.mxu0 %vm6966_vm14, %v6965_v29 }
 0x2e4   : > { %v3230_v5 = vadd.f32 %v8498_v20, %v8818_v33 }
 0x2e5   : > { %v2555_v48 = vpop.f32.mrb[232].mxu0  ;;  %v3125_v13 = vpop.f32.mrb[232].mxu1 }
 0x2e6   : > { %v8825_v58 = vadd.f32 %v3125_v13, %v2555_v48  ;;  %v5966_v39 = vpop.f32.mrb[233].mxu0  ;;  %v6157_v23 = vpop.f32.mrb[233].mxu1  ;;  %6331 = vmatmul.mubr.msk.f32.gmra.mrb[82].mxu0 %vm3308_vm15, %v3284_v35  ;;  %v3293_v48 = vmax.f32 %v3230_v5, 0.0 }
 0x2e7   : > { %6333 = vmatprep.mubr.msk.f32.mxu0 %vm6966_vm14, %v6965_v29 }
 0x2e8   : > { %v3231_v13 = vadd.f32 %v8498_v20, %v8825_v58 }
 0x2e9   : > { %v2560_v45 = vpop.f32.mrb[234].mxu0  ;;  %v3130_v14 = vpop.f32.mrb[234].mxu1 }
 0x2ea   : > { %v8832_v57 = vadd.f32 %v3130_v14, %v2560_v45  ;;  %v5969_v18 = vpop.f32.mrb[235].mxu0  ;;  %v6160_v56 = vpop.f32.mrb[235].mxu1  ;;  %6334 = vmatmul.mubr.msk.f32.gmra.mrb[84].mxu0 %vm3308_vm15, %v3285_v34  ;;  %v8894_v45 = vld [vmem:[%s9400_s2 + $0x79] ss:$0 sm:$0xff]  ;;  %v3294_v14 = vmax.f32 %v3231_v13, 0.0 }
 0x2eb   : > { %6336 = vmatprep.mubr.msk.f32.mxu0 %vm6966_vm14, %v6965_v29 }
 0x2ec   : > { %v3232_v58 = vadd.f32 %v8498_v20, %v8832_v57 }
 0x2ed   : > { %v2565_v28 = vpop.f32.mrb[236].mxu0  ;;  %v3135_v62 = vpop.f32.mrb[236].mxu1 }
 0x2ee   : > { %v8839_v61 = vadd.f32 %v3135_v62, %v2565_v28  ;;  %v5972_v59 = vpop.f32.mrb[237].mxu0  ;;  %v6163_v60 = vpop.f32.mrb[237].mxu1  ;;  %6337 = vmatmul.mubr.msk.f32.gmra.mrb[86].mxu0 %vm3308_vm15, %v3286_v16  ;;  %v3295_v12 = vmax.f32 %v3232_v58, 0.0 }
 0x2ef   : > { %6339 = vmatprep.mubr.msk.f32.mxu0 %vm6966_vm14, %v6965_v29 }
 0x2f0   : > { %v3233_v28 = vadd.f32 %v8498_v20, %v8839_v61  ;;  %v6952_v20 = vld [vmem:[%s9400_s2 + $0x78] ss:$0 sm:$0xff] }
 0x2f1   : > { %v2570_v17 = vpop.f32.mrb[238].mxu0  ;;  %v3140_v46 = vpop.f32.mrb[238].mxu1 }
 0x2f2   : > { %v8846_v37 = vadd.f32 %v3140_v46, %v2570_v17  ;;  %v5975_v38 = vpop.f32.mrb[239].mxu0  ;;  %v6166_v51 = vpop.f32.mrb[239].mxu1  ;;  %6340 = vmatmul.mubr.msk.f32.gmra.mrb[88].mxu0 %vm3308_vm15, %v3287_v49  ;;  %v3296_v57 = vmax.f32 %v3233_v28, 0.0 }
 0x2f3   : > { %6342 = vmatprep.mubr.msk.f32.mxu0 %vm6966_vm14, %v6965_v29 }
 0x2f4   : > { %v3234_v61 = vadd.f32 %v6952_v20, %v8846_v37 }
 0x2f5   : > { %v2575_v55 = vpop.f32.mrb[240].mxu0  ;;  %v3145_v54 = vpop.f32.mrb[240].mxu1 }
 0x2f6   : > { %v8853_v22 = vadd.f32 %v3145_v54, %v2575_v55  ;;  %v5978_v9 = vpop.f32.mrb[241].mxu0  ;;  %v6169_v30 = vpop.f32.mrb[241].mxu1  ;;  %6343 = vmatmul.mubr.msk.f32.gmra.mrb[90].mxu0 %vm3308_vm15, %v3288_v24  ;;  %v3297_v51 = vmax.f32 %v3234_v61, 0.0 }
 0x2f7   : > { %6345 = vmatprep.mubr.msk.f32.mxu0 %vm6966_vm14, %v6965_v29 }
 0x2f8   : > { %v3235_v24 = vadd.f32 %v6952_v20, %v8853_v22 }
 0x2f9   : > { %v2580_v44 = vpop.f32.mrb[242].mxu0  ;;  %v3150_v19 = vpop.f32.mrb[242].mxu1 }
 0x2fa   : > { %v8860_v2 = vadd.f32 %v3150_v19, %v2580_v44  ;;  %v5981_v41 = vpop.f32.mrb[243].mxu0  ;;  %v6172_v10 = vpop.f32.mrb[243].mxu1  ;;  %6346 = vmatmul.mubr.msk.f32.gmra.mrb[92].mxu0 %vm3308_vm15, %v3289_v15  ;;  %v3298_v9 = vmax.f32 %v3235_v24, 0.0 }
 0x2fb   : > { %6348 = vmatprep.mubr.msk.f32.mxu0 %vm6966_vm14, %v6965_v29 }
 0x2fc   : > { %v3236_v30 = vadd.f32 %v6952_v20, %v8860_v2 }
 0x2fd   : > { %v2585_v47 = vpop.f32.mrb[244].mxu0  ;;  %v3155_v63 = vpop.f32.mrb[244].mxu1 }
 0x2fe   : > { %v8867_v25 = vadd.f32 %v3155_v63, %v2585_v47  ;;  %v5984_v27 = vpop.f32.mrb[245].mxu0  ;;  %v6175_v42 = vpop.f32.mrb[245].mxu1  ;;  %6349 = vmatmul.mubr.msk.f32.gmra.mrb[94].mxu0 %vm3308_vm15, %v3290_v11  ;;  %v3299_v19 = vmax.f32 %v3236_v30, 0.0 }
 0x2ff   : > { %6351 = vmatprep.mubr.msk.f32.mxu0 %vm6966_vm14, %v6965_v29 }
 0x300   : > { %v3237_v41 = vadd.f32 %v6952_v20, %v8867_v25 }
 0x301   : > { %v2590_v3 = vpop.f32.mrb[246].mxu0  ;;  %v3160_v53 = vpop.f32.mrb[246].mxu1 }
 0x302   : > { %v8874_v40 = vadd.f32 %v3160_v53, %v2590_v3  ;;  %v5987_v8 = vpop.f32.mrb[247].mxu0  ;;  %v6178_v50 = vpop.f32.mrb[247].mxu1  ;;  %6352 = vmatmul.mubr.msk.f32.gmra.mrb[96].mxu0 %vm3308_vm15, %v3291_v7  ;;  %v3300_v47 = vmax.f32 %v3237_v41, 0.0 }
 0x303   : > { %6354 = vmatprep.mubr.msk.f32.mxu0 %vm6966_vm14, %v6965_v29 }
 0x304   : > { %v3238_v63 = vadd.f32 %v6952_v20, %v8874_v40 }
 0x305   : > { %v2595_v26 = vpop.f32.mrb[248].mxu0  ;;  %v3165_v4 = vpop.f32.mrb[248].mxu1 }
 0x306   : > { %v8881_v35 = vadd.f32 %v3165_v4, %v2595_v26  ;;  %v5990_v21 = vpop.f32.mrb[249].mxu0  ;;  %v6181_v32 = vpop.f32.mrb[249].mxu1  ;;  %6355 = vmatmul.mubr.msk.f32.gmra.mrb[98].mxu0 %vm3308_vm15, %v3292_v36  ;;  %v3301_v52 = vmax.f32 %v3238_v63, 0.0 }
 0x307   : > { %6357 = vmatprep.mubr.msk.f32.mxu0 %vm6966_vm14, %v6965_v29 }
 0x308   : > { %v3239_v3 = vadd.f32 %v6952_v20, %v8881_v35 }
 0x309   : > { %v2600_v39 = vpop.f32.mrb[250].mxu0  ;;  %v3170_v23 = vpop.f32.mrb[250].mxu1 }
 0x30a   : > { %v8888_v34 = vadd.f32 %v3170_v23, %v2600_v39  ;;  %v5993_v33 = vpop.f32.mrb[251].mxu0  ;;  %v6184_v43 = vpop.f32.mrb[251].mxu1  ;;  %6358 = vmatmul.mubr.msk.f32.gmra.mrb[100].mxu0 %vm3308_vm15, %v3293_v48  ;;  %v3302_v36 = vmax.f32 %v3239_v3, 0.0 }
 0x30b   : > { %6360 = vmatprep.mubr.msk.f32.mxu0 %vm6966_vm14, %v6965_v29 }
 0x30c   : > { %v3240_v5 = vadd.f32 %v6952_v20, %v8888_v34 }
 0x30d   : > { %v3564_v18 = vpop.f32.mrb[252].mxu0 }
 0x30e   : > { %v3565_v56 = vadd.f32 %v8894_v45, %v3564_v18  ;;  %v6203_v16 = vpop.f32.mrb[253].mxu0  ;;  %6361 = vmatmul.mubr.msk.f32.gmra.mrb[102].mxu0 %vm3308_vm15, %v3294_v14  ;;  %v3303_v32 = vmax.f32 %v3240_v5, 0.0 }
 0x30f   : > { %6363 = vmatprep.mubr.msk.f32.mxu0 %vm6966_vm14, %v6965_v29 }
 0x310   : > { %v3878_v62 = vmax.f32 %v3565_v56, 0.0 }
 0x311   : > { %v3569_v59 = vpop.f32.mrb[254].mxu0 }
 0x312   : > { %v3570_v60 = vadd.f32 %v8894_v45, %v3569_v59  ;;  %v6206_v49 = vpop.f32.mrb[255].mxu0  ;;  %6364 = vmatmul.mubr.msk.f32.gmra.mrb[104].mxu0 %vm3308_vm15, %v3295_v12  ;;  %6399 = vmatmul.mubr.msk.f32.vlgmr.msra.gmra.mrb[252].mxu1 %vm3945_vm0, %v3878_v62 }
 0x313   : > { %6366 = vmatprep.mubr.msk.f32.mxu0 %vm6966_vm14, %v6965_v29  ;;  %6401 = vmatprep.mubr.msk.f32.mxu1 %vm6966_vm14, %v6965_v29 }
 0x314   : > { %v3879_v31 = vmax.f32 %v3570_v60, 0.0 }
 0x315   : > { %v3574_v17 = vpop.f32.mrb[0].mxu0 }
 0x316   : > { %v3575_v46 = vadd.f32 %v8894_v45, %v3574_v17  ;;  %v6209_v38 = vpop.f32.mrb[1].mxu0  ;;  %6367 = vmatmul.mubr.msk.f32.gmra.mrb[106].mxu0 %vm3308_vm15, %v3296_v57  ;;  %6402 = vmatmul.mubr.msk.f32.gmra.mrb[254].mxu1 %vm3945_vm0, %v3879_v31 }
 0x317   : > { %6369 = vmatprep.mubr.msk.f32.mxu0 %vm6966_vm14, %v6965_v29  ;;  %6404 = vmatprep.mubr.msk.f32.mxu1 %vm6966_vm14, %v6965_v29 }
 0x318   : > { %v3880_v6 = vmax.f32 %v3575_v46, 0.0 }
 0x319   : > { %v3579_v37 = vpop.f32.mrb[2].mxu0 }
 0x31a   : > { %v3580_v55 = vadd.f32 %v8894_v45, %v3579_v37  ;;  %v6212_v54 = vpop.f32.mrb[3].mxu0  ;;  %6370 = vmatmul.mubr.msk.f32.gmra.mrb[108].mxu0 %vm3308_vm15, %v3297_v51  ;;  %6405 = vmatmul.mubr.msk.f32.gmra.mrb[0].mxu1 %vm3945_vm0, %v3880_v6 }
 0x31b   : > { %6372 = vmatprep.mubr.msk.f32.mxu0 %vm6966_vm14, %v6965_v29  ;;  %6407 = vmatprep.mubr.msk.f32.mxu1 %vm6966_vm14, %v6965_v29 }
 0x31c   : > { %v3881_v15 = vmax.f32 %v3580_v55, 0.0 }
 0x31d   : > { %v3584_v22 = vpop.f32.mrb[4].mxu0 }
 0x31e   : > { %v3585_v0 = vadd.f32 %v8894_v45, %v3584_v22  ;;  %v6215_v44 = vpop.f32.mrb[5].mxu0  ;;  %6373 = vmatmul.mubr.msk.f32.gmra.mrb[110].mxu0 %vm3308_vm15, %v3298_v9  ;;  %6408 = vmatmul.mubr.msk.f32.gmra.mrb[2].mxu1 %vm3945_vm0, %v3881_v15 }
 0x31f   : > { %6375 = vmatprep.mubr.msk.f32.mxu0 %vm6966_vm14, %v6965_v29  ;;  %6410 = vmatprep.mubr.msk.f32.mxu1 %vm6966_vm14, %v6965_v29 }
 0x320   : > { %v3882_v10 = vmax.f32 %v3585_v0, 0.0 }
 0x321   : > { %v3589_v2 = vpop.f32.mrb[6].mxu0 }
 0x322   : > { %v3590_v11 = vadd.f32 %v8894_v45, %v3589_v2  ;;  %v6218_v1 = vpop.f32.mrb[7].mxu0  ;;  %6376 = vmatmul.mubr.msk.f32.gmra.mrb[112].mxu0 %vm3308_vm15, %v3299_v19  ;;  %6411 = vmatmul.mubr.msk.f32.gmra.mrb[4].mxu1 %vm3945_vm0, %v3882_v10 }
 0x323   : > { %6378 = vmatprep.mubr.msk.f32.mxu0 %vm6966_vm14, %v6965_v29  ;;  %6413 = vmatprep.mubr.msk.f32.mxu1 %vm6966_vm14, %v6965_v29 }
 0x324   : > { %v3883_v27 = vmax.f32 %v3590_v11, 0.0 }
 0x325   : > { %v3594_v25 = vpop.f32.mrb[8].mxu0 }
 0x326   : > { %v3595_v42 = vadd.f32 %v8894_v45, %v3594_v25  ;;  %v6221_v7 = vpop.f32.mrb[9].mxu0  ;;  %6379 = vmatmul.mubr.msk.f32.gmra.mrb[114].mxu0 %vm3308_vm15, %v3300_v47  ;;  %6414 = vmatmul.mubr.msk.f32.gmra.mrb[6].mxu1 %vm3945_vm0, %v3883_v27 }
 0x327   : > { %6381 = vmatprep.mubr.msk.f32.mxu0 %vm6966_vm14, %v6965_v29  ;;  %6416 = vmatprep.mubr.msk.f32.mxu1 %vm6966_vm14, %v6965_v29 }
 0x328   : > { %v3884_v53 = vmax.f32 %v3595_v42, 0.0 }
 0x329   : > { %v3599_v40 = vpop.f32.mrb[10].mxu0 }
 0x32a   : > { %v3600_v8 = vadd.f32 %v8894_v45, %v3599_v40  ;;  %v6224_v50 = vpop.f32.mrb[11].mxu0  ;;  %6382 = vmatmul.mubr.msk.f32.gmra.mrb[116].mxu0 %vm3308_vm15, %v3301_v52  ;;  %6417 = vmatmul.mubr.msk.f32.gmra.mrb[8].mxu1 %vm3945_vm0, %v3884_v53 }
 0x32b   : > { %6384 = vmatprep.mubr.msk.f32.mxu0 %vm6966_vm14, %v6965_v29  ;;  %6419 = vmatprep.mubr.msk.f32.mxu1 %vm6966_vm14, %v6965_v29 }
 0x32c   : > { %v3885_v26 = vmax.f32 %v3600_v8, 0.0 }
 0x32d   : > { %v3604_v4 = vpop.f32.mrb[12].mxu0 }
 0x32e   : > { %v3605_v35 = vadd.f32 %v8894_v45, %v3604_v4  ;;  %v6227_v21 = vpop.f32.mrb[13].mxu0  ;;  %6385 = vmatmul.mubr.msk.f32.gmra.mrb[118].mxu0 %vm3308_vm15, %v3302_v36  ;;  %6420 = vmatmul.mubr.msk.f32.gmra.mrb[10].mxu1 %vm3945_vm0, %v3885_v26 }
 0x32f   : > { %6387 = vmatprep.mubr.msk.f32.mxu0 %vm6966_vm14, %v6965_v29  ;;  %6422 = vmatprep.mubr.msk.f32.mxu1 %vm6966_vm14, %v6965_v29 }
 0x330   : > { %v3886_v48 = vmax.f32 %v3605_v35, 0.0 }
 0x331   : > { %v3609_v13 = vpop.f32.mrb[14].mxu0 }
 0x332   : > { %v3610_v39 = vadd.f32 %v8894_v45, %v3609_v13  ;;  %v6230_v23 = vpop.f32.mrb[15].mxu0  ;;  %6388 = vmatmul.mubr.msk.f32.gmra.mrb[120].mxu0 %vm3308_vm15, %v3303_v32  ;;  %6423 = vmatmul.mubr.msk.f32.gmra.mrb[12].mxu1 %vm3945_vm0, %v3886_v48 }
 0x333   : > { %6425 = vmatprep.mubr.msk.f32.mxu1 %vm6966_vm14, %v6965_v29 }
 0x334   : > { %v3887_v34 = vmax.f32 %v3610_v39, 0.0 }
 0x335   : > { %v3614_v33 = vpop.f32.mrb[16].mxu0 }
 0x336   : > { %v3615_v43 = vadd.f32 %v8894_v45, %v3614_v33  ;;  %v6233_v14 = vpop.f32.mrb[17].mxu0  ;;  %6426 = vmatmul.mubr.msk.f32.gmra.mrb[14].mxu1 %vm3945_vm0, %v3887_v34 }
 0x337   : > { %6428 = vmatprep.mubr.msk.f32.mxu1 %vm6966_vm14, %v6965_v29 }
 0x338   : > { %v3888_v58 = vmax.f32 %v3615_v43, 0.0 }
 0x339   : > { %v3619_v18 = vpop.f32.mrb[18].mxu0 }
 0x33a   : > { %v3620_v56 = vadd.f32 %v8894_v45, %v3619_v18  ;;  %v6236_v16 = vpop.f32.mrb[19].mxu0  ;;  %6429 = vmatmul.mubr.msk.f32.gmra.mrb[16].mxu1 %vm3945_vm0, %v3888_v58 }
 0x33b   : > { %6431 = vmatprep.mubr.msk.f32.mxu1 %vm6966_vm14, %v6965_v29 }
 0x33c   : > { %v3889_v12 = vmax.f32 %v3620_v56, 0.0 }
 0x33d   : > { %v3624_v28 = vpop.f32.mrb[20].mxu0 }
 0x33e   : > { %v3625_v62 = vadd.f32 %v8894_v45, %v3624_v28  ;;  %v6239_v59 = vpop.f32.mrb[21].mxu0  ;;  %6432 = vmatmul.mubr.msk.f32.gmra.mrb[18].mxu1 %vm3945_vm0, %v3889_v12 }
 0x33f   : > { %6434 = vmatprep.mubr.msk.f32.mxu1 %vm6966_vm14, %v6965_v29 }
 0x340   : > { %v3890_v60 = vmax.f32 %v3625_v62, 0.0 }
 0x341   : > { %v3629_v49 = vpop.f32.mrb[22].mxu0 }
 0x342   : > { %v3630_v57 = vadd.f32 %v8894_v45, %v3629_v49  ;;  %v6242_v20 = vpop.f32.mrb[23].mxu0  ;;  %6435 = vmatmul.mubr.msk.f32.gmra.mrb[20].mxu1 %vm3945_vm0, %v3890_v60 }
 0x343   : > { %6437 = vmatprep.mubr.msk.f32.mxu1 %vm6966_vm14, %v6965_v29 }
 0x344   : > { %v3891_v61 = vmax.f32 %v3630_v57, 0.0 }
 0x345   : > { %v3634_v31 = vpop.f32.mrb[24].mxu0 }
 0x346   : > { %v3635_v17 = vadd.f32 %v8894_v45, %v3634_v31  ;;  %v6245_v46 = vpop.f32.mrb[25].mxu0  ;;  %6438 = vmatmul.mubr.msk.f32.gmra.mrb[22].mxu1 %vm3945_vm0, %v3891_v61 }
 0x347   : > { %6440 = vmatprep.mubr.msk.f32.mxu1 %vm6966_vm14, %v6965_v29 }
 0x348   : > { %v3892_v38 = vmax.f32 %v3635_v17, 0.0 }
 0x349   : > { %v3639_v51 = vpop.f32.mrb[26].mxu0 }
 0x34a   : > { %v3640_v24 = vadd.f32 %v8894_v45, %v3639_v51  ;;  %v6248_v6 = vpop.f32.mrb[27].mxu0  ;;  %6441 = vmatmul.mubr.msk.f32.gmra.mrb[24].mxu1 %vm3945_vm0, %v3892_v38 }
 0x34b   : > { %6443 = vmatprep.mubr.msk.f32.mxu1 %vm6966_vm14, %v6965_v29 }
 0x34c   : > { %v3893_v37 = vmax.f32 %v3640_v24, 0.0 }
 0x34d   : > { %v3644_v55 = vpop.f32.mrb[28].mxu0 }
 0x34e   : > { %v3645_v54 = vadd.f32 %v8894_v45, %v3644_v55  ;;  %v6251_v9 = vpop.f32.mrb[29].mxu0  ;;  %6444 = vmatmul.mubr.msk.f32.gmra.mrb[26].mxu1 %vm3945_vm0, %v3893_v37 }
 0x34f   : > { %6446 = vmatprep.mubr.msk.f32.mxu1 %vm6966_vm14, %v6965_v29 }
 0x350   : > { %v3894_v30 = vmax.f32 %v3645_v54, 0.0 }
 0x351   : > { %v3649_v15 = vpop.f32.mrb[30].mxu0 }
 0x352   : > { %v3650_v22 = vadd.f32 %v8894_v45, %v3649_v15  ;;  %v6254_v0 = vpop.f32.mrb[31].mxu0  ;;  %6447 = vmatmul.mubr.msk.f32.gmra.mrb[28].mxu1 %vm3945_vm0, %v3894_v30 }
 0x353   : > { %6449 = vmatprep.mubr.msk.f32.mxu1 %vm6966_vm14, %v6965_v29 }
 0x354   : > { %v3895_v44 = vmax.f32 %v3650_v22, 0.0 }
 0x355   : > { %v3654_v19 = vpop.f32.mrb[32].mxu0 }
 0x356   : > { %v3655_v41 = vadd.f32 %v8894_v45, %v3654_v19  ;;  %v6257_v10 = vpop.f32.mrb[33].mxu0  ;;  %6450 = vmatmul.mubr.msk.f32.gmra.mrb[30].mxu1 %vm3945_vm0, %v3895_v44 }
 0x357   : > { %6452 = vmatprep.mubr.msk.f32.mxu1 %vm6966_vm14, %v6965_v29 }
 0x358   : > { %v3896_v2 = vmax.f32 %v3655_v41, 0.0 }
 0x359   : > { %v3659_v11 = vpop.f32.mrb[34].mxu0 }
 0x35a   : > { %v3660_v1 = vadd.f32 %v8894_v45, %v3659_v11  ;;  %v6260_v47 = vpop.f32.mrb[35].mxu0  ;;  %6453 = vmatmul.mubr.msk.f32.gmra.mrb[32].mxu1 %vm3945_vm0, %v3896_v2 }
 0x35b   : > { %6455 = vmatprep.mubr.msk.f32.mxu1 %vm6966_vm14, %v6965_v29 }
 0x35c   : > { %v3897_v63 = vmax.f32 %v3660_v1, 0.0 }
 0x35d   : > { %v3664_v27 = vpop.f32.mrb[36].mxu0 }
 0x35e   : > { %v3665_v25 = vadd.f32 %v8894_v45, %v3664_v27  ;;  %v6263_v42 = vpop.f32.mrb[37].mxu0  ;;  %6456 = vmatmul.mubr.msk.f32.gmra.mrb[34].mxu1 %vm3945_vm0, %v3897_v63 }
 0x35f   : > { %6458 = vmatprep.mubr.msk.f32.mxu1 %vm6966_vm14, %v6965_v29 }
 0x360   : > { %v3898_v7 = vmax.f32 %v3665_v25, 0.0 }
 0x361   : > { %v3669_v52 = vpop.f32.mrb[38].mxu0 }
 0x362   : > { %v3670_v3 = vadd.f32 %v8894_v45, %v3669_v52  ;;  %v6266_v53 = vpop.f32.mrb[39].mxu0  ;;  %6459 = vmatmul.mubr.msk.f32.gmra.mrb[36].mxu1 %vm3945_vm0, %v3898_v7 }
 0x363   : > { %6461 = vmatprep.mubr.msk.f32.mxu1 %vm6966_vm14, %v6965_v29 }
 0x364   : > { %v3899_v40 = vmax.f32 %v3670_v3, 0.0 }
 0x365   : > { %v3674_v8 = vpop.f32.mrb[40].mxu0 }
 0x366   : > { %v3675_v50 = vadd.f32 %v8894_v45, %v3674_v8  ;;  %v6269_v36 = vpop.f32.mrb[41].mxu0  ;;  %6462 = vmatmul.mubr.msk.f32.gmra.mrb[38].mxu1 %vm3945_vm0, %v3899_v40 }
 0x367   : > { %6464 = vmatprep.mubr.msk.f32.mxu1 %vm6966_vm14, %v6965_v29 }
 0x368   : > { %v3900_v5 = vmax.f32 %v3675_v50, 0.0 }
 0x369   : > { %v3679_v26 = vpop.f32.mrb[42].mxu0 }
 0x36a   : > { %v3680_v4 = vadd.f32 %v8894_v45, %v3679_v26  ;;  %v6272_v35 = vpop.f32.mrb[43].mxu0  ;;  %6465 = vmatmul.mubr.msk.f32.gmra.mrb[40].mxu1 %vm3945_vm0, %v3900_v5 }
 0x36b   : > { %6467 = vmatprep.mubr.msk.f32.mxu1 %vm6966_vm14, %v6965_v29 }
 0x36c   : > { %v3901_v21 = vmax.f32 %v3680_v4, 0.0 }
 0x36d   : > { %v3684_v32 = vpop.f32.mrb[44].mxu0 }
 0x36e   : > { %v3685_v48 = vadd.f32 %v8894_v45, %v3684_v32  ;;  %v6275_v13 = vpop.f32.mrb[45].mxu0  ;;  %6468 = vmatmul.mubr.msk.f32.gmra.mrb[42].mxu1 %vm3945_vm0, %v3901_v21 }
 0x36f   : > { %6470 = vmatprep.mubr.msk.f32.mxu1 %vm6966_vm14, %v6965_v29 }
 0x370   : > { %v3902_v39 = vmax.f32 %v3685_v48, 0.0 }
 0x371   : > { %v3689_v23 = vpop.f32.mrb[46].mxu0 }
 0x372   : > { %v3690_v34 = vadd.f32 %v8894_v45, %v3689_v23  ;;  %v6278_v33 = vpop.f32.mrb[47].mxu0  ;;  %6471 = vmatmul.mubr.msk.f32.gmra.mrb[44].mxu1 %vm3945_vm0, %v3902_v39 }
 0x373   : > { %6473 = vmatprep.mubr.msk.f32.mxu1 %vm6966_vm14, %v6965_v29 }
 0x374   : > { %v3903_v43 = vmax.f32 %v3690_v34, 0.0 }
 0x375   : > { %v3694_v14 = vpop.f32.mrb[48].mxu0 }
 0x376   : > { %v3695_v58 = vadd.f32 %v8894_v45, %v3694_v14  ;;  %v6281_v18 = vpop.f32.mrb[49].mxu0  ;;  %6474 = vmatmul.mubr.msk.f32.gmra.mrb[46].mxu1 %vm3945_vm0, %v3903_v43 }
 0x377   : > { %6476 = vmatprep.mubr.msk.f32.mxu1 %vm6966_vm14, %v6965_v29 }
 0x378   : > { %v3904_v56 = vmax.f32 %v3695_v58, 0.0 }
 0x379   : > { %v3699_v16 = vpop.f32.mrb[50].mxu0 }
 0x37a   : > { %v3700_v12 = vadd.f32 %v8894_v45, %v3699_v16  ;;  %v6284_v28 = vpop.f32.mrb[51].mxu0  ;;  %6477 = vmatmul.mubr.msk.f32.gmra.mrb[48].mxu1 %vm3945_vm0, %v3904_v56 }
 0x37b   : > { %6479 = vmatprep.mubr.msk.f32.mxu1 %vm6966_vm14, %v6965_v29 }
 0x37c   : > { %v3905_v62 = vmax.f32 %v3700_v12, 0.0 }
 0x37d   : > { %v3704_v59 = vpop.f32.mrb[52].mxu0 }
 0x37e   : > { %v3705_v60 = vadd.f32 %v8894_v45, %v3704_v59  ;;  %v6287_v49 = vpop.f32.mrb[53].mxu0  ;;  %6480 = vmatmul.mubr.msk.f32.gmra.mrb[50].mxu1 %vm3945_vm0, %v3905_v62 }
 0x37f   : > { %6482 = vmatprep.mubr.msk.f32.mxu1 %vm6966_vm14, %v6965_v29 }
 0x380   : > { %v3906_v57 = vmax.f32 %v3705_v60, 0.0 }
 0x381   : > { %v3709_v20 = vpop.f32.mrb[54].mxu0 }
 0x382   : > { %v3710_v61 = vadd.f32 %v8894_v45, %v3709_v20  ;;  %v6290_v31 = vpop.f32.mrb[55].mxu0  ;;  %6483 = vmatmul.mubr.msk.f32.gmra.mrb[52].mxu1 %vm3945_vm0, %v3906_v57 }
 0x383   : > { %6485 = vmatprep.mubr.msk.f32.mxu1 %vm6966_vm14, %v6965_v29 }
 0x384   : > { %v3907_v17 = vmax.f32 %v3710_v61, 0.0 }
 0x385   : > { %v3714_v46 = vpop.f32.mrb[56].mxu0 }
 0x386   : > { %v3715_v38 = vadd.f32 %v8894_v45, %v3714_v46  ;;  %v6293_v51 = vpop.f32.mrb[57].mxu0  ;;  %6486 = vmatmul.mubr.msk.f32.gmra.mrb[54].mxu1 %vm3945_vm0, %v3907_v17 }
 0x387   : > { %6488 = vmatprep.mubr.msk.f32.mxu1 %vm6966_vm14, %v6965_v29 }
 0x388   : > { %v3908_v24 = vmax.f32 %v3715_v38, 0.0 }
 0x389   : > { %v3719_v6 = vpop.f32.mrb[58].mxu0 }
 0x38a   : > { %v3720_v37 = vadd.f32 %v8894_v45, %v3719_v6  ;;  %v6296_v55 = vpop.f32.mrb[59].mxu0  ;;  %6489 = vmatmul.mubr.msk.f32.gmra.mrb[56].mxu1 %vm3945_vm0, %v3908_v24 }
 0x38b   : > { %6491 = vmatprep.mubr.msk.f32.mxu1 %vm6966_vm14, %v6965_v29 }
 0x38c   : > { %v3909_v54 = vmax.f32 %v3720_v37, 0.0 }
 0x38d   : > { %v3724_v9 = vpop.f32.mrb[60].mxu0 }
 0x38e   : > { %v3725_v30 = vadd.f32 %v8894_v45, %v3724_v9  ;;  %v6299_v15 = vpop.f32.mrb[61].mxu0  ;;  %6492 = vmatmul.mubr.msk.f32.gmra.mrb[58].mxu1 %vm3945_vm0, %v3909_v54 }
 0x38f   : > { %6494 = vmatprep.mubr.msk.f32.mxu1 %vm6966_vm14, %v6965_v29 }
 0x390   : > { %v3910_v22 = vmax.f32 %v3725_v30, 0.0 }
 0x391   : > { %v3729_v0 = vpop.f32.mrb[62].mxu0 }
 0x392   : > { %v3730_v44 = vadd.f32 %v8894_v45, %v3729_v0  ;;  %v6302_v19 = vpop.f32.mrb[63].mxu0  ;;  %6495 = vmatmul.mubr.msk.f32.gmra.mrb[60].mxu1 %vm3945_vm0, %v3910_v22 }
 0x393   : > { %6497 = vmatprep.mubr.msk.f32.mxu1 %vm6966_vm14, %v6965_v29 }
 0x394   : > { %v3911_v41 = vmax.f32 %v3730_v44, 0.0 }
 0x395   : > { %v3734_v10 = vpop.f32.mrb[64].mxu0 }
 0x396   : > { %v3735_v2 = vadd.f32 %v8894_v45, %v3734_v10  ;;  %v6305_v11 = vpop.f32.mrb[65].mxu0  ;;  %6498 = vmatmul.mubr.msk.f32.gmra.mrb[62].mxu1 %vm3945_vm0, %v3911_v41 }
 0x397   : > { %6500 = vmatprep.mubr.msk.f32.mxu1 %vm6966_vm14, %v6965_v29 }
 0x398   : > { %v3912_v1 = vmax.f32 %v3735_v2, 0.0 }
 0x399   : > { %v3739_v47 = vpop.f32.mrb[66].mxu0 }
 0x39a   : > { %v3740_v63 = vadd.f32 %v8894_v45, %v3739_v47  ;;  %v6308_v27 = vpop.f32.mrb[67].mxu0  ;;  %6501 = vmatmul.mubr.msk.f32.gmra.mrb[64].mxu1 %vm3945_vm0, %v3912_v1 }
 0x39b   : > { %6503 = vmatprep.mubr.msk.f32.mxu1 %vm6966_vm14, %v6965_v29 }
 0x39c   : > { %v3913_v25 = vmax.f32 %v3740_v63, 0.0 }
 0x39d   : > { %v3744_v42 = vpop.f32.mrb[68].mxu0 }
 0x39e   : > { %v3745_v7 = vadd.f32 %v8894_v45, %v3744_v42  ;;  %v6311_v52 = vpop.f32.mrb[69].mxu0  ;;  %6504 = vmatmul.mubr.msk.f32.gmra.mrb[66].mxu1 %vm3945_vm0, %v3913_v25 }
 0x39f   : > { %6506 = vmatprep.mubr.msk.f32.mxu1 %vm6966_vm14, %v6965_v29 }
 0x3a0   : > { %v3914_v3 = vmax.f32 %v3745_v7, 0.0 }
 0x3a1   : > { %v3749_v53 = vpop.f32.mrb[70].mxu0 }
 0x3a2   : > { %v3750_v40 = vadd.f32 %v8894_v45, %v3749_v53  ;;  %v6314_v8 = vpop.f32.mrb[71].mxu0  ;;  %6507 = vmatmul.mubr.msk.f32.gmra.mrb[68].mxu1 %vm3945_vm0, %v3914_v3 }
 0x3a3   : > { %6509 = vmatprep.mubr.msk.f32.mxu1 %vm6966_vm14, %v6965_v29 }
 0x3a4   : > { %v3915_v50 = vmax.f32 %v3750_v40, 0.0 }
 0x3a5   : > { %v3754_v36 = vpop.f32.mrb[72].mxu0 }
 0x3a6   : > { %v3755_v5 = vadd.f32 %v8894_v45, %v3754_v36  ;;  %v6317_v26 = vpop.f32.mrb[73].mxu0  ;;  %6510 = vmatmul.mubr.msk.f32.gmra.mrb[70].mxu1 %vm3945_vm0, %v3915_v50 }
 0x3a7   : > { %6512 = vmatprep.mubr.msk.f32.mxu1 %vm6966_vm14, %v6965_v29 }
 0x3a8   : > { %v3916_v4 = vmax.f32 %v3755_v5, 0.0  ;;  %v9154_v5 = vld [vmem:[%s9400_s2 + $0x7a] ss:$0 sm:$0xff] }
 0x3a9   : > { %v3759_v35 = vpop.f32.mrb[74].mxu0 }
 0x3aa   : > { %v3760_v21 = vadd.f32 %v8894_v45, %v3759_v35  ;;  %v6320_v32 = vpop.f32.mrb[75].mxu0  ;;  %6513 = vmatmul.mubr.msk.f32.gmra.mrb[72].mxu1 %vm3945_vm0, %v3916_v4 }
 0x3ab   : > { %6515 = vmatprep.mubr.msk.f32.mxu1 %vm6966_vm14, %v6965_v29 }
 0x3ac   : > { %v3917_v48 = vmax.f32 %v3760_v21, 0.0 }
 0x3ad   : > { %v3764_v13 = vpop.f32.mrb[76].mxu0 }
 0x3ae   : > { %v3765_v39 = vadd.f32 %v8894_v45, %v3764_v13  ;;  %v6323_v23 = vpop.f32.mrb[77].mxu0  ;;  %6516 = vmatmul.mubr.msk.f32.gmra.mrb[74].mxu1 %vm3945_vm0, %v3917_v48 }
 0x3af   : > { %6518 = vmatprep.mubr.msk.f32.mxu1 %vm6966_vm14, %v6965_v29 }
 0x3b0   : > { %v3918_v34 = vmax.f32 %v3765_v39, 0.0 }
 0x3b1   : > { %v3769_v33 = vpop.f32.mrb[78].mxu0 }
 0x3b2   : > { %v3770_v43 = vadd.f32 %v8894_v45, %v3769_v33  ;;  %v6326_v14 = vpop.f32.mrb[79].mxu0  ;;  %6519 = vmatmul.mubr.msk.f32.gmra.mrb[76].mxu1 %vm3945_vm0, %v3918_v34 }
 0x3b3   : > { %6521 = vmatprep.mubr.msk.f32.mxu1 %vm6966_vm14, %v6965_v29 }
 0x3b4   : > { %v3919_v58 = vmax.f32 %v3770_v43, 0.0 }
 0x3b5   : > { %v3774_v18 = vpop.f32.mrb[80].mxu0 }
 0x3b6   : > { %v3775_v56 = vadd.f32 %v8894_v45, %v3774_v18  ;;  %v6329_v16 = vpop.f32.mrb[81].mxu0  ;;  %6522 = vmatmul.mubr.msk.f32.gmra.mrb[78].mxu1 %vm3945_vm0, %v3919_v58 }
 0x3b7   : > { %6524 = vmatprep.mubr.msk.f32.mxu1 %vm6966_vm14, %v6965_v29 }
 0x3b8   : > { %v3920_v12 = vmax.f32 %v3775_v56, 0.0 }
 0x3b9   : > { %v3779_v28 = vpop.f32.mrb[82].mxu0 }
 0x3ba   : > { %v3780_v62 = vadd.f32 %v8894_v45, %v3779_v28  ;;  %v6332_v59 = vpop.f32.mrb[83].mxu0  ;;  %6525 = vmatmul.mubr.msk.f32.gmra.mrb[80].mxu1 %vm3945_vm0, %v3920_v12 }
 0x3bb   : > { %6527 = vmatprep.mubr.msk.f32.mxu1 %vm6966_vm14, %v6965_v29 }
 0x3bc   : > { %v3921_v60 = vmax.f32 %v3780_v62, 0.0 }
 0x3bd   : > { %v3784_v49 = vpop.f32.mrb[84].mxu0 }
 0x3be   : > { %v3785_v57 = vadd.f32 %v8894_v45, %v3784_v49  ;;  %v6335_v20 = vpop.f32.mrb[85].mxu0  ;;  %6528 = vmatmul.mubr.msk.f32.gmra.mrb[82].mxu1 %vm3945_vm0, %v3921_v60 }
 0x3bf   : > { %6530 = vmatprep.mubr.msk.f32.mxu1 %vm6966_vm14, %v6965_v29 }
 0x3c0   : > { %v3922_v61 = vmax.f32 %v3785_v57, 0.0 }
 0x3c1   : > { %v3789_v31 = vpop.f32.mrb[86].mxu0 }
 0x3c2   : > { %v3790_v17 = vadd.f32 %v8894_v45, %v3789_v31  ;;  %v6338_v46 = vpop.f32.mrb[87].mxu0  ;;  %6531 = vmatmul.mubr.msk.f32.gmra.mrb[84].mxu1 %vm3945_vm0, %v3922_v61 }
 0x3c3   : > { %6533 = vmatprep.mubr.msk.f32.mxu1 %vm6966_vm14, %v6965_v29 }
 0x3c4   : > { %v3923_v38 = vmax.f32 %v3790_v17, 0.0 }
 0x3c5   : > { %v3794_v51 = vpop.f32.mrb[88].mxu0 }
 0x3c6   : > { %v3795_v24 = vadd.f32 %v8894_v45, %v3794_v51  ;;  %v6341_v6 = vpop.f32.mrb[89].mxu0  ;;  %6534 = vmatmul.mubr.msk.f32.gmra.mrb[86].mxu1 %vm3945_vm0, %v3923_v38 }
 0x3c7   : > { %6536 = vmatprep.mubr.msk.f32.mxu1 %vm6966_vm14, %v6965_v29 }
 0x3c8   : > { %v3924_v37 = vmax.f32 %v3795_v24, 0.0 }
 0x3c9   : > { %v3799_v55 = vpop.f32.mrb[90].mxu0 }
 0x3ca   : > { %v3800_v54 = vadd.f32 %v8894_v45, %v3799_v55  ;;  %v6344_v9 = vpop.f32.mrb[91].mxu0  ;;  %6537 = vmatmul.mubr.msk.f32.gmra.mrb[88].mxu1 %vm3945_vm0, %v3924_v37 }
 0x3cb   : > { %6539 = vmatprep.mubr.msk.f32.mxu1 %vm6966_vm14, %v6965_v29 }
 0x3cc   : > { %v3925_v30 = vmax.f32 %v3800_v54, 0.0 }
 0x3cd   : > { %v3804_v15 = vpop.f32.mrb[92].mxu0 }
 0x3ce   : > { %v3805_v22 = vadd.f32 %v8894_v45, %v3804_v15  ;;  %v6347_v0 = vpop.f32.mrb[93].mxu0  ;;  %6540 = vmatmul.mubr.msk.f32.gmra.mrb[90].mxu1 %vm3945_vm0, %v3925_v30 }
 0x3cf   : > { %6542 = vmatprep.mubr.msk.f32.mxu1 %vm6966_vm14, %v6965_v29 }
 0x3d0   : > { %v3926_v44 = vmax.f32 %v3805_v22, 0.0 }
 0x3d1   : > { %v3809_v19 = vpop.f32.mrb[94].mxu0 }
 0x3d2   : > { %v3810_v41 = vadd.f32 %v8894_v45, %v3809_v19  ;;  %v6350_v10 = vpop.f32.mrb[95].mxu0  ;;  %6543 = vmatmul.mubr.msk.f32.gmra.mrb[92].mxu1 %vm3945_vm0, %v3926_v44 }
 0x3d3   : > { %6545 = vmatprep.mubr.msk.f32.mxu1 %vm6966_vm14, %v6965_v29 }
 0x3d4   : > { %v3927_v2 = vmax.f32 %v3810_v41, 0.0 }
 0x3d5   : > { %v3814_v11 = vpop.f32.mrb[96].mxu0 }
 0x3d6   : > { %v3815_v1 = vadd.f32 %v8894_v45, %v3814_v11  ;;  %v6353_v47 = vpop.f32.mrb[97].mxu0  ;;  %6546 = vmatmul.mubr.msk.f32.gmra.mrb[94].mxu1 %vm3945_vm0, %v3927_v2 }
 0x3d7   : > { %6548 = vmatprep.mubr.msk.f32.mxu1 %vm6966_vm14, %v6965_v29 }
 0x3d8   : > { %v3928_v63 = vmax.f32 %v3815_v1, 0.0 }
 0x3d9   : > { %v3819_v27 = vpop.f32.mrb[98].mxu0 }
 0x3da   : > { %v3820_v25 = vadd.f32 %v8894_v45, %v3819_v27  ;;  %v6356_v42 = vpop.f32.mrb[99].mxu0  ;;  %6549 = vmatmul.mubr.msk.f32.gmra.mrb[96].mxu1 %vm3945_vm0, %v3928_v63 }
 0x3db   : > { %6551 = vmatprep.mubr.msk.f32.mxu1 %vm6966_vm14, %v6965_v29 }
 0x3dc   : > { %v3929_v7 = vmax.f32 %v3820_v25, 0.0 }
 0x3dd   : > { %v3824_v52 = vpop.f32.mrb[100].mxu0 }
 0x3de   : > { %v3825_v3 = vadd.f32 %v8894_v45, %v3824_v52  ;;  %v6359_v53 = vpop.f32.mrb[101].mxu0  ;;  %6552 = vmatmul.mubr.msk.f32.gmra.mrb[98].mxu1 %vm3945_vm0, %v3929_v7 }
 0x3df   : > { %6554 = vmatprep.mubr.msk.f32.mxu1 %vm6966_vm14, %v6965_v29 }
 0x3e0   : > { %v3930_v40 = vmax.f32 %v3825_v3, 0.0 }
 0x3e1   : > { %v3829_v8 = vpop.f32.mrb[102].mxu0 }
 0x3e2   : > { %v3830_v50 = vadd.f32 %v8894_v45, %v3829_v8  ;;  %v6362_v36 = vpop.f32.mrb[103].mxu0  ;;  %6555 = vmatmul.mubr.msk.f32.gmra.mrb[100].mxu1 %vm3945_vm0, %v3930_v40 }
 0x3e3   : > { %6557 = vmatprep.mubr.msk.f32.mxu1 %vm6966_vm14, %v6965_v29 }
 0x3e4   : > { %v3931_v26 = vmax.f32 %v3830_v50, 0.0 }
 0x3e5   : > { %v3834_v4 = vpop.f32.mrb[104].mxu0  ;;  %v4201_v35 = vpop.f32.mrb[252].mxu1 }
 0x3e6   : > { %v3835_v21 = vadd.f32 %v8894_v45, %v3834_v4  ;;  %v4202_v32 = vadd.f32 %v9154_v5, %v4201_v35  ;;  %v6365_v48 = vpop.f32.mrb[105].mxu0  ;;  %v6400_v13 = vpop.f32.mrb[253].mxu1  ;;  %6558 = vmatmul.mubr.msk.f32.gmra.mrb[102].mxu1 %vm3945_vm0, %v3931_v26 }
 0x3e7   : > { %6560 = vmatprep.mubr.msk.f32.mxu1 %vm6966_vm14, %v6965_v29 }
 0x3e8   : > { %v3932_v39 = vmax.f32 %v3835_v21, 0.0  ;;  %v5468_v23 = vmul.f32 -1.442695, %v4202_v32 }
 0x3e9   : > { %v3839_v34 = vpop.f32.mrb[106].mxu0  ;;  %v4206_v33 = vpop.f32.mrb[254].mxu1 }
 0x3ea   : > { %6700 = vpow2.f32 %v5468_v23  ;;  %v3840_v43 = vadd.f32 %v8894_v45, %v3839_v34  ;;  %v4207_v14 = vadd.f32 %v9154_v5, %v4206_v33  ;;  %v6368_v58 = vpop.f32.mrb[107].mxu0  ;;  %v6403_v18 = vpop.f32.mrb[255].mxu1  ;;  %6561 = vmatmul.mubr.msk.f32.gmra.mrb[104].mxu1 %vm3945_vm0, %v3932_v39 }
 0x3eb   : > { %6563 = vmatprep.mubr.msk.f32.mxu1 %vm6966_vm14, %v6965_v29 }
 0x3ec   : > { %v3933_v56 = vmax.f32 %v3840_v43, 0.0  ;;  %v5469_v16 = vmul.f32 -1.442695, %v4207_v14 }
 0x3ed   : > { %v3844_v12 = vpop.f32.mrb[108].mxu0  ;;  %v4211_v28 = vpop.f32.mrb[0].mxu1 }
 0x3ee   : > { %6702 = vpow2.f32 %v5469_v16  ;;  %v3845_v62 = vadd.f32 %v8894_v45, %v3844_v12  ;;  %v4212_v59 = vadd.f32 %v9154_v5, %v4211_v28  ;;  %v6371_v60 = vpop.f32.mrb[109].mxu0  ;;  %v6406_v49 = vpop.f32.mrb[1].mxu1  ;;  %6564 = vmatmul.mubr.msk.f32.gmra.mrb[106].mxu1 %vm3945_vm0, %v3933_v56 }
 0x3ef   : > { %6566 = vmatprep.mubr.msk.f32.mxu1 %vm6966_vm14, %v6965_v29 }
 0x3f0   : > { %v3934_v57 = vmax.f32 %v3845_v62, 0.0  ;;  %v5470_v20 = vmul.f32 -1.442695, %v4212_v59 }
 0x3f1   : > { %v3849_v61 = vpop.f32.mrb[110].mxu0  ;;  %v4216_v31 = vpop.f32.mrb[2].mxu1 }
 0x3f2   : > { %6704 = vpow2.f32 %v5470_v20  ;;  %v3850_v17 = vadd.f32 %v8894_v45, %v3849_v61  ;;  %v4217_v46 = vadd.f32 %v9154_v5, %v4216_v31  ;;  %v6374_v38 = vpop.f32.mrb[111].mxu0  ;;  %v6409_v51 = vpop.f32.mrb[3].mxu1  ;;  %6567 = vmatmul.mubr.msk.f32.gmra.mrb[108].mxu1 %vm3945_vm0, %v3934_v57 }
 0x3f3   : > { %6569 = vmatprep.mubr.msk.f32.mxu1 %vm6966_vm14, %v6965_v29 }
 0x3f4   : > { %v6701_v24 = vpop.eup %6700  ;;  %v3935_v6 = vmax.f32 %v3850_v17, 0.0  ;;  %v5471_v37 = vmul.f32 -1.442695, %v4217_v46 }
 0x3f5   : > { %v4704_v55 = vadd.f32 1.0, %v6701_v24  ;;  %v3854_v54 = vpop.f32.mrb[112].mxu0  ;;  %v4221_v9 = vpop.f32.mrb[4].mxu1 }
 0x3f6   : > { %6706 = vpow2.f32 %v5471_v37  ;;  %v3855_v30 = vadd.f32 %v8894_v45, %v3854_v54  ;;  %v4222_v15 = vadd.f32 %v9154_v5, %v4221_v9  ;;  %v6377_v22 = vpop.f32.mrb[113].mxu0  ;;  %v6412_v0 = vpop.f32.mrb[5].mxu1  ;;  %6570 = vmatmul.mubr.msk.f32.gmra.mrb[110].mxu1 %vm3945_vm0, %v3935_v6 }
 0x3f7   : > { %6708 = vrcp.f32 %v4704_v55  ;;  %6572 = vmatprep.mubr.msk.f32.mxu1 %vm6966_vm14, %v6965_v29 }
 0x3f8   : > { %v6703_v44 = vpop.eup %6702  ;;  %v3936_v19 = vmax.f32 %v3855_v30, 0.0  ;;  %v5472_v41 = vmul.f32 -1.442695, %v4222_v15 }
 0x3f9   : > { %v4705_v10 = vadd.f32 1.0, %v6703_v44  ;;  %v3859_v2 = vpop.f32.mrb[114].mxu0  ;;  %v4226_v11 = vpop.f32.mrb[6].mxu1 }
 0x3fa   : > { %6710 = vpow2.f32 %v5472_v41  ;;  %v3860_v1 = vadd.f32 %v8894_v45, %v3859_v2  ;;  %v4227_v47 = vadd.f32 %v9154_v5, %v4226_v11  ;;  %v6380_v63 = vpop.f32.mrb[115].mxu0  ;;  %v6415_v27 = vpop.f32.mrb[7].mxu1  ;;  %6573 = vmatmul.mubr.msk.f32.gmra.mrb[112].mxu1 %vm3945_vm0, %v3936_v19 }
 0x3fb   : > { %6712 = vrcp.f32 %v4705_v10  ;;  %6575 = vmatprep.mubr.msk.f32.mxu1 %vm6966_vm14, %v6965_v29 }
 0x3fc   : > { %v6705_v25 = vpop.eup %6704  ;;  %v3937_v42 = vmax.f32 %v3860_v1, 0.0  ;;  %v5473_v7 = vmul.f32 -1.442695, %v4227_v47 }
 0x3fd   : > { %v4706_v52 = vadd.f32 1.0, %v6705_v25  ;;  %v3864_v3 = vpop.f32.mrb[116].mxu0  ;;  %v4231_v53 = vpop.f32.mrb[8].mxu1 }
 0x3fe   : > { %6714 = vpow2.f32 %v5473_v7  ;;  %v3865_v40 = vadd.f32 %v8894_v45, %v3864_v3  ;;  %v4232_v8 = vadd.f32 %v9154_v5, %v4231_v53  ;;  %v6383_v50 = vpop.f32.mrb[117].mxu0  ;;  %v6418_v36 = vpop.f32.mrb[9].mxu1  ;;  %6576 = vmatmul.mubr.msk.f32.gmra.mrb[114].mxu1 %vm3945_vm0, %v3937_v42 }
 0x3ff   : > { %6716 = vrcp.f32 %v4706_v52  ;;  %6578 = vmatprep.mubr.msk.f32.mxu1 %vm6966_vm14, %v6965_v29 }
 0x400   : > { %v6707_v26 = vpop.eup %6706  ;;  %v3938_v4 = vmax.f32 %v3865_v40, 0.0  ;;  %v5474_v35 = vmul.f32 -1.442695, %v4232_v8 }
 0x401   : > { %v6709_v21 = vpop.eup %6708  ;;  %v4707_v32 = vadd.f32 1.0, %v6707_v26  ;;  %v3869_v48 = vpop.f32.mrb[118].mxu0 }
 0x402   : > { %v4236_v13 = vpop.f32.mrb[10].mxu1  ;;  %4894 = vst.msk [vmem:[%s9195_s10] sm:$0xff] %vm4893_vm1, %v6709_v21  ;;  %6718 = vpow2.f32 %v5474_v35  ;;  %v3870_v39 = vadd.f32 %v8894_v45, %v3869_v48  ;;  %v6386_v34 = vpop.f32.mrb[119].mxu0  ;;  %6579 = vmatmul.mubr.msk.f32.gmra.mrb[116].mxu1 %vm3945_vm0, %v3938_v4 }
 0x403   : > { %v4237_v23 = vadd.f32 %v9154_v5, %v4236_v13  ;;  %v6421_v33 = vpop.f32.mrb[11].mxu1  ;;  %6720 = vrcp.f32 %v4707_v32  ;;  %6581 = vmatprep.mubr.msk.f32.mxu1 %vm6966_vm14, %v6965_v29 }
 0x404   : > { %v6711_v43 = vpop.eup %6710  ;;  %v3939_v14 = vmax.f32 %v3870_v39, 0.0 }
 0x405   : > { %v5475_v58 = vmul.f32 -1.442695, %v4237_v23  ;;  %v6713_v18 = vpop.eup %6712  ;;  %v4708_v56 = vadd.f32 1.0, %v6711_v43  ;;  %v3874_v16 = vpop.f32.mrb[120].mxu0 }
 0x406   : > { %v4241_v12 = vpop.f32.mrb[12].mxu1  ;;  %4895 = vst.msk [vmem:[%s9195_s10 + $0x8] sm:$0xff] %vm4893_vm1, %v6713_v18  ;;  %v3875_v28 = vadd.f32 %v8894_v45, %v3874_v16  ;;  %v6389_v59 = vpop.f32.mrb[121].mxu0  ;;  %6582 = vmatmul.mubr.msk.f32.gmra.mrb[118].mxu1 %vm3945_vm0, %v3939_v14 }
 0x407   : > { %6722 = vpow2.f32 %v5475_v58  ;;  %v4242_v62 = vadd.f32 %v9154_v5, %v4241_v12  ;;  %v6424_v60 = vpop.f32.mrb[13].mxu1  ;;  %6584 = vmatprep.mubr.msk.f32.mxu1 %vm6966_vm14, %v6965_v29 }
 0x408   : > { %6724 = vrcp.f32 %v4708_v56  ;;  %v6715_v49 = vpop.eup %6714  ;;  %v3940_v57 = vmax.f32 %v3875_v28, 0.0 }
 0x409   : > { %v5476_v20 = vmul.f32 -1.442695, %v4242_v62  ;;  %v6717_v61 = vpop.eup %6716  ;;  %v4709_v31 = vadd.f32 1.0, %v6715_v49  ;;  %v4246_v17 = vpop.f32.mrb[14].mxu1 }
 0x40a   : > { %4896 = vst.msk [vmem:[%s9195_s10 + $0x10] sm:$0xff] %vm4893_vm1, %v6717_v61  ;;  %v4247_v45 = vadd.f32 %v9154_v5, %v4246_v17  ;;  %v6427_v46 = vpop.f32.mrb[15].mxu1  ;;  %6585 = vmatmul.mubr.msk.f32.gmra.mrb[120].mxu1 %vm3945_vm0, %v3940_v57 }
 0x40b   : > { %6726 = vpow2.f32 %v5476_v20 }
 0x40c   : > { %6728 = vrcp.f32 %v4709_v31  ;;  %v6719_v38 = vpop.eup %6718  ;;  %v5477_v51 = vmul.f32 -1.442695, %v4247_v45 }
 0x40d   : > { %v6721_v29 = vpop.eup %6720  ;;  %v4710_v24 = vadd.f32 1.0, %v6719_v38  ;;  %v4251_v6 = vpop.f32.mrb[16].mxu1 }
 0x40e   : > { %4897 = vst.msk [vmem:[%s9195_s10 + $0x18] sm:$0xff] %vm4893_vm1, %v6721_v29  ;;  %6730 = vpow2.f32 %v5477_v51  ;;  %v4252_v37 = vadd.f32 %v9154_v5, %v4251_v6  ;;  %v6430_v55 = vpop.f32.mrb[17].mxu1 }
 0x40f   : > { %6732 = vrcp.f32 %v4710_v24 }
 0x410   : > { %v5478_v9 = vmul.f32 -1.442695, %v4252_v37 }
 0x411   : > { %v6723_v54 = vpop.eup %6722  ;;  %v4256_v22 = vpop.f32.mrb[18].mxu1 }
 0x412   : > { %v6725_v30 = vpop.eup %6724  ;;  %v4711_v15 = vadd.f32 1.0, %v6723_v54  ;;  %6734 = vpow2.f32 %v5478_v9  ;;  %v4257_v0 = vadd.f32 %v9154_v5, %v4256_v22  ;;  %v6433_v44 = vpop.f32.mrb[19].mxu1 }
 0x413   : > { %4898 = vst.msk [vmem:[%s9195_s10 + $0x20] sm:$0xff] %vm4893_vm1, %v6725_v30 }
 0x414   : > { %6736 = vrcp.f32 %v4711_v15  ;;  %v5479_v41 = vmul.f32 -1.442695, %v4257_v0 }
 0x415   : > { %v6727_v19 = vpop.eup %6726  ;;  %v4261_v11 = vpop.f32.mrb[20].mxu1 }
 0x416   : > { %v6729_v10 = vpop.eup %6728  ;;  %v4712_v2 = vadd.f32 1.0, %v6727_v19  ;;  %6738 = vpow2.f32 %v5479_v41  ;;  %v4262_v1 = vadd.f32 %v9154_v5, %v4261_v11  ;;  %v6436_v47 = vpop.f32.mrb[21].mxu1 }
 0x417   : > { %4899 = vst.msk [vmem:[%s9195_s10 + $0x28] sm:$0xff] %vm4893_vm1, %v6729_v10 }
 0x418   : > { %6740 = vrcp.f32 %v4712_v2  ;;  %v6731_v63 = vpop.eup %6730  ;;  %v5480_v27 = vmul.f32 -1.442695, %v4262_v1 }
 0x419   : > { %v6733_v25 = vpop.eup %6732  ;;  %v4713_v42 = vadd.f32 1.0, %v6731_v63  ;;  %v4266_v7 = vpop.f32.mrb[22].mxu1 }
 0x41a   : > { %4900 = vst.msk [vmem:[%s9195_s10 + $0x30] sm:$0xff] %vm4893_vm1, %v6733_v25  ;;  %6742 = vpow2.f32 %v5480_v27  ;;  %v4267_v52 = vadd.f32 %v9154_v5, %v4266_v7  ;;  %v6439_v3 = vpop.f32.mrb[23].mxu1 }
 0x41b   : > { %6744 = vrcp.f32 %v4713_v42 }
 0x41c   : > { %v6735_v53 = vpop.eup %6734  ;;  %v5481_v40 = vmul.f32 -1.442695, %v4267_v52 }
 0x41d   : > { %v4714_v50 = vadd.f32 1.0, %v6735_v53  ;;  %v4271_v36 = vpop.f32.mrb[24].mxu1 }
 0x41e   : > { %v6737_v8 = vpop.eup %6736  ;;  %6746 = vpow2.f32 %v5481_v40  ;;  %v4272_v26 = vadd.f32 %v9154_v5, %v4271_v36  ;;  %v6442_v4 = vpop.f32.mrb[25].mxu1 }
 0x41f   : > { %4901 = vst.msk [vmem:[%s9195_s10 + $0x38] sm:$0xff] %vm4893_vm1, %v6737_v8  ;;  %6748 = vrcp.f32 %v4714_v50 }
 0x420   : > { %v6739_v35 = vpop.eup %6738  ;;  %v5482_v21 = vmul.f32 -1.442695, %v4272_v26 }
 0x421   : > { %v4715_v48 = vadd.f32 1.0, %v6739_v35  ;;  %v4276_v13 = vpop.f32.mrb[26].mxu1 }
 0x422   : > { %v6741_v32 = vpop.eup %6740  ;;  %6750 = vpow2.f32 %v5482_v21  ;;  %v4277_v39 = vadd.f32 %v9154_v5, %v4276_v13  ;;  %v6445_v23 = vpop.f32.mrb[27].mxu1 }
 0x423   : > { %4902 = vst.msk [vmem:[%s9195_s10 + $0x40] sm:$0xff] %vm4893_vm1, %v6741_v32  ;;  %6752 = vrcp.f32 %v4715_v48 }
 0x424   : > { %v6743_v34 = vpop.eup %6742  ;;  %v5483_v33 = vmul.f32 -1.442695, %v4277_v39 }
 0x425   : > { %v6745_v43 = vpop.eup %6744  ;;  %v4716_v14 = vadd.f32 1.0, %v6743_v34  ;;  %v4281_v58 = vpop.f32.mrb[28].mxu1 }
 0x426   : > { %4903 = vst.msk [vmem:[%s9195_s10 + $0x48] sm:$0xff] %vm4893_vm1, %v6745_v43  ;;  %6754 = vpow2.f32 %v5483_v33  ;;  %v4282_v18 = vadd.f32 %v9154_v5, %v4281_v58  ;;  %v6448_v56 = vpop.f32.mrb[29].mxu1 }
 0x427   : > { %6756 = vrcp.f32 %v4716_v14 }
 0x428   : > { %v6747_v16 = vpop.eup %6746  ;;  %v5484_v12 = vmul.f32 -1.442695, %v4282_v18 }
 0x429   : > { %v6749_v28 = vpop.eup %6748  ;;  %v4717_v62 = vadd.f32 1.0, %v6747_v16  ;;  %v4286_v59 = vpop.f32.mrb[30].mxu1 }
 0x42a   : > { %4904 = vst.msk [vmem:[%s9195_s10 + $0x50] sm:$0xff] %vm4893_vm1, %v6749_v28  ;;  %6758 = vpow2.f32 %v5484_v12  ;;  %v4287_v60 = vadd.f32 %v9154_v5, %v4286_v59  ;;  %v6451_v49 = vpop.f32.mrb[31].mxu1 }
 0x42b   : > { %6760 = vrcp.f32 %v4717_v62 }
 0x42c   : > { %v6751_v57 = vpop.eup %6750  ;;  %v5485_v20 = vmul.f32 -1.442695, %v4287_v60 }
 0x42d   : > { %v6753_v61 = vpop.eup %6752  ;;  %v4718_v31 = vadd.f32 1.0, %v6751_v57  ;;  %v4291_v17 = vpop.f32.mrb[32].mxu1 }
 0x42e   : > { %4905 = vst.msk [vmem:[%s9195_s10 + $0x58] sm:$0xff] %vm4893_vm1, %v6753_v61  ;;  %6762 = vpow2.f32 %v5485_v20  ;;  %v4292_v45 = vadd.f32 %v9154_v5, %v4291_v17  ;;  %v6454_v46 = vpop.f32.mrb[33].mxu1 }
 0x42f   : > { %6764 = vrcp.f32 %v4718_v31 }
 0x430   : > { %v6755_v38 = vpop.eup %6754  ;;  %v5486_v51 = vmul.f32 -1.442695, %v4292_v45 }
 0x431   : > { %v6757_v29 = vpop.eup %6756  ;;  %v4719_v24 = vadd.f32 1.0, %v6755_v38  ;;  %v4296_v6 = vpop.f32.mrb[34].mxu1 }
 0x432   : > { %4906 = vst.msk [vmem:[%s9195_s10 + $0x60] sm:$0xff] %vm4893_vm1, %v6757_v29  ;;  %6766 = vpow2.f32 %v5486_v51  ;;  %v4297_v37 = vadd.f32 %v9154_v5, %v4296_v6  ;;  %v6457_v55 = vpop.f32.mrb[35].mxu1 }
 0x433   : > { %6768 = vrcp.f32 %v4719_v24 }
 0x434   : > { %v6759_v54 = vpop.eup %6758  ;;  %v5487_v9 = vmul.f32 -1.442695, %v4297_v37 }
 0x435   : > { %v6761_v30 = vpop.eup %6760  ;;  %v4720_v15 = vadd.f32 1.0, %v6759_v54  ;;  %v4301_v22 = vpop.f32.mrb[36].mxu1 }
 0x436   : > { %4907 = vst.msk [vmem:[%s9195_s10 + $0x68] sm:$0xff] %vm4893_vm1, %v6761_v30  ;;  %6770 = vpow2.f32 %v5487_v9  ;;  %v4302_v0 = vadd.f32 %v9154_v5, %v4301_v22  ;;  %v6460_v44 = vpop.f32.mrb[37].mxu1 }
 0x437   : > { %6772 = vrcp.f32 %v4720_v15 }
 0x438   : > { %v6763_v19 = vpop.eup %6762  ;;  %v5488_v41 = vmul.f32 -1.442695, %v4302_v0 }
 0x439   : > { %v6765_v10 = vpop.eup %6764  ;;  %v4721_v2 = vadd.f32 1.0, %v6763_v19  ;;  %v4306_v11 = vpop.f32.mrb[38].mxu1 }
 0x43a   : > { %4908 = vst.msk [vmem:[%s9195_s10 + $0x70] sm:$0xff] %vm4893_vm1, %v6765_v10  ;;  %6774 = vpow2.f32 %v5488_v41  ;;  %v4307_v1 = vadd.f32 %v9154_v5, %v4306_v11  ;;  %v6463_v47 = vpop.f32.mrb[39].mxu1 }
 0x43b   : > { %6776 = vrcp.f32 %v4721_v2 }
 0x43c   : > { %v6767_v63 = vpop.eup %6766  ;;  %v5489_v27 = vmul.f32 -1.442695, %v4307_v1 }
 0x43d   : > { %v6769_v25 = vpop.eup %6768  ;;  %v4722_v42 = vadd.f32 1.0, %v6767_v63  ;;  %v4311_v7 = vpop.f32.mrb[40].mxu1 }
 0x43e   : > { %4909 = vst.msk [vmem:[%s9195_s10 + $0x78] sm:$0xff] %vm4893_vm1, %v6769_v25  ;;  %6778 = vpow2.f32 %v5489_v27  ;;  %v4312_v52 = vadd.f32 %v9154_v5, %v4311_v7  ;;  %v6466_v3 = vpop.f32.mrb[41].mxu1 }
 0x43f   : > { %6780 = vrcp.f32 %v4722_v42 }
 0x440   : > { %v6771_v53 = vpop.eup %6770  ;;  %v5490_v40 = vmul.f32 -1.442695, %v4312_v52 }
 0x441   : > { %v6773_v8 = vpop.eup %6772  ;;  %v4723_v50 = vadd.f32 1.0, %v6771_v53  ;;  %v4316_v36 = vpop.f32.mrb[42].mxu1 }
 0x442   : > { %4910 = vst.msk [vmem:[%s9195_s10 + $0x80] sm:$0xff] %vm4893_vm1, %v6773_v8  ;;  %6782 = vpow2.f32 %v5490_v40  ;;  %v4317_v26 = vadd.f32 %v9154_v5, %v4316_v36  ;;  %v6469_v4 = vpop.f32.mrb[43].mxu1 }
 0x443   : > { %6784 = vrcp.f32 %v4723_v50 }
 0x444   : > { %v6775_v35 = vpop.eup %6774  ;;  %v5491_v21 = vmul.f32 -1.442695, %v4317_v26 }
 0x445   : > { %v6777_v32 = vpop.eup %6776  ;;  %v4724_v48 = vadd.f32 1.0, %v6775_v35  ;;  %v4321_v13 = vpop.f32.mrb[44].mxu1 }
 0x446   : > { %4911 = vst.msk [vmem:[%s9195_s10 + $0x88] sm:$0xff] %vm4893_vm1, %v6777_v32  ;;  %6786 = vpow2.f32 %v5491_v21  ;;  %v4322_v39 = vadd.f32 %v9154_v5, %v4321_v13  ;;  %v6472_v23 = vpop.f32.mrb[45].mxu1 }
 0x447   : > { %6788 = vrcp.f32 %v4724_v48 }
 0x448   : > { %v6779_v34 = vpop.eup %6778  ;;  %v5492_v33 = vmul.f32 -1.442695, %v4322_v39 }
 0x449   : > { %v6781_v43 = vpop.eup %6780  ;;  %v4725_v14 = vadd.f32 1.0, %v6779_v34  ;;  %v4326_v58 = vpop.f32.mrb[46].mxu1 }
 0x44a   : > { %4912 = vst.msk [vmem:[%s9195_s10 + $0x90] sm:$0xff] %vm4893_vm1, %v6781_v43  ;;  %6790 = vpow2.f32 %v5492_v33  ;;  %v4327_v18 = vadd.f32 %v9154_v5, %v4326_v58  ;;  %v6475_v56 = vpop.f32.mrb[47].mxu1 }
 0x44b   : > { %6792 = vrcp.f32 %v4725_v14 }
 0x44c   : > { %v6783_v16 = vpop.eup %6782  ;;  %v5493_v12 = vmul.f32 -1.442695, %v4327_v18 }
 0x44d   : > { %v6785_v28 = vpop.eup %6784  ;;  %v4726_v62 = vadd.f32 1.0, %v6783_v16  ;;  %v4331_v59 = vpop.f32.mrb[48].mxu1 }
 0x44e   : > { %4913 = vst.msk [vmem:[%s9195_s10 + $0x98] sm:$0xff] %vm4893_vm1, %v6785_v28  ;;  %6794 = vpow2.f32 %v5493_v12  ;;  %v4332_v60 = vadd.f32 %v9154_v5, %v4331_v59  ;;  %v6478_v49 = vpop.f32.mrb[49].mxu1 }
 0x44f   : > { %6796 = vrcp.f32 %v4726_v62 }
 0x450   : > { %v6787_v57 = vpop.eup %6786  ;;  %v5494_v20 = vmul.f32 -1.442695, %v4332_v60 }
 0x451   : > { %v6789_v61 = vpop.eup %6788  ;;  %v4727_v31 = vadd.f32 1.0, %v6787_v57  ;;  %v4336_v17 = vpop.f32.mrb[50].mxu1 }
 0x452   : > { %4914 = vst.msk [vmem:[%s9195_s10 + $0xa0] sm:$0xff] %vm4893_vm1, %v6789_v61  ;;  %6798 = vpow2.f32 %v5494_v20  ;;  %v4337_v45 = vadd.f32 %v9154_v5, %v4336_v17  ;;  %v6481_v46 = vpop.f32.mrb[51].mxu1 }
 0x453   : > { %6800 = vrcp.f32 %v4727_v31 }
 0x454   : > { %v6791_v38 = vpop.eup %6790  ;;  %v5495_v51 = vmul.f32 -1.442695, %v4337_v45 }
 0x455   : > { %v6793_v29 = vpop.eup %6792  ;;  %v4728_v24 = vadd.f32 1.0, %v6791_v38  ;;  %v4341_v6 = vpop.f32.mrb[52].mxu1 }
 0x456   : > { %4915 = vst.msk [vmem:[%s9195_s10 + $0xa8] sm:$0xff] %vm4893_vm1, %v6793_v29  ;;  %6802 = vpow2.f32 %v5495_v51  ;;  %v4342_v37 = vadd.f32 %v9154_v5, %v4341_v6  ;;  %v6484_v55 = vpop.f32.mrb[53].mxu1 }
 0x457   : > { %6804 = vrcp.f32 %v4728_v24 }
 0x458   : > { %v6795_v54 = vpop.eup %6794  ;;  %v5496_v9 = vmul.f32 -1.442695, %v4342_v37 }
 0x459   : > { %v6797_v30 = vpop.eup %6796  ;;  %v4729_v15 = vadd.f32 1.0, %v6795_v54  ;;  %v4346_v22 = vpop.f32.mrb[54].mxu1 }
 0x45a   : > { %4916 = vst.msk [vmem:[%s9195_s10 + $0xb0] sm:$0xff] %vm4893_vm1, %v6797_v30  ;;  %6806 = vpow2.f32 %v5496_v9  ;;  %v4347_v0 = vadd.f32 %v9154_v5, %v4346_v22  ;;  %v6487_v44 = vpop.f32.mrb[55].mxu1 }
 0x45b   : > { %6808 = vrcp.f32 %v4729_v15 }
 0x45c   : > { %v6799_v19 = vpop.eup %6798  ;;  %v5497_v41 = vmul.f32 -1.442695, %v4347_v0 }
 0x45d   : > { %v6801_v10 = vpop.eup %6800  ;;  %v4730_v2 = vadd.f32 1.0, %v6799_v19  ;;  %v4351_v11 = vpop.f32.mrb[56].mxu1 }
 0x45e   : > { %4917 = vst.msk [vmem:[%s9195_s10 + $0xb8] sm:$0xff] %vm4893_vm1, %v6801_v10  ;;  %6810 = vpow2.f32 %v5497_v41  ;;  %v4352_v1 = vadd.f32 %v9154_v5, %v4351_v11  ;;  %v6490_v47 = vpop.f32.mrb[57].mxu1 }
 0x45f   : > { %6812 = vrcp.f32 %v4730_v2 }
 0x460   : > { %v6803_v63 = vpop.eup %6802  ;;  %v5498_v27 = vmul.f32 -1.442695, %v4352_v1 }
 0x461   : > { %v6805_v25 = vpop.eup %6804  ;;  %v4731_v42 = vadd.f32 1.0, %v6803_v63  ;;  %v4356_v7 = vpop.f32.mrb[58].mxu1 }
 0x462   : > { %4918 = vst.msk [vmem:[%s9195_s10 + $0xc0] sm:$0xff] %vm4893_vm1, %v6805_v25  ;;  %6814 = vpow2.f32 %v5498_v27  ;;  %v4357_v52 = vadd.f32 %v9154_v5, %v4356_v7  ;;  %v6493_v3 = vpop.f32.mrb[59].mxu1 }
 0x463   : > { %6816 = vrcp.f32 %v4731_v42 }
 0x464   : > { %v6807_v53 = vpop.eup %6806  ;;  %v5499_v40 = vmul.f32 -1.442695, %v4357_v52 }
 0x465   : > { %v6809_v8 = vpop.eup %6808  ;;  %v4732_v50 = vadd.f32 1.0, %v6807_v53  ;;  %v4361_v36 = vpop.f32.mrb[60].mxu1 }
 0x466   : > { %4919 = vst.msk [vmem:[%s9195_s10 + $0xc8] sm:$0xff] %vm4893_vm1, %v6809_v8  ;;  %6818 = vpow2.f32 %v5499_v40  ;;  %v4362_v26 = vadd.f32 %v9154_v5, %v4361_v36  ;;  %v6496_v4 = vpop.f32.mrb[61].mxu1 }
 0x467   : > { %6820 = vrcp.f32 %v4732_v50 }
 0x468   : > { %v6811_v35 = vpop.eup %6810  ;;  %v5500_v21 = vmul.f32 -1.442695, %v4362_v26 }
 0x469   : > { %v6813_v32 = vpop.eup %6812  ;;  %v4733_v48 = vadd.f32 1.0, %v6811_v35  ;;  %v4366_v13 = vpop.f32.mrb[62].mxu1 }
 0x46a   : > { %4920 = vst.msk [vmem:[%s9195_s10 + $0xd0] sm:$0xff] %vm4893_vm1, %v6813_v32  ;;  %6822 = vpow2.f32 %v5500_v21  ;;  %v4367_v39 = vadd.f32 %v9154_v5, %v4366_v13  ;;  %v6499_v23 = vpop.f32.mrb[63].mxu1 }
 0x46b   : > { %6824 = vrcp.f32 %v4733_v48 }
 0x46c   : > { %v6815_v34 = vpop.eup %6814  ;;  %v5501_v33 = vmul.f32 -1.442695, %v4367_v39 }
 0x46d   : > { %v6817_v43 = vpop.eup %6816  ;;  %v4734_v14 = vadd.f32 1.0, %v6815_v34  ;;  %v4371_v58 = vpop.f32.mrb[64].mxu1 }
 0x46e   : > { %4921 = vst.msk [vmem:[%s9195_s10 + $0xd8] sm:$0xff] %vm4893_vm1, %v6817_v43  ;;  %6826 = vpow2.f32 %v5501_v33  ;;  %v4372_v18 = vadd.f32 %v9154_v5, %v4371_v58  ;;  %v6502_v56 = vpop.f32.mrb[65].mxu1 }
 0x46f   : > { %6828 = vrcp.f32 %v4734_v14 }
 0x470   : > { %v6819_v16 = vpop.eup %6818  ;;  %v5502_v12 = vmul.f32 -1.442695, %v4372_v18 }
 0x471   : > { %v6821_v28 = vpop.eup %6820  ;;  %v4735_v62 = vadd.f32 1.0, %v6819_v16  ;;  %v4376_v59 = vpop.f32.mrb[66].mxu1 }
 0x472   : > { %4922 = vst.msk [vmem:[%s9195_s10 + $0xe0] sm:$0xff] %vm4893_vm1, %v6821_v28  ;;  %6830 = vpow2.f32 %v5502_v12  ;;  %v4377_v60 = vadd.f32 %v9154_v5, %v4376_v59  ;;  %v6505_v49 = vpop.f32.mrb[67].mxu1 }
 0x473   : > { %6832 = vrcp.f32 %v4735_v62 }
 0x474   : > { %v6823_v57 = vpop.eup %6822  ;;  %v5503_v20 = vmul.f32 -1.442695, %v4377_v60 }
 0x475   : > { %v6825_v61 = vpop.eup %6824  ;;  %v4736_v31 = vadd.f32 1.0, %v6823_v57  ;;  %v4381_v17 = vpop.f32.mrb[68].mxu1 }
 0x476   : > { %4923 = vst.msk [vmem:[%s9195_s10 + $0xe8] sm:$0xff] %vm4893_vm1, %v6825_v61  ;;  %6834 = vpow2.f32 %v5503_v20  ;;  %v4382_v45 = vadd.f32 %v9154_v5, %v4381_v17  ;;  %v6508_v46 = vpop.f32.mrb[69].mxu1 }
 0x477   : > { %6836 = vrcp.f32 %v4736_v31 }
 0x478   : > { %v6827_v38 = vpop.eup %6826  ;;  %v5504_v51 = vmul.f32 -1.442695, %v4382_v45 }
 0x479   : > { %v6829_v29 = vpop.eup %6828  ;;  %v4737_v24 = vadd.f32 1.0, %v6827_v38  ;;  %v4386_v6 = vpop.f32.mrb[70].mxu1 }
 0x47a   : > { %4924 = vst.msk [vmem:[%s9195_s10 + $0xf0] sm:$0xff] %vm4893_vm1, %v6829_v29  ;;  %6838 = vpow2.f32 %v5504_v51  ;;  %v4387_v37 = vadd.f32 %v9154_v5, %v4386_v6  ;;  %v6511_v55 = vpop.f32.mrb[71].mxu1 }
 0x47b   : > { %6840 = vrcp.f32 %v4737_v24 }
 0x47c   : > { %v6831_v54 = vpop.eup %6830  ;;  %v5505_v9 = vmul.f32 -1.442695, %v4387_v37 }
 0x47d   : > { %v6833_v30 = vpop.eup %6832  ;;  %v4738_v15 = vadd.f32 1.0, %v6831_v54  ;;  %v4391_v22 = vpop.f32.mrb[72].mxu1 }
 0x47e   : > { %4925 = vst.msk [vmem:[%s9195_s10 + $0xf8] sm:$0xff] %vm4893_vm1, %v6833_v30  ;;  %6842 = vpow2.f32 %v5505_v9  ;;  %v4392_v0 = vadd.f32 %v9154_v5, %v4391_v22  ;;  %v6514_v44 = vpop.f32.mrb[73].mxu1 }
 0x47f   : > { %6844 = vrcp.f32 %v4738_v15 }
 0x480   : > { %v6835_v19 = vpop.eup %6834  ;;  %v5506_v41 = vmul.f32 -1.442695, %v4392_v0 }
 0x481   : > { %v6837_v10 = vpop.eup %6836  ;;  %v4739_v2 = vadd.f32 1.0, %v6835_v19  ;;  %v4396_v11 = vpop.f32.mrb[74].mxu1 }
 0x482   : > { %4926 = vst.msk [vmem:[%s9195_s10 + $0x100] sm:$0xff] %vm4893_vm1, %v6837_v10  ;;  %6846 = vpow2.f32 %v5506_v41  ;;  %v4397_v1 = vadd.f32 %v9154_v5, %v4396_v11  ;;  %v6517_v47 = vpop.f32.mrb[75].mxu1 }
 0x483   : > { %6848 = vrcp.f32 %v4739_v2 }
 0x484   : > { %v6839_v63 = vpop.eup %6838  ;;  %v5507_v27 = vmul.f32 -1.442695, %v4397_v1  ;;  %v9336_v1 = vld [vmem:[%s9400_s2 + $0x7a] ss:$0 sm:$0xff] }
 0x485   : > { %v6841_v25 = vpop.eup %6840  ;;  %v4740_v42 = vadd.f32 1.0, %v6839_v63  ;;  %v4401_v7 = vpop.f32.mrb[76].mxu1 }
 0x486   : > { %4927 = vst.msk [vmem:[%s9195_s10 + $0x108] sm:$0xff] %vm4893_vm1, %v6841_v25  ;;  %6850 = vpow2.f32 %v5507_v27  ;;  %v4402_v52 = vadd.f32 %v9154_v5, %v4401_v7  ;;  %v6520_v3 = vpop.f32.mrb[77].mxu1 }
 0x487   : > { %6852 = vrcp.f32 %v4740_v42 }
 0x488   : > { %v6843_v53 = vpop.eup %6842  ;;  %v5508_v40 = vmul.f32 -1.442695, %v4402_v52 }
 0x489   : > { %v6845_v8 = vpop.eup %6844  ;;  %v4741_v50 = vadd.f32 1.0, %v6843_v53  ;;  %v4406_v36 = vpop.f32.mrb[78].mxu1 }
 0x48a   : > { %4928 = vst.msk [vmem:[%s9195_s10 + $0x110] sm:$0xff] %vm4893_vm1, %v6845_v8  ;;  %6854 = vpow2.f32 %v5508_v40  ;;  %v4407_v26 = vadd.f32 %v9154_v5, %v4406_v36  ;;  %v6523_v4 = vpop.f32.mrb[79].mxu1 }
 0x48b   : > { %6856 = vrcp.f32 %v4741_v50 }
 0x48c   : > { %v6847_v35 = vpop.eup %6846  ;;  %v5509_v21 = vmul.f32 -1.442695, %v4407_v26 }
 0x48d   : > { %v6849_v32 = vpop.eup %6848  ;;  %v4742_v48 = vadd.f32 1.0, %v6847_v35  ;;  %v4411_v13 = vpop.f32.mrb[80].mxu1 }
 0x48e   : > { %4929 = vst.msk [vmem:[%s9195_s10 + $0x118] sm:$0xff] %vm4893_vm1, %v6849_v32  ;;  %6858 = vpow2.f32 %v5509_v21  ;;  %v4412_v39 = vadd.f32 %v9154_v5, %v4411_v13  ;;  %v6526_v23 = vpop.f32.mrb[81].mxu1 }
 0x48f   : > { %6860 = vrcp.f32 %v4742_v48 }
 0x490   : > { %v6851_v34 = vpop.eup %6850  ;;  %v5510_v33 = vmul.f32 -1.442695, %v4412_v39 }
 0x491   : > { %v6853_v43 = vpop.eup %6852  ;;  %v4743_v14 = vadd.f32 1.0, %v6851_v34  ;;  %v4416_v58 = vpop.f32.mrb[82].mxu1 }
 0x492   : > { %4930 = vst.msk [vmem:[%s9195_s10 + $0x120] sm:$0xff] %vm4893_vm1, %v6853_v43  ;;  %6862 = vpow2.f32 %v5510_v33  ;;  %v4417_v18 = vadd.f32 %v9154_v5, %v4416_v58  ;;  %v6529_v56 = vpop.f32.mrb[83].mxu1 }
 0x493   : > { %6864 = vrcp.f32 %v4743_v14 }
 0x494   : > { %v6855_v16 = vpop.eup %6854  ;;  %v5511_v12 = vmul.f32 -1.442695, %v4417_v18 }
 0x495   : > { %v6857_v28 = vpop.eup %6856  ;;  %v4744_v62 = vadd.f32 1.0, %v6855_v16  ;;  %v4421_v59 = vpop.f32.mrb[84].mxu1 }
 0x496   : > { %4931 = vst.msk [vmem:[%s9195_s10 + $0x128] sm:$0xff] %vm4893_vm1, %v6857_v28  ;;  %6866 = vpow2.f32 %v5511_v12  ;;  %v4422_v60 = vadd.f32 %v9154_v5, %v4421_v59  ;;  %v6532_v49 = vpop.f32.mrb[85].mxu1 }
 0x497   : > { %6868 = vrcp.f32 %v4744_v62 }
 0x498   : > { %v6859_v57 = vpop.eup %6858  ;;  %v5512_v20 = vmul.f32 -1.442695, %v4422_v60 }
 0x499   : > { %v6861_v61 = vpop.eup %6860  ;;  %v4745_v31 = vadd.f32 1.0, %v6859_v57  ;;  %v4426_v17 = vpop.f32.mrb[86].mxu1 }
 0x49a   : > { %4932 = vst.msk [vmem:[%s9195_s10 + $0x130] sm:$0xff] %vm4893_vm1, %v6861_v61  ;;  %6870 = vpow2.f32 %v5512_v20  ;;  %v4427_v45 = vadd.f32 %v9154_v5, %v4426_v17  ;;  %v6535_v46 = vpop.f32.mrb[87].mxu1 }
 0x49b   : > { %6872 = vrcp.f32 %v4745_v31 }
 0x49c   : > { %v6863_v38 = vpop.eup %6862  ;;  %v5513_v51 = vmul.f32 -1.442695, %v4427_v45 }
 0x49d   : > { %v6865_v29 = vpop.eup %6864  ;;  %v4746_v24 = vadd.f32 1.0, %v6863_v38  ;;  %v4431_v6 = vpop.f32.mrb[88].mxu1 }
 0x49e   : > { %4933 = vst.msk [vmem:[%s9195_s10 + $0x138] sm:$0xff] %vm4893_vm1, %v6865_v29  ;;  %6874 = vpow2.f32 %v5513_v51  ;;  %v4432_v37 = vadd.f32 %v9154_v5, %v4431_v6  ;;  %v6538_v55 = vpop.f32.mrb[89].mxu1 }
 0x49f   : > { %6876 = vrcp.f32 %v4746_v24 }
 0x4a0   : > { %v6867_v54 = vpop.eup %6866  ;;  %v5514_v9 = vmul.f32 -1.442695, %v4432_v37 }
 0x4a1   : > { %v6869_v30 = vpop.eup %6868  ;;  %v4747_v15 = vadd.f32 1.0, %v6867_v54  ;;  %v4436_v22 = vpop.f32.mrb[90].mxu1 }
 0x4a2   : > { %4934 = vst.msk [vmem:[%s9195_s10 + $0x140] sm:$0xff] %vm4893_vm1, %v6869_v30  ;;  %6878 = vpow2.f32 %v5514_v9  ;;  %v4437_v0 = vadd.f32 %v9154_v5, %v4436_v22  ;;  %v6541_v44 = vpop.f32.mrb[91].mxu1 }
 0x4a3   : > { %6880 = vrcp.f32 %v4747_v15 }
 0x4a4   : > { %v6871_v19 = vpop.eup %6870  ;;  %v5515_v41 = vmul.f32 -1.442695, %v4437_v0 }
 0x4a5   : > { %v6873_v10 = vpop.eup %6872  ;;  %v4748_v2 = vadd.f32 1.0, %v6871_v19  ;;  %v4441_v11 = vpop.f32.mrb[92].mxu1 }
 0x4a6   : > { %4935 = vst.msk [vmem:[%s9195_s10 + $0x148] sm:$0xff] %vm4893_vm1, %v6873_v10  ;;  %6882 = vpow2.f32 %v5515_v41  ;;  %v4442_v47 = vadd.f32 %v9336_v1, %v4441_v11  ;;  %v6544_v63 = vpop.f32.mrb[93].mxu1 }
 0x4a7   : > { %6884 = vrcp.f32 %v4748_v2 }
 0x4a8   : > { %v6875_v5 = vpop.eup %6874  ;;  %v5516_v27 = vmul.f32 -1.442695, %v4442_v47 }
 0x4a9   : > { %v6877_v25 = vpop.eup %6876  ;;  %v4749_v42 = vadd.f32 1.0, %v6875_v5  ;;  %v4446_v7 = vpop.f32.mrb[94].mxu1 }
 0x4aa   : > { %4936 = vst.msk [vmem:[%s9195_s10 + $0x150] sm:$0xff] %vm4893_vm1, %v6877_v25  ;;  %6886 = vpow2.f32 %v5516_v27  ;;  %v4447_v52 = vadd.f32 %v9336_v1, %v4446_v7  ;;  %v6547_v3 = vpop.f32.mrb[95].mxu1 }
 0x4ab   : > { %6888 = vrcp.f32 %v4749_v42 }
 0x4ac   : > { %v6879_v53 = vpop.eup %6878  ;;  %v5517_v40 = vmul.f32 -1.442695, %v4447_v52 }
 0x4ad   : > { %v6881_v8 = vpop.eup %6880  ;;  %v4750_v50 = vadd.f32 1.0, %v6879_v53  ;;  %v4451_v36 = vpop.f32.mrb[96].mxu1 }
 0x4ae   : > { %4937 = vst.msk [vmem:[%s9195_s10 + $0x158] sm:$0xff] %vm4893_vm1, %v6881_v8  ;;  %6890 = vpow2.f32 %v5517_v40  ;;  %v4452_v26 = vadd.f32 %v9336_v1, %v4451_v36  ;;  %v6550_v4 = vpop.f32.mrb[97].mxu1 }
 0x4af   : > { %6892 = vrcp.f32 %v4750_v50 }
 0x4b0   : > { %v6883_v35 = vpop.eup %6882  ;;  %v5518_v21 = vmul.f32 -1.442695, %v4452_v26 }
 0x4b1   : > { %v6885_v32 = vpop.eup %6884  ;;  %v4751_v48 = vadd.f32 1.0, %v6883_v35  ;;  %v4456_v13 = vpop.f32.mrb[98].mxu1 }
 0x4b2   : > { %4938 = vst.msk [vmem:[%s9195_s10 + $0x160] sm:$0xff] %vm4893_vm1, %v6885_v32  ;;  %6894 = vpow2.f32 %v5518_v21  ;;  %v4457_v39 = vadd.f32 %v9336_v1, %v4456_v13  ;;  %v6553_v23 = vpop.f32.mrb[99].mxu1 }
 0x4b3   : > { %6896 = vrcp.f32 %v4751_v48 }
 0x4b4   : > { %v6887_v34 = vpop.eup %6886  ;;  %v5519_v33 = vmul.f32 -1.442695, %v4457_v39 }
 0x4b5   : > { %v6889_v43 = vpop.eup %6888  ;;  %v4752_v14 = vadd.f32 1.0, %v6887_v34  ;;  %v4461_v58 = vpop.f32.mrb[100].mxu1 }
 0x4b6   : > { %4939 = vst.msk [vmem:[%s9195_s10 + $0x168] sm:$0xff] %vm4893_vm1, %v6889_v43  ;;  %6898 = vpow2.f32 %v5519_v33  ;;  %v4462_v18 = vadd.f32 %v9336_v1, %v4461_v58  ;;  %v6556_v56 = vpop.f32.mrb[101].mxu1 }
 0x4b7   : > { %6900 = vrcp.f32 %v4752_v14 }
 0x4b8   : > { %v6891_v16 = vpop.eup %6890  ;;  %v5520_v12 = vmul.f32 -1.442695, %v4462_v18 }
 0x4b9   : > { %v6893_v28 = vpop.eup %6892  ;;  %v4753_v62 = vadd.f32 1.0, %v6891_v16  ;;  %v4466_v59 = vpop.f32.mrb[102].mxu1 }
 0x4ba   : > { %4940 = vst.msk [vmem:[%s9195_s10 + $0x170] sm:$0xff] %vm4893_vm1, %v6893_v28  ;;  %6902 = vpow2.f32 %v5520_v12  ;;  %v4467_v60 = vadd.f32 %v9336_v1, %v4466_v59  ;;  %v6559_v49 = vpop.f32.mrb[103].mxu1 }
 0x4bb   : > { %6904 = vrcp.f32 %v4753_v62 }
 0x4bc   : > { %v6895_v57 = vpop.eup %6894  ;;  %v5521_v20 = vmul.f32 -1.442695, %v4467_v60 }
 0x4bd   : > { %v6897_v61 = vpop.eup %6896  ;;  %v4754_v31 = vadd.f32 1.0, %v6895_v57  ;;  %v4471_v17 = vpop.f32.mrb[104].mxu1 }
 0x4be   : > { %4941 = vst.msk [vmem:[%s9195_s10 + $0x178] sm:$0xff] %vm4893_vm1, %v6897_v61  ;;  %6906 = vpow2.f32 %v5521_v20  ;;  %v4472_v45 = vadd.f32 %v9336_v1, %v4471_v17  ;;  %v6562_v46 = vpop.f32.mrb[105].mxu1 }
 0x4bf   : > { %6908 = vrcp.f32 %v4754_v31 }
 0x4c0   : > { %v6899_v38 = vpop.eup %6898  ;;  %v5522_v51 = vmul.f32 -1.442695, %v4472_v45 }
 0x4c1   : > { %v6901_v29 = vpop.eup %6900  ;;  %v4755_v24 = vadd.f32 1.0, %v6899_v38  ;;  %v4476_v6 = vpop.f32.mrb[106].mxu1 }
 0x4c2   : > { %4942 = vst.msk [vmem:[%s9195_s10 + $0x180] sm:$0xff] %vm4893_vm1, %v6901_v29  ;;  %6910 = vpow2.f32 %v5522_v51  ;;  %v4477_v37 = vadd.f32 %v9336_v1, %v4476_v6  ;;  %v6565_v55 = vpop.f32.mrb[107].mxu1 }
 0x4c3   : > { %6912 = vrcp.f32 %v4755_v24 }
 0x4c4   : > { %v6903_v54 = vpop.eup %6902  ;;  %v5523_v9 = vmul.f32 -1.442695, %v4477_v37 }
 0x4c5   : > { %v6905_v30 = vpop.eup %6904  ;;  %v4756_v15 = vadd.f32 1.0, %v6903_v54  ;;  %v4481_v22 = vpop.f32.mrb[108].mxu1 }
 0x4c6   : > { %4943 = vst.msk [vmem:[%s9195_s10 + $0x188] sm:$0xff] %vm4893_vm1, %v6905_v30  ;;  %6914 = vpow2.f32 %v5523_v9  ;;  %v4482_v0 = vadd.f32 %v9336_v1, %v4481_v22  ;;  %v6568_v44 = vpop.f32.mrb[109].mxu1 }
 0x4c7   : > { %6916 = vrcp.f32 %v4756_v15 }
 0x4c8   : > { %v6907_v19 = vpop.eup %6906  ;;  %v5524_v41 = vmul.f32 -1.442695, %v4482_v0 }
 0x4c9   : > { %v6909_v10 = vpop.eup %6908  ;;  %v4757_v2 = vadd.f32 1.0, %v6907_v19  ;;  %v4486_v11 = vpop.f32.mrb[110].mxu1 }
 0x4ca   : > { %4944 = vst.msk [vmem:[%s9195_s10 + $0x190] sm:$0xff] %vm4893_vm1, %v6909_v10  ;;  %6918 = vpow2.f32 %v5524_v41  ;;  %v4487_v47 = vadd.f32 %v9336_v1, %v4486_v11  ;;  %v6571_v63 = vpop.f32.mrb[111].mxu1 }
 0x4cb   : > { %6920 = vrcp.f32 %v4757_v2 }
 0x4cc   : > { %v6911_v5 = vpop.eup %6910  ;;  %v5525_v27 = vmul.f32 -1.442695, %v4487_v47 }
 0x4cd   : > { %v6913_v25 = vpop.eup %6912  ;;  %v4758_v42 = vadd.f32 1.0, %v6911_v5  ;;  %v4491_v7 = vpop.f32.mrb[112].mxu1 }
 0x4ce   : > { %4945 = vst.msk [vmem:[%s9195_s10 + $0x198] sm:$0xff] %vm4893_vm1, %v6913_v25  ;;  %6922 = vpow2.f32 %v5525_v27  ;;  %v4492_v52 = vadd.f32 %v9336_v1, %v4491_v7  ;;  %v6574_v3 = vpop.f32.mrb[113].mxu1 }
 0x4cf   : > { %6924 = vrcp.f32 %v4758_v42 }
 0x4d0   : > { %v6915_v53 = vpop.eup %6914  ;;  %v5526_v40 = vmul.f32 -1.442695, %v4492_v52 }
 0x4d1   : > { %v6917_v8 = vpop.eup %6916  ;;  %v4759_v50 = vadd.f32 1.0, %v6915_v53  ;;  %v4496_v36 = vpop.f32.mrb[114].mxu1 }
 0x4d2   : > { %4946 = vst.msk [vmem:[%s9195_s10 + $0x1a0] sm:$0xff] %vm4893_vm1, %v6917_v8  ;;  %6926 = vpow2.f32 %v5526_v40  ;;  %v4497_v26 = vadd.f32 %v9336_v1, %v4496_v36  ;;  %v6577_v4 = vpop.f32.mrb[115].mxu1 }
 0x4d3   : > { %6928 = vrcp.f32 %v4759_v50 }
 0x4d4   : > { %v6919_v35 = vpop.eup %6918  ;;  %v5527_v21 = vmul.f32 -1.442695, %v4497_v26 }
 0x4d5   : > { %v6921_v32 = vpop.eup %6920  ;;  %v4760_v48 = vadd.f32 1.0, %v6919_v35  ;;  %v4501_v13 = vpop.f32.mrb[116].mxu1 }
 0x4d6   : > { %4947 = vst.msk [vmem:[%s9195_s10 + $0x1a8] sm:$0xff] %vm4893_vm1, %v6921_v32  ;;  %6930 = vpow2.f32 %v5527_v21  ;;  %v4502_v39 = vadd.f32 %v9336_v1, %v4501_v13  ;;  %v6580_v23 = vpop.f32.mrb[117].mxu1 }
 0x4d7   : > { %6932 = vrcp.f32 %v4760_v48 }
 0x4d8   : > { %v6923_v34 = vpop.eup %6922  ;;  %v5528_v33 = vmul.f32 -1.442695, %v4502_v39 }
 0x4d9   : > { %v6925_v43 = vpop.eup %6924  ;;  %v4761_v14 = vadd.f32 1.0, %v6923_v34  ;;  %v4506_v58 = vpop.f32.mrb[118].mxu1 }
 0x4da   : > { %4948 = vst.msk [vmem:[%s9195_s10 + $0x1b0] sm:$0xff] %vm4893_vm1, %v6925_v43  ;;  %6934 = vpow2.f32 %v5528_v33  ;;  %v4507_v18 = vadd.f32 %v9336_v1, %v4506_v58  ;;  %v6583_v56 = vpop.f32.mrb[119].mxu1 }
 0x4db   : > { %6936 = vrcp.f32 %v4761_v14 }
 0x4dc   : > { %v6927_v16 = vpop.eup %6926  ;;  %v5529_v12 = vmul.f32 -1.442695, %v4507_v18 }
 0x4dd   : > { %v6929_v28 = vpop.eup %6928  ;;  %v4762_v62 = vadd.f32 1.0, %v6927_v16  ;;  %v4511_v59 = vpop.f32.mrb[120].mxu1 }
 0x4de   : > { %4949 = vst.msk [vmem:[%s9195_s10 + $0x1b8] sm:$0xff] %vm4893_vm1, %v6929_v28  ;;  %6938 = vpow2.f32 %v5529_v12  ;;  %v4512_v60 = vadd.f32 %v9336_v1, %v4511_v59  ;;  %v6586_v49 = vpop.f32.mrb[121].mxu1 }
 0x4df   : > { %6940 = vrcp.f32 %v4762_v62 }
 0x4e0   : > { %v6931_v57 = vpop.eup %6930  ;;  %v5530_v20 = vmul.f32 -1.442695, %v4512_v60 }
 0x4e1   : > { %v6933_v61 = vpop.eup %6932  ;;  %v4763_v31 = vadd.f32 1.0, %v6931_v57 }
 0x4e2   : > { %4950 = vst.msk [vmem:[%s9195_s10 + $0x1c0] sm:$0xff] %vm4893_vm1, %v6933_v61  ;;  %6942 = vpow2.f32 %v5530_v20 }
 0x4e3   : > { %6944 = vrcp.f32 %v4763_v31 }
 0x4e4   : > { %v6935_v17 = vpop.eup %6934 }
 0x4e5   : > { %v6937_v45 = vpop.eup %6936  ;;  %v4764_v46 = vadd.f32 1.0, %v6935_v17 }
 0x4e6   : > { %4951 = vst.msk [vmem:[%s9195_s10 + $0x1c8] sm:$0xff] %vm4893_vm1, %v6937_v45 }
 0x4e7   : > { %6946 = vrcp.f32 %v4764_v46 }
 0x4e8   : > { %v6939_v1 = vpop.eup %6938 }
 0x4e9   : > { %v6941_v38 = vpop.eup %6940  ;;  %v4765_v51 = vadd.f32 1.0, %v6939_v1 }
 0x4ea   : > { %4952 = vst.msk [vmem:[%s9195_s10 + $0x1d0] sm:$0xff] %vm4893_vm1, %v6941_v38 }
 0x4eb   : > { %6948 = vrcp.f32 %v4765_v51 }
 0x4ec   : > { %v6943_v29 = vpop.eup %6942 }
 0x4ed   : > { %v6945_v24 = vpop.eup %6944  ;;  %v4766_v6 = vadd.f32 1.0, %v6943_v29 }
 0x4ee   : > { %4953 = vst.msk [vmem:[%s9195_s10 + $0x1d8] sm:$0xff] %vm4893_vm1, %v6945_v24 }
 0x4ef   : > { %6950 = vrcp.f32 %v4766_v6 }
 0x4f1   : > { %v6947_v37 = vpop.eup %6946 }
 0x4f2   : > { %4954 = vst.msk [vmem:[%s9195_s10 + $0x1e0] sm:$0xff] %vm4893_vm1, %v6947_v37 }
 0x4f5   : > { %v6949_v55 = vpop.eup %6948 }
 0x4f6   : > { %4955 = vst.msk [vmem:[%s9195_s10 + $0x1e8] sm:$0xff] %vm4893_vm1, %v6949_v55 }
 0x4f9   : > { %v6951_v54 = vpop.eup %6950 }
 0x4fa   : > { %4956 = vst.msk [vmem:[%s9195_s10 + $0x1f0] sm:$0xff] %vm4893_vm1, %v6951_v54 }
 0x4fb PF: > { %s13_s12 = sadd.s32 1, %s6960_s12  }
 0x4fc   : > { %p10_p4 = scmp.ge.s32.totalorder %s13_s12, 4  }
 0x4fe   :  { %12 = sbr.rel (!%p10_p4) target bundleno = 1 (0x1), region = 65 }

</bundles_post_ra>
